<compile_context>
chip_gen: v5e
topology: v5e:2x2
jax: 0.10.0
libtpu: 0.0.40
codegen_flags: <defaults>
</compile_context>

<pallas_src>
import functools

import jax
import jax.numpy as jnp
import numpy as np
from jax.experimental import pallas as pl
from jax.experimental.pallas import tpu as pltpu


def _lstm_kernel(num_layers, T, B, H, *refs):
    G = 4 * H

    # ---- unpack refs: inputs then output (no scratch) ------------------------
    x_ref, weff_ref, beff_ref, whh0_ref = refs[:4]
    off = 4
    wih_up_refs, whh_up_refs, b_up_refs = [], [], []
    for _ in range(1, num_layers):
        wih_up_refs.append(refs[off])
        whh_up_refs.append(refs[off + 1])
        b_up_refs.append(refs[off + 2])
        off += 3
    wfc_ref, bfc_ref, out_ref = refs[off], refs[off + 1], refs[off + 2]

    # ---- hoisted weight loads (stay resident in vregs) -----------------------
    w_hh = [whh0_ref[...]] + [r[...] for r in whh_up_refs]     # each [H, 4H]
    w_ih_up = [r[...] for r in wih_up_refs]                    # each [H, 4H]
    b_up = [r[...] for r in b_up_refs]                         # each [1, 4H]

    # ---- layer-0 pre-activations for all time steps, flat & dense ------------
    # Embedding folded in:  pre0[t*B + b, :] = x[t, b] * w_eff + b_eff
    pre0 = x_ref[...] * weff_ref[...] + beff_ref[...]          # [T*B, 4H]

    def cell(gates, c):
        # gate column order is [i, f, o | g]: one fused sigmoid + one tanh on the
        # gates (plus one tanh on c_new) instead of four per-gate activations.
        sig = jax.nn.sigmoid(gates[:, :3 * H])
        g = jnp.tanh(gates[:, 3 * H:])
        i, f, o = sig[:, :H], sig[:, H:2 * H], sig[:, 2 * H:3 * H]
        c_new = f * c + i * g
        h_new = o * jnp.tanh(c_new)
        return h_new, c_new

    zeros = jnp.zeros((B, H), jnp.float32)
    states = [(zeros, zeros) for _ in range(num_layers)]

    # ---- wavefront over (time, layer): iteration k runs layer l at t = k - l --
    # Within an iteration all active cells read only the previous iteration's
    # states, so they are independent and their latencies overlap.  T and L are
    # static, so the loop is fully unrolled (total state is ~a dozen vregs; no
    # spill risk from the long unrolled trace).
    for k in range(T + num_layers - 1):
        new_states = list(states)
        for l in range(num_layers):
            t = k - l
            if 0 <= t < T:
                h, c = states[l]
                if l == 0:
                    gates = pre0[t * B:(t + 1) * B, :] + jnp.dot(
                        h, w_hh[0], preferred_element_type=jnp.float32)
                else:
                    # h from the layer below at time t was produced in the
                    # previous wavefront iteration -> read the old snapshot.
                    h_below = states[l - 1][0]
                    gates = (jnp.dot(h_below, w_ih_up[l - 1],
                                     preferred_element_type=jnp.float32)
                             + jnp.dot(h, w_hh[l],
                                       preferred_element_type=jnp.float32)
                             + b_up[l - 1])
                new_states[l] = cell(gates, c)
        states = new_states

    # fc(out[:, -1, :]) == fc(h of the last layer at the final time step),
    # done as a VPU lane reduction rather than a 1-lane-output MXU matmul.
    h_last = states[num_layers - 1][0]                          # [B, H]
    out_ref[...] = (jnp.sum(h_last * wfc_ref[...], axis=-1, keepdims=True)
                    + bfc_ref[...])


def lstm_forward(x, params, *, hidden_dim, num_layers, embed_dim):
    B, T = x.shape
    H = hidden_dim
    del embed_dim  # folded into w_eff / b_eff

    def reorder_gates(w):
        # Permute gate columns from PyTorch order [i, f, g, o] to [i, f, o, g]
        # so the kernel can apply one fused sigmoid over the first 3H columns.
        i, f, g, o = jnp.split(w, 4, axis=-1)
        return jnp.concatenate([i, f, o, g], axis=-1)

    # Fold the Linear(1, E) embedding into layer 0 (host-side, tiny one-time math):
    #   (x * w_emb + b_emb) @ w_ih_0 = x * (w_emb @ w_ih_0) + (b_emb @ w_ih_0)
    w_ih0 = params["w_ih_0"]                                    # [E, 4H]
    w_eff = reorder_gates(params["w_emb"] @ w_ih0)              # [1, 4H]
    b_eff = reorder_gates(params["b_emb"] @ w_ih0 + params["b_0"])

    # Time-major, flattened to [T*B, 1] so layer-0 pre-activations are dense vregs.
    x_flat = x.T.reshape(T * B, 1).astype(jnp.float32)

    args = [x_flat, w_eff, b_eff, reorder_gates(params["w_hh_0"])]
    for l in range(1, num_layers):
        args += [reorder_gates(params[f"w_ih_{l}"]),
                 reorder_gates(params[f"w_hh_{l}"]),
                 reorder_gates(params[f"b_{l}"])]
    args += [params["w_fc"].T, params["b_fc"]]                  # w_fc as [1, H]

    kernel = functools.partial(_lstm_kernel, num_layers, T, B, H)
    return pl.pallas_call(
        kernel,
        out_shape=jax.ShapeDtypeStruct((B, 1), jnp.float32),
        in_specs=[pl.BlockSpec(memory_space=pltpu.MemorySpace.VMEM)] * len(args),
        out_specs=pl.BlockSpec(memory_space=pltpu.MemorySpace.VMEM),
        # No scratch: wavefront scheduling removed the [T, B, 4H] ping-pong buffers.
    )(*args)


def init_params(key, input_dim, hidden_dim, num_layers, embed_dim):
    """Deterministic synthetic parameters (PyTorch-style uniform ranges)."""
    E, H = embed_dim, hidden_dim
    params = {}
    keys = iter(jax.random.split(key, 4 + 4 * num_layers))

    k_emb = 1.0  # fan_in = 1
    params["w_emb"] = jax.random.uniform(next(keys), (1, E), jnp.float32, -k_emb, k_emb)
    params["b_emb"] = jax.random.uniform(next(keys), (1, E), jnp.float32, -k_emb, k_emb)

    k_lstm = 1.0 / np.sqrt(H)
    for l in range(num_layers):
        d_in = E if l == 0 else H
        params[f"w_ih_{l}"] = jax.random.uniform(next(keys), (d_in, 4 * H),
                                                 jnp.float32, -k_lstm, k_lstm)
        params[f"w_hh_{l}"] = jax.random.uniform(next(keys), (H, 4 * H),
                                                 jnp.float32, -k_lstm, k_lstm)
        # b = b_ih + b_hh folded into one vector
        params[f"b_{l}"] = jax.random.uniform(next(keys), (1, 4 * H),
                                              jnp.float32, -2 * k_lstm, 2 * k_lstm)

    k_fc = 1.0 / np.sqrt(H)
    params["w_fc"] = jax.random.uniform(next(keys), (H, 1), jnp.float32, -k_fc, k_fc)
    params["b_fc"] = jax.random.uniform(next(keys), (1, 1), jnp.float32, -k_fc, k_fc)
    return params


def lstm_reference(x, params, *, hidden_dim, num_layers, embed_dim):
    """Pure-JAX reference matching the PyTorch forward (eval mode), gate order [i,f,g,o]."""
    B, T = x.shape
    H = hidden_dim
    xe = (x[:, :, None] * params["w_emb"].reshape(1, 1, -1)
          + params["b_emb"].reshape(1, 1, -1))
    inp = xe
    for l in range(num_layers):
        w_ih_t = params[f"w_ih_{l}"]
        w_hh_t = params[f"w_hh_{l}"]
        b = params[f"b_{l}"]
        h = jnp.zeros((B, H), jnp.float32)
        c = jnp.zeros((B, H), jnp.float32)
        outs = []
        for t in range(T):
            gates = inp[:, t, :] @ w_ih_t + h @ w_hh_t + b
            i = jax.nn.sigmoid(gates[:, 0 * H:1 * H])
            f = jax.nn.sigmoid(gates[:, 1 * H:2 * H])
            g = jnp.tanh(gates[:, 2 * H:3 * H])
            o = jax.nn.sigmoid(gates[:, 3 * H:4 * H])
            c = f * c + i * g
            h = o * jnp.tanh(c)
            outs.append(h)
        inp = jnp.stack(outs, axis=1)
    return inp[:, -1, :] @ params["w_fc"] + params["b_fc"]


if __name__ == "__main__":
    input_dim, hidden_dim, num_layers, embed_dim = 16, 32, 2, 8
    batch = 2

    key = jax.random.PRNGKey(0)
    kx, kp = jax.random.split(key)
    x = jax.random.normal(kx, (batch, input_dim), jnp.float32)   # [B, input_dim]
    params = init_params(kp, input_dim, hidden_dim, num_layers, embed_dim)

    out = lstm_forward(x, params, hidden_dim=hidden_dim,
                       num_layers=num_layers, embed_dim=embed_dim)
    out = jax.block_until_ready(out)

    ref = lstm_reference(x, params, hidden_dim=hidden_dim,
                         num_layers=num_layers, embed_dim=embed_dim)
    # 1e-3: kernel fc uses an exact f32 VPU reduction while the reference fc is a
    # TPU matmul; gate matmuls in both paths use default MXU precision.
    np.testing.assert_allclose(np.asarray(out), np.asarray(ref),
                               rtol=1e-3, atol=1e-3)
    print("KERNEL_OK")
</pallas_src>

<mosaic_0001>
module attributes {stable_mosaic.version = 11 : i64} {
  func.func @_lstm_kernel(%arg0: memref<32x1xf32, #tpu.memory_space<vmem>>, %arg1: memref<1x128xf32, #tpu.memory_space<vmem>>, %arg2: memref<1x128xf32, #tpu.memory_space<vmem>>, %arg3: memref<32x128xf32, #tpu.memory_space<vmem>>, %arg4: memref<32x128xf32, #tpu.memory_space<vmem>>, %arg5: memref<32x128xf32, #tpu.memory_space<vmem>>, %arg6: memref<1x128xf32, #tpu.memory_space<vmem>>, %arg7: memref<1x32xf32, #tpu.memory_space<vmem>>, %arg8: memref<1x1xf32, #tpu.memory_space<vmem>>, %arg9: memref<2x1xf32, #tpu.memory_space<vmem>>) attributes {dimension_semantics = [], scalar_prefetch = 0 : i64, scratch_operands = 0 : i64, tpu.core_type = #tpu.core_type<tc>} {
    %c0 = arith.constant 0 : index
    %c0_0 = arith.constant 0 : index
    %0 = vector.load %arg3[%c0, %c0_0] : memref<32x128xf32, #tpu.memory_space<vmem>>, vector<32x128xf32>
    %c0_1 = arith.constant 0 : index
    %c0_2 = arith.constant 0 : index
    %1 = vector.load %arg5[%c0_1, %c0_2] : memref<32x128xf32, #tpu.memory_space<vmem>>, vector<32x128xf32>
    %c0_3 = arith.constant 0 : index
    %c0_4 = arith.constant 0 : index
    %2 = vector.load %arg4[%c0_3, %c0_4] : memref<32x128xf32, #tpu.memory_space<vmem>>, vector<32x128xf32>
    %c0_5 = arith.constant 0 : index
    %c0_6 = arith.constant 0 : index
    %3 = vector.load %arg6[%c0_5, %c0_6] : memref<1x128xf32, #tpu.memory_space<vmem>>, vector<1x128xf32>
    %c0_7 = arith.constant 0 : index
    %c0_8 = arith.constant 0 : index
    %4 = vector.load %arg0[%c0_7, %c0_8] : memref<32x1xf32, #tpu.memory_space<vmem>>, vector<32x1xf32>
    %c0_9 = arith.constant 0 : index
    %c0_10 = arith.constant 0 : index
    %5 = vector.load %arg1[%c0_9, %c0_10] : memref<1x128xf32, #tpu.memory_space<vmem>>, vector<1x128xf32>
    %6 = vector.broadcast %4 : vector<32x1xf32> to vector<32x128xf32>
    %7 = vector.broadcast %5 : vector<1x128xf32> to vector<32x128xf32>
    %8 = arith.mulf %6, %7 : vector<32x128xf32>
    %c0_11 = arith.constant 0 : index
    %c0_12 = arith.constant 0 : index
    %9 = vector.load %arg2[%c0_11, %c0_12] : memref<1x128xf32, #tpu.memory_space<vmem>>, vector<1x128xf32>
    %10 = vector.broadcast %9 : vector<1x128xf32> to vector<32x128xf32>
    %11 = arith.addf %8, %10 : vector<32x128xf32>
    %cst = arith.constant 0.000000e+00 : f32
    %12 = vector.broadcast %cst : f32 to vector<2x32xf32>
    %13 = vector.extract_strided_slice %11 {offsets = [0, 0], sizes = [2, 128], strides = [1, 1]} : vector<32x128xf32> to vector<2x128xf32>
    %cst_13 = arith.constant dense<0.000000e+00> : vector<2x128xf32>
    %14 = tpu.matmul %12, %0, %cst_13 {dimension_numbers = #tpu.dot_dimension_numbers<[1], [0], [0], [1], [0, 0, 1, 1], [], []>} : vector<2x32xf32>, vector<32x128xf32>, vector<2x128xf32> -> vector<2x128xf32>
    %15 = arith.addf %13, %14 : vector<2x128xf32>
    %16 = vector.extract_strided_slice %15 {offsets = [0, 0], sizes = [2, 96], strides = [1, 1]} : vector<2x128xf32> to vector<2x96xf32>
    %17 = arith.negf %16 : vector<2x96xf32>
    %18 = math.exp %17 : vector<2x96xf32>
    %cst_14 = arith.constant 1.000000e+00 : f32
    %19 = vector.broadcast %cst_14 : f32 to vector<2x96xf32>
    %20 = arith.addf %19, %18 : vector<2x96xf32>
    %21 = arith.divf %19, %20 : vector<2x96xf32>
    %22 = vector.extract_strided_slice %15 {offsets = [0, 96], sizes = [2, 32], strides = [1, 1]} : vector<2x128xf32> to vector<2x32xf32>
    %23 = math.tanh %22 : vector<2x32xf32>
    %24 = vector.extract_strided_slice %21 {offsets = [0, 0], sizes = [2, 32], strides = [1, 1]} : vector<2x96xf32> to vector<2x32xf32>
    %25 = vector.extract_strided_slice %21 {offsets = [0, 32], sizes = [2, 32], strides = [1, 1]} : vector<2x96xf32> to vector<2x32xf32>
    %26 = vector.extract_strided_slice %21 {offsets = [0, 64], sizes = [2, 32], strides = [1, 1]} : vector<2x96xf32> to vector<2x32xf32>
    %27 = arith.mulf %25, %12 : vector<2x32xf32>
    %28 = arith.mulf %24, %23 : vector<2x32xf32>
    %29 = arith.addf %27, %28 : vector<2x32xf32>
    %30 = math.tanh %29 : vector<2x32xf32>
    %31 = arith.mulf %26, %30 : vector<2x32xf32>
    %32 = vector.extract_strided_slice %11 {offsets = [2, 0], sizes = [2, 128], strides = [1, 1]} : vector<32x128xf32> to vector<2x128xf32>
    %cst_15 = arith.constant dense<0.000000e+00> : vector<2x128xf32>
    %33 = tpu.matmul %31, %0, %cst_15 {dimension_numbers = #tpu.dot_dimension_numbers<[1], [0], [0], [1], [0, 0, 1, 1], [], []>} : vector<2x32xf32>, vector<32x128xf32>, vector<2x128xf32> -> vector<2x128xf32>
    %34 = arith.addf %32, %33 : vector<2x128xf32>
    %35 = vector.extract_strided_slice %34 {offsets = [0, 0], sizes = [2, 96], strides = [1, 1]} : vector<2x128xf32> to vector<2x96xf32>
    %36 = arith.negf %35 : vector<2x96xf32>
    %37 = math.exp %36 : vector<2x96xf32>
    %cst_16 = arith.constant 1.000000e+00 : f32
    %38 = vector.broadcast %cst_16 : f32 to vector<2x96xf32>
    %39 = arith.addf %38, %37 : vector<2x96xf32>
    %40 = arith.divf %38, %39 : vector<2x96xf32>
    %41 = vector.extract_strided_slice %34 {offsets = [0, 96], sizes = [2, 32], strides = [1, 1]} : vector<2x128xf32> to vector<2x32xf32>
    %42 = math.tanh %41 : vector<2x32xf32>
    %43 = vector.extract_strided_slice %40 {offsets = [0, 0], sizes = [2, 32], strides = [1, 1]} : vector<2x96xf32> to vector<2x32xf32>
    %44 = vector.extract_strided_slice %40 {offsets = [0, 32], sizes = [2, 32], strides = [1, 1]} : vector<2x96xf32> to vector<2x32xf32>
    %45 = vector.extract_strided_slice %40 {offsets = [0, 64], sizes = [2, 32], strides = [1, 1]} : vector<2x96xf32> to vector<2x32xf32>
    %46 = arith.mulf %44, %29 : vector<2x32xf32>
    %47 = arith.mulf %43, %42 : vector<2x32xf32>
    %48 = arith.addf %46, %47 : vector<2x32xf32>
    %49 = math.tanh %48 : vector<2x32xf32>
    %50 = arith.mulf %45, %49 : vector<2x32xf32>
    %cst_17 = arith.constant dense<0.000000e+00> : vector<2x128xf32>
    %51 = tpu.matmul %31, %2, %cst_17 {dimension_numbers = #tpu.dot_dimension_numbers<[1], [0], [0], [1], [0, 0, 1, 1], [], []>} : vector<2x32xf32>, vector<32x128xf32>, vector<2x128xf32> -> vector<2x128xf32>
    %cst_18 = arith.constant dense<0.000000e+00> : vector<2x128xf32>
    %52 = tpu.matmul %12, %1, %cst_18 {dimension_numbers = #tpu.dot_dimension_numbers<[1], [0], [0], [1], [0, 0, 1, 1], [], []>} : vector<2x32xf32>, vector<32x128xf32>, vector<2x128xf32> -> vector<2x128xf32>
    %53 = arith.addf %51, %52 : vector<2x128xf32>
    %54 = vector.broadcast %3 : vector<1x128xf32> to vector<2x128xf32>
    %55 = arith.addf %53, %54 : vector<2x128xf32>
    %56 = vector.extract_strided_slice %55 {offsets = [0, 0], sizes = [2, 96], strides = [1, 1]} : vector<2x128xf32> to vector<2x96xf32>
    %57 = arith.negf %56 : vector<2x96xf32>
    %58 = math.exp %57 : vector<2x96xf32>
    %cst_19 = arith.constant 1.000000e+00 : f32
    %59 = vector.broadcast %cst_19 : f32 to vector<2x96xf32>
    %60 = arith.addf %59, %58 : vector<2x96xf32>
    %61 = arith.divf %59, %60 : vector<2x96xf32>
    %62 = vector.extract_strided_slice %55 {offsets = [0, 96], sizes = [2, 32], strides = [1, 1]} : vector<2x128xf32> to vector<2x32xf32>
    %63 = math.tanh %62 : vector<2x32xf32>
    %64 = vector.extract_strided_slice %61 {offsets = [0, 0], sizes = [2, 32], strides = [1, 1]} : vector<2x96xf32> to vector<2x32xf32>
    %65 = vector.extract_strided_slice %61 {offsets = [0, 32], sizes = [2, 32], strides = [1, 1]} : vector<2x96xf32> to vector<2x32xf32>
    %66 = vector.extract_strided_slice %61 {offsets = [0, 64], sizes = [2, 32], strides = [1, 1]} : vector<2x96xf32> to vector<2x32xf32>
    %67 = arith.mulf %65, %12 : vector<2x32xf32>
    %68 = arith.mulf %64, %63 : vector<2x32xf32>
    %69 = arith.addf %67, %68 : vector<2x32xf32>
    %70 = math.tanh %69 : vector<2x32xf32>
    %71 = arith.mulf %66, %70 : vector<2x32xf32>
    %72 = vector.extract_strided_slice %11 {offsets = [4, 0], sizes = [2, 128], strides = [1, 1]} : vector<32x128xf32> to vector<2x128xf32>
    %cst_20 = arith.constant dense<0.000000e+00> : vector<2x128xf32>
    %73 = tpu.matmul %50, %0, %cst_20 {dimension_numbers = #tpu.dot_dimension_numbers<[1], [0], [0], [1], [0, 0, 1, 1], [], []>} : vector<2x32xf32>, vector<32x128xf32>, vector<2x128xf32> -> vector<2x128xf32>
    %74 = arith.addf %72, %73 : vector<2x128xf32>
    %75 = vector.extract_strided_slice %74 {offsets = [0, 0], sizes = [2, 96], strides = [1, 1]} : vector<2x128xf32> to vector<2x96xf32>
    %76 = arith.negf %75 : vector<2x96xf32>
    %77 = math.exp %76 : vector<2x96xf32>
    %cst_21 = arith.constant 1.000000e+00 : f32
    %78 = vector.broadcast %cst_21 : f32 to vector<2x96xf32>
    %79 = arith.addf %78, %77 : vector<2x96xf32>
    %80 = arith.divf %78, %79 : vector<2x96xf32>
    %81 = vector.extract_strided_slice %74 {offsets = [0, 96], sizes = [2, 32], strides = [1, 1]} : vector<2x128xf32> to vector<2x32xf32>
    %82 = math.tanh %81 : vector<2x32xf32>
    %83 = vector.extract_strided_slice %80 {offsets = [0, 0], sizes = [2, 32], strides = [1, 1]} : vector<2x96xf32> to vector<2x32xf32>
    %84 = vector.extract_strided_slice %80 {offsets = [0, 32], sizes = [2, 32], strides = [1, 1]} : vector<2x96xf32> to vector<2x32xf32>
    %85 = vector.extract_strided_slice %80 {offsets = [0, 64], sizes = [2, 32], strides = [1, 1]} : vector<2x96xf32> to vector<2x32xf32>
    %86 = arith.mulf %84, %48 : vector<2x32xf32>
    %87 = arith.mulf %83, %82 : vector<2x32xf32>
    %88 = arith.addf %86, %87 : vector<2x32xf32>
    %89 = math.tanh %88 : vector<2x32xf32>
    %90 = arith.mulf %85, %89 : vector<2x32xf32>
    %cst_22 = arith.constant dense<0.000000e+00> : vector<2x128xf32>
    %91 = tpu.matmul %50, %2, %cst_22 {dimension_numbers = #tpu.dot_dimension_numbers<[1], [0], [0], [1], [0, 0, 1, 1], [], []>} : vector<2x32xf32>, vector<32x128xf32>, vector<2x128xf32> -> vector<2x128xf32>
    %cst_23 = arith.constant dense<0.000000e+00> : vector<2x128xf32>
    %92 = tpu.matmul %71, %1, %cst_23 {dimension_numbers = #tpu.dot_dimension_numbers<[1], [0], [0], [1], [0, 0, 1, 1], [], []>} : vector<2x32xf32>, vector<32x128xf32>, vector<2x128xf32> -> vector<2x128xf32>
    %93 = arith.addf %91, %92 : vector<2x128xf32>
    %94 = vector.broadcast %3 : vector<1x128xf32> to vector<2x128xf32>
    %95 = arith.addf %93, %94 : vector<2x128xf32>
    %96 = vector.extract_strided_slice %95 {offsets = [0, 0], sizes = [2, 96], strides = [1, 1]} : vector<2x128xf32> to vector<2x96xf32>
    %97 = arith.negf %96 : vector<2x96xf32>
    %98 = math.exp %97 : vector<2x96xf32>
    %cst_24 = arith.constant 1.000000e+00 : f32
    %99 = vector.broadcast %cst_24 : f32 to vector<2x96xf32>
    %100 = arith.addf %99, %98 : vector<2x96xf32>
    %101 = arith.divf %99, %100 : vector<2x96xf32>
    %102 = vector.extract_strided_slice %95 {offsets = [0, 96], sizes = [2, 32], strides = [1, 1]} : vector<2x128xf32> to vector<2x32xf32>
    %103 = math.tanh %102 : vector<2x32xf32>
    %104 = vector.extract_strided_slice %101 {offsets = [0, 0], sizes = [2, 32], strides = [1, 1]} : vector<2x96xf32> to vector<2x32xf32>
    %105 = vector.extract_strided_slice %101 {offsets = [0, 32], sizes = [2, 32], strides = [1, 1]} : vector<2x96xf32> to vector<2x32xf32>
    %106 = vector.extract_strided_slice %101 {offsets = [0, 64], sizes = [2, 32], strides = [1, 1]} : vector<2x96xf32> to vector<2x32xf32>
    %107 = arith.mulf %105, %69 : vector<2x32xf32>
    %108 = arith.mulf %104, %103 : vector<2x32xf32>
    %109 = arith.addf %107, %108 : vector<2x32xf32>
    %110 = math.tanh %109 : vector<2x32xf32>
    %111 = arith.mulf %106, %110 : vector<2x32xf32>
    %112 = vector.extract_strided_slice %11 {offsets = [6, 0], sizes = [2, 128], strides = [1, 1]} : vector<32x128xf32> to vector<2x128xf32>
    %cst_25 = arith.constant dense<0.000000e+00> : vector<2x128xf32>
    %113 = tpu.matmul %90, %0, %cst_25 {dimension_numbers = #tpu.dot_dimension_numbers<[1], [0], [0], [1], [0, 0, 1, 1], [], []>} : vector<2x32xf32>, vector<32x128xf32>, vector<2x128xf32> -> vector<2x128xf32>
    %114 = arith.addf %112, %113 : vector<2x128xf32>
    %115 = vector.extract_strided_slice %114 {offsets = [0, 0], sizes = [2, 96], strides = [1, 1]} : vector<2x128xf32> to vector<2x96xf32>
    %116 = arith.negf %115 : vector<2x96xf32>
    %117 = math.exp %116 : vector<2x96xf32>
    %cst_26 = arith.constant 1.000000e+00 : f32
    %118 = vector.broadcast %cst_26 : f32 to vector<2x96xf32>
    %119 = arith.addf %118, %117 : vector<2x96xf32>
    %120 = arith.divf %118, %119 : vector<2x96xf32>
    %121 = vector.extract_strided_slice %114 {offsets = [0, 96], sizes = [2, 32], strides = [1, 1]} : vector<2x128xf32> to vector<2x32xf32>
    %122 = math.tanh %121 : vector<2x32xf32>
    %123 = vector.extract_strided_slice %120 {offsets = [0, 0], sizes = [2, 32], strides = [1, 1]} : vector<2x96xf32> to vector<2x32xf32>
    %124 = vector.extract_strided_slice %120 {offsets = [0, 32], sizes = [2, 32], strides = [1, 1]} : vector<2x96xf32> to vector<2x32xf32>
    %125 = vector.extract_strided_slice %120 {offsets = [0, 64], sizes = [2, 32], strides = [1, 1]} : vector<2x96xf32> to vector<2x32xf32>
    %126 = arith.mulf %124, %88 : vector<2x32xf32>
    %127 = arith.mulf %123, %122 : vector<2x32xf32>
    %128 = arith.addf %126, %127 : vector<2x32xf32>
    %129 = math.tanh %128 : vector<2x32xf32>
    %130 = arith.mulf %125, %129 : vector<2x32xf32>
    %cst_27 = arith.constant dense<0.000000e+00> : vector<2x128xf32>
    %131 = tpu.matmul %90, %2, %cst_27 {dimension_numbers = #tpu.dot_dimension_numbers<[1], [0], [0], [1], [0, 0, 1, 1], [], []>} : vector<2x32xf32>, vector<32x128xf32>, vector<2x128xf32> -> vector<2x128xf32>
    %cst_28 = arith.constant dense<0.000000e+00> : vector<2x128xf32>
    %132 = tpu.matmul %111, %1, %cst_28 {dimension_numbers = #tpu.dot_dimension_numbers<[1], [0], [0], [1], [0, 0, 1, 1], [], []>} : vector<2x32xf32>, vector<32x128xf32>, vector<2x128xf32> -> vector<2x128xf32>
    %133 = arith.addf %131, %132 : vector<2x128xf32>
    %134 = vector.broadcast %3 : vector<1x128xf32> to vector<2x128xf32>
    %135 = arith.addf %133, %134 : vector<2x128xf32>
    %136 = vector.extract_strided_slice %135 {offsets = [0, 0], sizes = [2, 96], strides = [1, 1]} : vector<2x128xf32> to vector<2x96xf32>
    %137 = arith.negf %136 : vector<2x96xf32>
    %138 = math.exp %137 : vector<2x96xf32>
    %cst_29 = arith.constant 1.000000e+00 : f32
    %139 = vector.broadcast %cst_29 : f32 to vector<2x96xf32>
    %140 = arith.addf %139, %138 : vector<2x96xf32>
    %141 = arith.divf %139, %140 : vector<2x96xf32>
    %142 = vector.extract_strided_slice %135 {offsets = [0, 96], sizes = [2, 32], strides = [1, 1]} : vector<2x128xf32> to vector<2x32xf32>
    %143 = math.tanh %142 : vector<2x32xf32>
    %144 = vector.extract_strided_slice %141 {offsets = [0, 0], sizes = [2, 32], strides = [1, 1]} : vector<2x96xf32> to vector<2x32xf32>
    %145 = vector.extract_strided_slice %141 {offsets = [0, 32], sizes = [2, 32], strides = [1, 1]} : vector<2x96xf32> to vector<2x32xf32>
    %146 = vector.extract_strided_slice %141 {offsets = [0, 64], sizes = [2, 32], strides = [1, 1]} : vector<2x96xf32> to vector<2x32xf32>
    %147 = arith.mulf %145, %109 : vector<2x32xf32>
    %148 = arith.mulf %144, %143 : vector<2x32xf32>
    %149 = arith.addf %147, %148 : vector<2x32xf32>
    %150 = math.tanh %149 : vector<2x32xf32>
    %151 = arith.mulf %146, %150 : vector<2x32xf32>
    %152 = vector.extract_strided_slice %11 {offsets = [8, 0], sizes = [2, 128], strides = [1, 1]} : vector<32x128xf32> to vector<2x128xf32>
    %cst_30 = arith.constant dense<0.000000e+00> : vector<2x128xf32>
    %153 = tpu.matmul %130, %0, %cst_30 {dimension_numbers = #tpu.dot_dimension_numbers<[1], [0], [0], [1], [0, 0, 1, 1], [], []>} : vector<2x32xf32>, vector<32x128xf32>, vector<2x128xf32> -> vector<2x128xf32>
    %154 = arith.addf %152, %153 : vector<2x128xf32>
    %155 = vector.extract_strided_slice %154 {offsets = [0, 0], sizes = [2, 96], strides = [1, 1]} : vector<2x128xf32> to vector<2x96xf32>
    %156 = arith.negf %155 : vector<2x96xf32>
    %157 = math.exp %156 : vector<2x96xf32>
    %cst_31 = arith.constant 1.000000e+00 : f32
    %158 = vector.broadcast %cst_31 : f32 to vector<2x96xf32>
    %159 = arith.addf %158, %157 : vector<2x96xf32>
    %160 = arith.divf %158, %159 : vector<2x96xf32>
    %161 = vector.extract_strided_slice %154 {offsets = [0, 96], sizes = [2, 32], strides = [1, 1]} : vector<2x128xf32> to vector<2x32xf32>
    %162 = math.tanh %161 : vector<2x32xf32>
    %163 = vector.extract_strided_slice %160 {offsets = [0, 0], sizes = [2, 32], strides = [1, 1]} : vector<2x96xf32> to vector<2x32xf32>
    %164 = vector.extract_strided_slice %160 {offsets = [0, 32], sizes = [2, 32], strides = [1, 1]} : vector<2x96xf32> to vector<2x32xf32>
    %165 = vector.extract_strided_slice %160 {offsets = [0, 64], sizes = [2, 32], strides = [1, 1]} : vector<2x96xf32> to vector<2x32xf32>
    %166 = arith.mulf %164, %128 : vector<2x32xf32>
    %167 = arith.mulf %163, %162 : vector<2x32xf32>
    %168 = arith.addf %166, %167 : vector<2x32xf32>
    %169 = math.tanh %168 : vector<2x32xf32>
    %170 = arith.mulf %165, %169 : vector<2x32xf32>
    %cst_32 = arith.constant dense<0.000000e+00> : vector<2x128xf32>
    %171 = tpu.matmul %130, %2, %cst_32 {dimension_numbers = #tpu.dot_dimension_numbers<[1], [0], [0], [1], [0, 0, 1, 1], [], []>} : vector<2x32xf32>, vector<32x128xf32>, vector<2x128xf32> -> vector<2x128xf32>
    %cst_33 = arith.constant dense<0.000000e+00> : vector<2x128xf32>
    %172 = tpu.matmul %151, %1, %cst_33 {dimension_numbers = #tpu.dot_dimension_numbers<[1], [0], [0], [1], [0, 0, 1, 1], [], []>} : vector<2x32xf32>, vector<32x128xf32>, vector<2x128xf32> -> vector<2x128xf32>
    %173 = arith.addf %171, %172 : vector<2x128xf32>
    %174 = vector.broadcast %3 : vector<1x128xf32> to vector<2x128xf32>
    %175 = arith.addf %173, %174 : vector<2x128xf32>
    %176 = vector.extract_strided_slice %175 {offsets = [0, 0], sizes = [2, 96], strides = [1, 1]} : vector<2x128xf32> to vector<2x96xf32>
    %177 = arith.negf %176 : vector<2x96xf32>
    %178 = math.exp %177 : vector<2x96xf32>
    %cst_34 = arith.constant 1.000000e+00 : f32
    %179 = vector.broadcast %cst_34 : f32 to vector<2x96xf32>
    %180 = arith.addf %179, %178 : vector<2x96xf32>
    %181 = arith.divf %179, %180 : vector<2x96xf32>
    %182 = vector.extract_strided_slice %175 {offsets = [0, 96], sizes = [2, 32], strides = [1, 1]} : vector<2x128xf32> to vector<2x32xf32>
    %183 = math.tanh %182 : vector<2x32xf32>
    %184 = vector.extract_strided_slice %181 {offsets = [0, 0], sizes = [2, 32], strides = [1, 1]} : vector<2x96xf32> to vector<2x32xf32>
    %185 = vector.extract_strided_slice %181 {offsets = [0, 32], sizes = [2, 32], strides = [1, 1]} : vector<2x96xf32> to vector<2x32xf32>
    %186 = vector.extract_strided_slice %181 {offsets = [0, 64], sizes = [2, 32], strides = [1, 1]} : vector<2x96xf32> to vector<2x32xf32>
    %187 = arith.mulf %185, %149 : vector<2x32xf32>
    %188 = arith.mulf %184, %183 : vector<2x32xf32>
    %189 = arith.addf %187, %188 : vector<2x32xf32>
    %190 = math.tanh %189 : vector<2x32xf32>
    %191 = arith.mulf %186, %190 : vector<2x32xf32>
    %192 = vector.extract_strided_slice %11 {offsets = [10, 0], sizes = [2, 128], strides = [1, 1]} : vector<32x128xf32> to vector<2x128xf32>
    %cst_35 = arith.constant dense<0.000000e+00> : vector<2x128xf32>
    %193 = tpu.matmul %170, %0, %cst_35 {dimension_numbers = #tpu.dot_dimension_numbers<[1], [0], [0], [1], [0, 0, 1, 1], [], []>} : vector<2x32xf32>, vector<32x128xf32>, vector<2x128xf32> -> vector<2x128xf32>
    %194 = arith.addf %192, %193 : vector<2x128xf32>
    %195 = vector.extract_strided_slice %194 {offsets = [0, 0], sizes = [2, 96], strides = [1, 1]} : vector<2x128xf32> to vector<2x96xf32>
    %196 = arith.negf %195 : vector<2x96xf32>
    %197 = math.exp %196 : vector<2x96xf32>
    %cst_36 = arith.constant 1.000000e+00 : f32
    %198 = vector.broadcast %cst_36 : f32 to vector<2x96xf32>
    %199 = arith.addf %198, %197 : vector<2x96xf32>
    %200 = arith.divf %198, %199 : vector<2x96xf32>
    %201 = vector.extract_strided_slice %194 {offsets = [0, 96], sizes = [2, 32], strides = [1, 1]} : vector<2x128xf32> to vector<2x32xf32>
    %202 = math.tanh %201 : vector<2x32xf32>
    %203 = vector.extract_strided_slice %200 {offsets = [0, 0], sizes = [2, 32], strides = [1, 1]} : vector<2x96xf32> to vector<2x32xf32>
    %204 = vector.extract_strided_slice %200 {offsets = [0, 32], sizes = [2, 32], strides = [1, 1]} : vector<2x96xf32> to vector<2x32xf32>
    %205 = vector.extract_strided_slice %200 {offsets = [0, 64], sizes = [2, 32], strides = [1, 1]} : vector<2x96xf32> to vector<2x32xf32>
    %206 = arith.mulf %204, %168 : vector<2x32xf32>
    %207 = arith.mulf %203, %202 : vector<2x32xf32>
    %208 = arith.addf %206, %207 : vector<2x32xf32>
    %209 = math.tanh %208 : vector<2x32xf32>
    %210 = arith.mulf %205, %209 : vector<2x32xf32>
    %cst_37 = arith.constant dense<0.000000e+00> : vector<2x128xf32>
    %211 = tpu.matmul %170, %2, %cst_37 {dimension_numbers = #tpu.dot_dimension_numbers<[1], [0], [0], [1], [0, 0, 1, 1], [], []>} : vector<2x32xf32>, vector<32x128xf32>, vector<2x128xf32> -> vector<2x128xf32>
    %cst_38 = arith.constant dense<0.000000e+00> : vector<2x128xf32>
    %212 = tpu.matmul %191, %1, %cst_38 {dimension_numbers = #tpu.dot_dimension_numbers<[1], [0], [0], [1], [0, 0, 1, 1], [], []>} : vector<2x32xf32>, vector<32x128xf32>, vector<2x128xf32> -> vector<2x128xf32>
    %213 = arith.addf %211, %212 : vector<2x128xf32>
    %214 = vector.broadcast %3 : vector<1x128xf32> to vector<2x128xf32>
    %215 = arith.addf %213, %214 : vector<2x128xf32>
    %216 = vector.extract_strided_slice %215 {offsets = [0, 0], sizes = [2, 96], strides = [1, 1]} : vector<2x128xf32> to vector<2x96xf32>
    %217 = arith.negf %216 : vector<2x96xf32>
    %218 = math.exp %217 : vector<2x96xf32>
    %cst_39 = arith.constant 1.000000e+00 : f32
    %219 = vector.broadcast %cst_39 : f32 to vector<2x96xf32>
    %220 = arith.addf %219, %218 : vector<2x96xf32>
    %221 = arith.divf %219, %220 : vector<2x96xf32>
    %222 = vector.extract_strided_slice %215 {offsets = [0, 96], sizes = [2, 32], strides = [1, 1]} : vector<2x128xf32> to vector<2x32xf32>
    %223 = math.tanh %222 : vector<2x32xf32>
    %224 = vector.extract_strided_slice %221 {offsets = [0, 0], sizes = [2, 32], strides = [1, 1]} : vector<2x96xf32> to vector<2x32xf32>
    %225 = vector.extract_strided_slice %221 {offsets = [0, 32], sizes = [2, 32], strides = [1, 1]} : vector<2x96xf32> to vector<2x32xf32>
    %226 = vector.extract_strided_slice %221 {offsets = [0, 64], sizes = [2, 32], strides = [1, 1]} : vector<2x96xf32> to vector<2x32xf32>
    %227 = arith.mulf %225, %189 : vector<2x32xf32>
    %228 = arith.mulf %224, %223 : vector<2x32xf32>
    %229 = arith.addf %227, %228 : vector<2x32xf32>
    %230 = math.tanh %229 : vector<2x32xf32>
    %231 = arith.mulf %226, %230 : vector<2x32xf32>
    %232 = vector.extract_strided_slice %11 {offsets = [12, 0], sizes = [2, 128], strides = [1, 1]} : vector<32x128xf32> to vector<2x128xf32>
    %cst_40 = arith.constant dense<0.000000e+00> : vector<2x128xf32>
    %233 = tpu.matmul %210, %0, %cst_40 {dimension_numbers = #tpu.dot_dimension_numbers<[1], [0], [0], [1], [0, 0, 1, 1], [], []>} : vector<2x32xf32>, vector<32x128xf32>, vector<2x128xf32> -> vector<2x128xf32>
    %234 = arith.addf %232, %233 : vector<2x128xf32>
    %235 = vector.extract_strided_slice %234 {offsets = [0, 0], sizes = [2, 96], strides = [1, 1]} : vector<2x128xf32> to vector<2x96xf32>
    %236 = arith.negf %235 : vector<2x96xf32>
    %237 = math.exp %236 : vector<2x96xf32>
    %cst_41 = arith.constant 1.000000e+00 : f32
    %238 = vector.broadcast %cst_41 : f32 to vector<2x96xf32>
    %239 = arith.addf %238, %237 : vector<2x96xf32>
    %240 = arith.divf %238, %239 : vector<2x96xf32>
    %241 = vector.extract_strided_slice %234 {offsets = [0, 96], sizes = [2, 32], strides = [1, 1]} : vector<2x128xf32> to vector<2x32xf32>
    %242 = math.tanh %241 : vector<2x32xf32>
    %243 = vector.extract_strided_slice %240 {offsets = [0, 0], sizes = [2, 32], strides = [1, 1]} : vector<2x96xf32> to vector<2x32xf32>
    %244 = vector.extract_strided_slice %240 {offsets = [0, 32], sizes = [2, 32], strides = [1, 1]} : vector<2x96xf32> to vector<2x32xf32>
    %245 = vector.extract_strided_slice %240 {offsets = [0, 64], sizes = [2, 32], strides = [1, 1]} : vector<2x96xf32> to vector<2x32xf32>
    %246 = arith.mulf %244, %208 : vector<2x32xf32>
    %247 = arith.mulf %243, %242 : vector<2x32xf32>
    %248 = arith.addf %246, %247 : vector<2x32xf32>
    %249 = math.tanh %248 : vector<2x32xf32>
    %250 = arith.mulf %245, %249 : vector<2x32xf32>
    %cst_42 = arith.constant dense<0.000000e+00> : vector<2x128xf32>
    %251 = tpu.matmul %210, %2, %cst_42 {dimension_numbers = #tpu.dot_dimension_numbers<[1], [0], [0], [1], [0, 0, 1, 1], [], []>} : vector<2x32xf32>, vector<32x128xf32>, vector<2x128xf32> -> vector<2x128xf32>
    %cst_43 = arith.constant dense<0.000000e+00> : vector<2x128xf32>
    %252 = tpu.matmul %231, %1, %cst_43 {dimension_numbers = #tpu.dot_dimension_numbers<[1], [0], [0], [1], [0, 0, 1, 1], [], []>} : vector<2x32xf32>, vector<32x128xf32>, vector<2x128xf32> -> vector<2x128xf32>
    %253 = arith.addf %251, %252 : vector<2x128xf32>
    %254 = vector.broadcast %3 : vector<1x128xf32> to vector<2x128xf32>
    %255 = arith.addf %253, %254 : vector<2x128xf32>
    %256 = vector.extract_strided_slice %255 {offsets = [0, 0], sizes = [2, 96], strides = [1, 1]} : vector<2x128xf32> to vector<2x96xf32>
    %257 = arith.negf %256 : vector<2x96xf32>
    %258 = math.exp %257 : vector<2x96xf32>
    %cst_44 = arith.constant 1.000000e+00 : f32
    %259 = vector.broadcast %cst_44 : f32 to vector<2x96xf32>
    %260 = arith.addf %259, %258 : vector<2x96xf32>
    %261 = arith.divf %259, %260 : vector<2x96xf32>
    %262 = vector.extract_strided_slice %255 {offsets = [0, 96], sizes = [2, 32], strides = [1, 1]} : vector<2x128xf32> to vector<2x32xf32>
    %263 = math.tanh %262 : vector<2x32xf32>
    %264 = vector.extract_strided_slice %261 {offsets = [0, 0], sizes = [2, 32], strides = [1, 1]} : vector<2x96xf32> to vector<2x32xf32>
    %265 = vector.extract_strided_slice %261 {offsets = [0, 32], sizes = [2, 32], strides = [1, 1]} : vector<2x96xf32> to vector<2x32xf32>
    %266 = vector.extract_strided_slice %261 {offsets = [0, 64], sizes = [2, 32], strides = [1, 1]} : vector<2x96xf32> to vector<2x32xf32>
    %267 = arith.mulf %265, %229 : vector<2x32xf32>
    %268 = arith.mulf %264, %263 : vector<2x32xf32>
    %269 = arith.addf %267, %268 : vector<2x32xf32>
    %270 = math.tanh %269 : vector<2x32xf32>
    %271 = arith.mulf %266, %270 : vector<2x32xf32>
    %272 = vector.extract_strided_slice %11 {offsets = [14, 0], sizes = [2, 128], strides = [1, 1]} : vector<32x128xf32> to vector<2x128xf32>
    %cst_45 = arith.constant dense<0.000000e+00> : vector<2x128xf32>
    %273 = tpu.matmul %250, %0, %cst_45 {dimension_numbers = #tpu.dot_dimension_numbers<[1], [0], [0], [1], [0, 0, 1, 1], [], []>} : vector<2x32xf32>, vector<32x128xf32>, vector<2x128xf32> -> vector<2x128xf32>
    %274 = arith.addf %272, %273 : vector<2x128xf32>
    %275 = vector.extract_strided_slice %274 {offsets = [0, 0], sizes = [2, 96], strides = [1, 1]} : vector<2x128xf32> to vector<2x96xf32>
    %276 = arith.negf %275 : vector<2x96xf32>
    %277 = math.exp %276 : vector<2x96xf32>
    %cst_46 = arith.constant 1.000000e+00 : f32
    %278 = vector.broadcast %cst_46 : f32 to vector<2x96xf32>
    %279 = arith.addf %278, %277 : vector<2x96xf32>
    %280 = arith.divf %278, %279 : vector<2x96xf32>
    %281 = vector.extract_strided_slice %274 {offsets = [0, 96], sizes = [2, 32], strides = [1, 1]} : vector<2x128xf32> to vector<2x32xf32>
    %282 = math.tanh %281 : vector<2x32xf32>
    %283 = vector.extract_strided_slice %280 {offsets = [0, 0], sizes = [2, 32], strides = [1, 1]} : vector<2x96xf32> to vector<2x32xf32>
    %284 = vector.extract_strided_slice %280 {offsets = [0, 32], sizes = [2, 32], strides = [1, 1]} : vector<2x96xf32> to vector<2x32xf32>
    %285 = vector.extract_strided_slice %280 {offsets = [0, 64], sizes = [2, 32], strides = [1, 1]} : vector<2x96xf32> to vector<2x32xf32>
    %286 = arith.mulf %284, %248 : vector<2x32xf32>
    %287 = arith.mulf %283, %282 : vector<2x32xf32>
    %288 = arith.addf %286, %287 : vector<2x32xf32>
    %289 = math.tanh %288 : vector<2x32xf32>
    %290 = arith.mulf %285, %289 : vector<2x32xf32>
    %cst_47 = arith.constant dense<0.000000e+00> : vector<2x128xf32>
    %291 = tpu.matmul %250, %2, %cst_47 {dimension_numbers = #tpu.dot_dimension_numbers<[1], [0], [0], [1], [0, 0, 1, 1], [], []>} : vector<2x32xf32>, vector<32x128xf32>, vector<2x128xf32> -> vector<2x128xf32>
    %cst_48 = arith.constant dense<0.000000e+00> : vector<2x128xf32>
    %292 = tpu.matmul %271, %1, %cst_48 {dimension_numbers = #tpu.dot_dimension_numbers<[1], [0], [0], [1], [0, 0, 1, 1], [], []>} : vector<2x32xf32>, vector<32x128xf32>, vector<2x128xf32> -> vector<2x128xf32>
    %293 = arith.addf %291, %292 : vector<2x128xf32>
    %294 = vector.broadcast %3 : vector<1x128xf32> to vector<2x128xf32>
    %295 = arith.addf %293, %294 : vector<2x128xf32>
    %296 = vector.extract_strided_slice %295 {offsets = [0, 0], sizes = [2, 96], strides = [1, 1]} : vector<2x128xf32> to vector<2x96xf32>
    %297 = arith.negf %296 : vector<2x96xf32>
    %298 = math.exp %297 : vector<2x96xf32>
    %cst_49 = arith.constant 1.000000e+00 : f32
    %299 = vector.broadcast %cst_49 : f32 to vector<2x96xf32>
    %300 = arith.addf %299, %298 : vector<2x96xf32>
    %301 = arith.divf %299, %300 : vector<2x96xf32>
    %302 = vector.extract_strided_slice %295 {offsets = [0, 96], sizes = [2, 32], strides = [1, 1]} : vector<2x128xf32> to vector<2x32xf32>
    %303 = math.tanh %302 : vector<2x32xf32>
    %304 = vector.extract_strided_slice %301 {offsets = [0, 0], sizes = [2, 32], strides = [1, 1]} : vector<2x96xf32> to vector<2x32xf32>
    %305 = vector.extract_strided_slice %301 {offsets = [0, 32], sizes = [2, 32], strides = [1, 1]} : vector<2x96xf32> to vector<2x32xf32>
    %306 = vector.extract_strided_slice %301 {offsets = [0, 64], sizes = [2, 32], strides = [1, 1]} : vector<2x96xf32> to vector<2x32xf32>
    %307 = arith.mulf %305, %269 : vector<2x32xf32>
    %308 = arith.mulf %304, %303 : vector<2x32xf32>
    %309 = arith.addf %307, %308 : vector<2x32xf32>
    %310 = math.tanh %309 : vector<2x32xf32>
    %311 = arith.mulf %306, %310 : vector<2x32xf32>
    %312 = vector.extract_strided_slice %11 {offsets = [16, 0], sizes = [2, 128], strides = [1, 1]} : vector<32x128xf32> to vector<2x128xf32>
    %cst_50 = arith.constant dense<0.000000e+00> : vector<2x128xf32>
    %313 = tpu.matmul %290, %0, %cst_50 {dimension_numbers = #tpu.dot_dimension_numbers<[1], [0], [0], [1], [0, 0, 1, 1], [], []>} : vector<2x32xf32>, vector<32x128xf32>, vector<2x128xf32> -> vector<2x128xf32>
    %314 = arith.addf %312, %313 : vector<2x128xf32>
    %315 = vector.extract_strided_slice %314 {offsets = [0, 0], sizes = [2, 96], strides = [1, 1]} : vector<2x128xf32> to vector<2x96xf32>
    %316 = arith.negf %315 : vector<2x96xf32>
    %317 = math.exp %316 : vector<2x96xf32>
    %cst_51 = arith.constant 1.000000e+00 : f32
    %318 = vector.broadcast %cst_51 : f32 to vector<2x96xf32>
    %319 = arith.addf %318, %317 : vector<2x96xf32>
    %320 = arith.divf %318, %319 : vector<2x96xf32>
    %321 = vector.extract_strided_slice %314 {offsets = [0, 96], sizes = [2, 32], strides = [1, 1]} : vector<2x128xf32> to vector<2x32xf32>
    %322 = math.tanh %321 : vector<2x32xf32>
    %323 = vector.extract_strided_slice %320 {offsets = [0, 0], sizes = [2, 32], strides = [1, 1]} : vector<2x96xf32> to vector<2x32xf32>
    %324 = vector.extract_strided_slice %320 {offsets = [0, 32], sizes = [2, 32], strides = [1, 1]} : vector<2x96xf32> to vector<2x32xf32>
    %325 = vector.extract_strided_slice %320 {offsets = [0, 64], sizes = [2, 32], strides = [1, 1]} : vector<2x96xf32> to vector<2x32xf32>
    %326 = arith.mulf %324, %288 : vector<2x32xf32>
    %327 = arith.mulf %323, %322 : vector<2x32xf32>
    %328 = arith.addf %326, %327 : vector<2x32xf32>
    %329 = math.tanh %328 : vector<2x32xf32>
    %330 = arith.mulf %325, %329 : vector<2x32xf32>
    %cst_52 = arith.constant dense<0.000000e+00> : vector<2x128xf32>
    %331 = tpu.matmul %290, %2, %cst_52 {dimension_numbers = #tpu.dot_dimension_numbers<[1], [0], [0], [1], [0, 0, 1, 1], [], []>} : vector<2x32xf32>, vector<32x128xf32>, vector<2x128xf32> -> vector<2x128xf32>
    %cst_53 = arith.constant dense<0.000000e+00> : vector<2x128xf32>
    %332 = tpu.matmul %311, %1, %cst_53 {dimension_numbers = #tpu.dot_dimension_numbers<[1], [0], [0], [1], [0, 0, 1, 1], [], []>} : vector<2x32xf32>, vector<32x128xf32>, vector<2x128xf32> -> vector<2x128xf32>
    %333 = arith.addf %331, %332 : vector<2x128xf32>
    %334 = vector.broadcast %3 : vector<1x128xf32> to vector<2x128xf32>
    %335 = arith.addf %333, %334 : vector<2x128xf32>
    %336 = vector.extract_strided_slice %335 {offsets = [0, 0], sizes = [2, 96], strides = [1, 1]} : vector<2x128xf32> to vector<2x96xf32>
    %337 = arith.negf %336 : vector<2x96xf32>
    %338 = math.exp %337 : vector<2x96xf32>
    %cst_54 = arith.constant 1.000000e+00 : f32
    %339 = vector.broadcast %cst_54 : f32 to vector<2x96xf32>
    %340 = arith.addf %339, %338 : vector<2x96xf32>
    %341 = arith.divf %339, %340 : vector<2x96xf32>
    %342 = vector.extract_strided_slice %335 {offsets = [0, 96], sizes = [2, 32], strides = [1, 1]} : vector<2x128xf32> to vector<2x32xf32>
    %343 = math.tanh %342 : vector<2x32xf32>
    %344 = vector.extract_strided_slice %341 {offsets = [0, 0], sizes = [2, 32], strides = [1, 1]} : vector<2x96xf32> to vector<2x32xf32>
    %345 = vector.extract_strided_slice %341 {offsets = [0, 32], sizes = [2, 32], strides = [1, 1]} : vector<2x96xf32> to vector<2x32xf32>
    %346 = vector.extract_strided_slice %341 {offsets = [0, 64], sizes = [2, 32], strides = [1, 1]} : vector<2x96xf32> to vector<2x32xf32>
    %347 = arith.mulf %345, %309 : vector<2x32xf32>
    %348 = arith.mulf %344, %343 : vector<2x32xf32>
    %349 = arith.addf %347, %348 : vector<2x32xf32>
    %350 = math.tanh %349 : vector<2x32xf32>
    %351 = arith.mulf %346, %350 : vector<2x32xf32>
    %352 = vector.extract_strided_slice %11 {offsets = [18, 0], sizes = [2, 128], strides = [1, 1]} : vector<32x128xf32> to vector<2x128xf32>
    %cst_55 = arith.constant dense<0.000000e+00> : vector<2x128xf32>
    %353 = tpu.matmul %330, %0, %cst_55 {dimension_numbers = #tpu.dot_dimension_numbers<[1], [0], [0], [1], [0, 0, 1, 1], [], []>} : vector<2x32xf32>, vector<32x128xf32>, vector<2x128xf32> -> vector<2x128xf32>
    %354 = arith.addf %352, %353 : vector<2x128xf32>
    %355 = vector.extract_strided_slice %354 {offsets = [0, 0], sizes = [2, 96], strides = [1, 1]} : vector<2x128xf32> to vector<2x96xf32>
    %356 = arith.negf %355 : vector<2x96xf32>
    %357 = math.exp %356 : vector<2x96xf32>
    %cst_56 = arith.constant 1.000000e+00 : f32
    %358 = vector.broadcast %cst_56 : f32 to vector<2x96xf32>
    %359 = arith.addf %358, %357 : vector<2x96xf32>
    %360 = arith.divf %358, %359 : vector<2x96xf32>
    %361 = vector.extract_strided_slice %354 {offsets = [0, 96], sizes = [2, 32], strides = [1, 1]} : vector<2x128xf32> to vector<2x32xf32>
    %362 = math.tanh %361 : vector<2x32xf32>
    %363 = vector.extract_strided_slice %360 {offsets = [0, 0], sizes = [2, 32], strides = [1, 1]} : vector<2x96xf32> to vector<2x32xf32>
    %364 = vector.extract_strided_slice %360 {offsets = [0, 32], sizes = [2, 32], strides = [1, 1]} : vector<2x96xf32> to vector<2x32xf32>
    %365 = vector.extract_strided_slice %360 {offsets = [0, 64], sizes = [2, 32], strides = [1, 1]} : vector<2x96xf32> to vector<2x32xf32>
    %366 = arith.mulf %364, %328 : vector<2x32xf32>
    %367 = arith.mulf %363, %362 : vector<2x32xf32>
    %368 = arith.addf %366, %367 : vector<2x32xf32>
    %369 = math.tanh %368 : vector<2x32xf32>
    %370 = arith.mulf %365, %369 : vector<2x32xf32>
    %cst_57 = arith.constant dense<0.000000e+00> : vector<2x128xf32>
    %371 = tpu.matmul %330, %2, %cst_57 {dimension_numbers = #tpu.dot_dimension_numbers<[1], [0], [0], [1], [0, 0, 1, 1], [], []>} : vector<2x32xf32>, vector<32x128xf32>, vector<2x128xf32> -> vector<2x128xf32>
    %cst_58 = arith.constant dense<0.000000e+00> : vector<2x128xf32>
    %372 = tpu.matmul %351, %1, %cst_58 {dimension_numbers = #tpu.dot_dimension_numbers<[1], [0], [0], [1], [0, 0, 1, 1], [], []>} : vector<2x32xf32>, vector<32x128xf32>, vector<2x128xf32> -> vector<2x128xf32>
    %373 = arith.addf %371, %372 : vector<2x128xf32>
    %374 = vector.broadcast %3 : vector<1x128xf32> to vector<2x128xf32>
    %375 = arith.addf %373, %374 : vector<2x128xf32>
    %376 = vector.extract_strided_slice %375 {offsets = [0, 0], sizes = [2, 96], strides = [1, 1]} : vector<2x128xf32> to vector<2x96xf32>
    %377 = arith.negf %376 : vector<2x96xf32>
    %378 = math.exp %377 : vector<2x96xf32>
    %cst_59 = arith.constant 1.000000e+00 : f32
    %379 = vector.broadcast %cst_59 : f32 to vector<2x96xf32>
    %380 = arith.addf %379, %378 : vector<2x96xf32>
    %381 = arith.divf %379, %380 : vector<2x96xf32>
    %382 = vector.extract_strided_slice %375 {offsets = [0, 96], sizes = [2, 32], strides = [1, 1]} : vector<2x128xf32> to vector<2x32xf32>
    %383 = math.tanh %382 : vector<2x32xf32>
    %384 = vector.extract_strided_slice %381 {offsets = [0, 0], sizes = [2, 32], strides = [1, 1]} : vector<2x96xf32> to vector<2x32xf32>
    %385 = vector.extract_strided_slice %381 {offsets = [0, 32], sizes = [2, 32], strides = [1, 1]} : vector<2x96xf32> to vector<2x32xf32>
    %386 = vector.extract_strided_slice %381 {offsets = [0, 64], sizes = [2, 32], strides = [1, 1]} : vector<2x96xf32> to vector<2x32xf32>
    %387 = arith.mulf %385, %349 : vector<2x32xf32>
    %388 = arith.mulf %384, %383 : vector<2x32xf32>
    %389 = arith.addf %387, %388 : vector<2x32xf32>
    %390 = math.tanh %389 : vector<2x32xf32>
    %391 = arith.mulf %386, %390 : vector<2x32xf32>
    %392 = vector.extract_strided_slice %11 {offsets = [20, 0], sizes = [2, 128], strides = [1, 1]} : vector<32x128xf32> to vector<2x128xf32>
    %cst_60 = arith.constant dense<0.000000e+00> : vector<2x128xf32>
    %393 = tpu.matmul %370, %0, %cst_60 {dimension_numbers = #tpu.dot_dimension_numbers<[1], [0], [0], [1], [0, 0, 1, 1], [], []>} : vector<2x32xf32>, vector<32x128xf32>, vector<2x128xf32> -> vector<2x128xf32>
    %394 = arith.addf %392, %393 : vector<2x128xf32>
    %395 = vector.extract_strided_slice %394 {offsets = [0, 0], sizes = [2, 96], strides = [1, 1]} : vector<2x128xf32> to vector<2x96xf32>
    %396 = arith.negf %395 : vector<2x96xf32>
    %397 = math.exp %396 : vector<2x96xf32>
    %cst_61 = arith.constant 1.000000e+00 : f32
    %398 = vector.broadcast %cst_61 : f32 to vector<2x96xf32>
    %399 = arith.addf %398, %397 : vector<2x96xf32>
    %400 = arith.divf %398, %399 : vector<2x96xf32>
    %401 = vector.extract_strided_slice %394 {offsets = [0, 96], sizes = [2, 32], strides = [1, 1]} : vector<2x128xf32> to vector<2x32xf32>
    %402 = math.tanh %401 : vector<2x32xf32>
    %403 = vector.extract_strided_slice %400 {offsets = [0, 0], sizes = [2, 32], strides = [1, 1]} : vector<2x96xf32> to vector<2x32xf32>
    %404 = vector.extract_strided_slice %400 {offsets = [0, 32], sizes = [2, 32], strides = [1, 1]} : vector<2x96xf32> to vector<2x32xf32>
    %405 = vector.extract_strided_slice %400 {offsets = [0, 64], sizes = [2, 32], strides = [1, 1]} : vector<2x96xf32> to vector<2x32xf32>
    %406 = arith.mulf %404, %368 : vector<2x32xf32>
    %407 = arith.mulf %403, %402 : vector<2x32xf32>
    %408 = arith.addf %406, %407 : vector<2x32xf32>
    %409 = math.tanh %408 : vector<2x32xf32>
    %410 = arith.mulf %405, %409 : vector<2x32xf32>
    %cst_62 = arith.constant dense<0.000000e+00> : vector<2x128xf32>
    %411 = tpu.matmul %370, %2, %cst_62 {dimension_numbers = #tpu.dot_dimension_numbers<[1], [0], [0], [1], [0, 0, 1, 1], [], []>} : vector<2x32xf32>, vector<32x128xf32>, vector<2x128xf32> -> vector<2x128xf32>
    %cst_63 = arith.constant dense<0.000000e+00> : vector<2x128xf32>
    %412 = tpu.matmul %391, %1, %cst_63 {dimension_numbers = #tpu.dot_dimension_numbers<[1], [0], [0], [1], [0, 0, 1, 1], [], []>} : vector<2x32xf32>, vector<32x128xf32>, vector<2x128xf32> -> vector<2x128xf32>
    %413 = arith.addf %411, %412 : vector<2x128xf32>
    %414 = vector.broadcast %3 : vector<1x128xf32> to vector<2x128xf32>
    %415 = arith.addf %413, %414 : vector<2x128xf32>
    %416 = vector.extract_strided_slice %415 {offsets = [0, 0], sizes = [2, 96], strides = [1, 1]} : vector<2x128xf32> to vector<2x96xf32>
    %417 = arith.negf %416 : vector<2x96xf32>
    %418 = math.exp %417 : vector<2x96xf32>
    %cst_64 = arith.constant 1.000000e+00 : f32
    %419 = vector.broadcast %cst_64 : f32 to vector<2x96xf32>
    %420 = arith.addf %419, %418 : vector<2x96xf32>
    %421 = arith.divf %419, %420 : vector<2x96xf32>
    %422 = vector.extract_strided_slice %415 {offsets = [0, 96], sizes = [2, 32], strides = [1, 1]} : vector<2x128xf32> to vector<2x32xf32>
    %423 = math.tanh %422 : vector<2x32xf32>
    %424 = vector.extract_strided_slice %421 {offsets = [0, 0], sizes = [2, 32], strides = [1, 1]} : vector<2x96xf32> to vector<2x32xf32>
    %425 = vector.extract_strided_slice %421 {offsets = [0, 32], sizes = [2, 32], strides = [1, 1]} : vector<2x96xf32> to vector<2x32xf32>
    %426 = vector.extract_strided_slice %421 {offsets = [0, 64], sizes = [2, 32], strides = [1, 1]} : vector<2x96xf32> to vector<2x32xf32>
    %427 = arith.mulf %425, %389 : vector<2x32xf32>
    %428 = arith.mulf %424, %423 : vector<2x32xf32>
    %429 = arith.addf %427, %428 : vector<2x32xf32>
    %430 = math.tanh %429 : vector<2x32xf32>
    %431 = arith.mulf %426, %430 : vector<2x32xf32>
    %432 = vector.extract_strided_slice %11 {offsets = [22, 0], sizes = [2, 128], strides = [1, 1]} : vector<32x128xf32> to vector<2x128xf32>
    %cst_65 = arith.constant dense<0.000000e+00> : vector<2x128xf32>
    %433 = tpu.matmul %410, %0, %cst_65 {dimension_numbers = #tpu.dot_dimension_numbers<[1], [0], [0], [1], [0, 0, 1, 1], [], []>} : vector<2x32xf32>, vector<32x128xf32>, vector<2x128xf32> -> vector<2x128xf32>
    %434 = arith.addf %432, %433 : vector<2x128xf32>
    %435 = vector.extract_strided_slice %434 {offsets = [0, 0], sizes = [2, 96], strides = [1, 1]} : vector<2x128xf32> to vector<2x96xf32>
    %436 = arith.negf %435 : vector<2x96xf32>
    %437 = math.exp %436 : vector<2x96xf32>
    %cst_66 = arith.constant 1.000000e+00 : f32
    %438 = vector.broadcast %cst_66 : f32 to vector<2x96xf32>
    %439 = arith.addf %438, %437 : vector<2x96xf32>
    %440 = arith.divf %438, %439 : vector<2x96xf32>
    %441 = vector.extract_strided_slice %434 {offsets = [0, 96], sizes = [2, 32], strides = [1, 1]} : vector<2x128xf32> to vector<2x32xf32>
    %442 = math.tanh %441 : vector<2x32xf32>
    %443 = vector.extract_strided_slice %440 {offsets = [0, 0], sizes = [2, 32], strides = [1, 1]} : vector<2x96xf32> to vector<2x32xf32>
    %444 = vector.extract_strided_slice %440 {offsets = [0, 32], sizes = [2, 32], strides = [1, 1]} : vector<2x96xf32> to vector<2x32xf32>
    %445 = vector.extract_strided_slice %440 {offsets = [0, 64], sizes = [2, 32], strides = [1, 1]} : vector<2x96xf32> to vector<2x32xf32>
    %446 = arith.mulf %444, %408 : vector<2x32xf32>
    %447 = arith.mulf %443, %442 : vector<2x32xf32>
    %448 = arith.addf %446, %447 : vector<2x32xf32>
    %449 = math.tanh %448 : vector<2x32xf32>
    %450 = arith.mulf %445, %449 : vector<2x32xf32>
    %cst_67 = arith.constant dense<0.000000e+00> : vector<2x128xf32>
    %451 = tpu.matmul %410, %2, %cst_67 {dimension_numbers = #tpu.dot_dimension_numbers<[1], [0], [0], [1], [0, 0, 1, 1], [], []>} : vector<2x32xf32>, vector<32x128xf32>, vector<2x128xf32> -> vector<2x128xf32>
    %cst_68 = arith.constant dense<0.000000e+00> : vector<2x128xf32>
    %452 = tpu.matmul %431, %1, %cst_68 {dimension_numbers = #tpu.dot_dimension_numbers<[1], [0], [0], [1], [0, 0, 1, 1], [], []>} : vector<2x32xf32>, vector<32x128xf32>, vector<2x128xf32> -> vector<2x128xf32>
    %453 = arith.addf %451, %452 : vector<2x128xf32>
    %454 = vector.broadcast %3 : vector<1x128xf32> to vector<2x128xf32>
    %455 = arith.addf %453, %454 : vector<2x128xf32>
    %456 = vector.extract_strided_slice %455 {offsets = [0, 0], sizes = [2, 96], strides = [1, 1]} : vector<2x128xf32> to vector<2x96xf32>
    %457 = arith.negf %456 : vector<2x96xf32>
    %458 = math.exp %457 : vector<2x96xf32>
    %cst_69 = arith.constant 1.000000e+00 : f32
    %459 = vector.broadcast %cst_69 : f32 to vector<2x96xf32>
    %460 = arith.addf %459, %458 : vector<2x96xf32>
    %461 = arith.divf %459, %460 : vector<2x96xf32>
    %462 = vector.extract_strided_slice %455 {offsets = [0, 96], sizes = [2, 32], strides = [1, 1]} : vector<2x128xf32> to vector<2x32xf32>
    %463 = math.tanh %462 : vector<2x32xf32>
    %464 = vector.extract_strided_slice %461 {offsets = [0, 0], sizes = [2, 32], strides = [1, 1]} : vector<2x96xf32> to vector<2x32xf32>
    %465 = vector.extract_strided_slice %461 {offsets = [0, 32], sizes = [2, 32], strides = [1, 1]} : vector<2x96xf32> to vector<2x32xf32>
    %466 = vector.extract_strided_slice %461 {offsets = [0, 64], sizes = [2, 32], strides = [1, 1]} : vector<2x96xf32> to vector<2x32xf32>
    %467 = arith.mulf %465, %429 : vector<2x32xf32>
    %468 = arith.mulf %464, %463 : vector<2x32xf32>
    %469 = arith.addf %467, %468 : vector<2x32xf32>
    %470 = math.tanh %469 : vector<2x32xf32>
    %471 = arith.mulf %466, %470 : vector<2x32xf32>
    %472 = vector.extract_strided_slice %11 {offsets = [24, 0], sizes = [2, 128], strides = [1, 1]} : vector<32x128xf32> to vector<2x128xf32>
    %cst_70 = arith.constant dense<0.000000e+00> : vector<2x128xf32>
    %473 = tpu.matmul %450, %0, %cst_70 {dimension_numbers = #tpu.dot_dimension_numbers<[1], [0], [0], [1], [0, 0, 1, 1], [], []>} : vector<2x32xf32>, vector<32x128xf32>, vector<2x128xf32> -> vector<2x128xf32>
    %474 = arith.addf %472, %473 : vector<2x128xf32>
    %475 = vector.extract_strided_slice %474 {offsets = [0, 0], sizes = [2, 96], strides = [1, 1]} : vector<2x128xf32> to vector<2x96xf32>
    %476 = arith.negf %475 : vector<2x96xf32>
    %477 = math.exp %476 : vector<2x96xf32>
    %cst_71 = arith.constant 1.000000e+00 : f32
    %478 = vector.broadcast %cst_71 : f32 to vector<2x96xf32>
    %479 = arith.addf %478, %477 : vector<2x96xf32>
    %480 = arith.divf %478, %479 : vector<2x96xf32>
    %481 = vector.extract_strided_slice %474 {offsets = [0, 96], sizes = [2, 32], strides = [1, 1]} : vector<2x128xf32> to vector<2x32xf32>
    %482 = math.tanh %481 : vector<2x32xf32>
    %483 = vector.extract_strided_slice %480 {offsets = [0, 0], sizes = [2, 32], strides = [1, 1]} : vector<2x96xf32> to vector<2x32xf32>
    %484 = vector.extract_strided_slice %480 {offsets = [0, 32], sizes = [2, 32], strides = [1, 1]} : vector<2x96xf32> to vector<2x32xf32>
    %485 = vector.extract_strided_slice %480 {offsets = [0, 64], sizes = [2, 32], strides = [1, 1]} : vector<2x96xf32> to vector<2x32xf32>
    %486 = arith.mulf %484, %448 : vector<2x32xf32>
    %487 = arith.mulf %483, %482 : vector<2x32xf32>
    %488 = arith.addf %486, %487 : vector<2x32xf32>
    %489 = math.tanh %488 : vector<2x32xf32>
    %490 = arith.mulf %485, %489 : vector<2x32xf32>
    %cst_72 = arith.constant dense<0.000000e+00> : vector<2x128xf32>
    %491 = tpu.matmul %450, %2, %cst_72 {dimension_numbers = #tpu.dot_dimension_numbers<[1], [0], [0], [1], [0, 0, 1, 1], [], []>} : vector<2x32xf32>, vector<32x128xf32>, vector<2x128xf32> -> vector<2x128xf32>
    %cst_73 = arith.constant dense<0.000000e+00> : vector<2x128xf32>
    %492 = tpu.matmul %471, %1, %cst_73 {dimension_numbers = #tpu.dot_dimension_numbers<[1], [0], [0], [1], [0, 0, 1, 1], [], []>} : vector<2x32xf32>, vector<32x128xf32>, vector<2x128xf32> -> vector<2x128xf32>
    %493 = arith.addf %491, %492 : vector<2x128xf32>
    %494 = vector.broadcast %3 : vector<1x128xf32> to vector<2x128xf32>
    %495 = arith.addf %493, %494 : vector<2x128xf32>
    %496 = vector.extract_strided_slice %495 {offsets = [0, 0], sizes = [2, 96], strides = [1, 1]} : vector<2x128xf32> to vector<2x96xf32>
    %497 = arith.negf %496 : vector<2x96xf32>
    %498 = math.exp %497 : vector<2x96xf32>
    %cst_74 = arith.constant 1.000000e+00 : f32
    %499 = vector.broadcast %cst_74 : f32 to vector<2x96xf32>
    %500 = arith.addf %499, %498 : vector<2x96xf32>
    %501 = arith.divf %499, %500 : vector<2x96xf32>
    %502 = vector.extract_strided_slice %495 {offsets = [0, 96], sizes = [2, 32], strides = [1, 1]} : vector<2x128xf32> to vector<2x32xf32>
    %503 = math.tanh %502 : vector<2x32xf32>
    %504 = vector.extract_strided_slice %501 {offsets = [0, 0], sizes = [2, 32], strides = [1, 1]} : vector<2x96xf32> to vector<2x32xf32>
    %505 = vector.extract_strided_slice %501 {offsets = [0, 32], sizes = [2, 32], strides = [1, 1]} : vector<2x96xf32> to vector<2x32xf32>
    %506 = vector.extract_strided_slice %501 {offsets = [0, 64], sizes = [2, 32], strides = [1, 1]} : vector<2x96xf32> to vector<2x32xf32>
    %507 = arith.mulf %505, %469 : vector<2x32xf32>
    %508 = arith.mulf %504, %503 : vector<2x32xf32>
    %509 = arith.addf %507, %508 : vector<2x32xf32>
    %510 = math.tanh %509 : vector<2x32xf32>
    %511 = arith.mulf %506, %510 : vector<2x32xf32>
    %512 = vector.extract_strided_slice %11 {offsets = [26, 0], sizes = [2, 128], strides = [1, 1]} : vector<32x128xf32> to vector<2x128xf32>
    %cst_75 = arith.constant dense<0.000000e+00> : vector<2x128xf32>
    %513 = tpu.matmul %490, %0, %cst_75 {dimension_numbers = #tpu.dot_dimension_numbers<[1], [0], [0], [1], [0, 0, 1, 1], [], []>} : vector<2x32xf32>, vector<32x128xf32>, vector<2x128xf32> -> vector<2x128xf32>
    %514 = arith.addf %512, %513 : vector<2x128xf32>
    %515 = vector.extract_strided_slice %514 {offsets = [0, 0], sizes = [2, 96], strides = [1, 1]} : vector<2x128xf32> to vector<2x96xf32>
    %516 = arith.negf %515 : vector<2x96xf32>
    %517 = math.exp %516 : vector<2x96xf32>
    %cst_76 = arith.constant 1.000000e+00 : f32
    %518 = vector.broadcast %cst_76 : f32 to vector<2x96xf32>
    %519 = arith.addf %518, %517 : vector<2x96xf32>
    %520 = arith.divf %518, %519 : vector<2x96xf32>
    %521 = vector.extract_strided_slice %514 {offsets = [0, 96], sizes = [2, 32], strides = [1, 1]} : vector<2x128xf32> to vector<2x32xf32>
    %522 = math.tanh %521 : vector<2x32xf32>
    %523 = vector.extract_strided_slice %520 {offsets = [0, 0], sizes = [2, 32], strides = [1, 1]} : vector<2x96xf32> to vector<2x32xf32>
    %524 = vector.extract_strided_slice %520 {offsets = [0, 32], sizes = [2, 32], strides = [1, 1]} : vector<2x96xf32> to vector<2x32xf32>
    %525 = vector.extract_strided_slice %520 {offsets = [0, 64], sizes = [2, 32], strides = [1, 1]} : vector<2x96xf32> to vector<2x32xf32>
    %526 = arith.mulf %524, %488 : vector<2x32xf32>
    %527 = arith.mulf %523, %522 : vector<2x32xf32>
    %528 = arith.addf %526, %527 : vector<2x32xf32>
    %529 = math.tanh %528 : vector<2x32xf32>
    %530 = arith.mulf %525, %529 : vector<2x32xf32>
    %cst_77 = arith.constant dense<0.000000e+00> : vector<2x128xf32>
    %531 = tpu.matmul %490, %2, %cst_77 {dimension_numbers = #tpu.dot_dimension_numbers<[1], [0], [0], [1], [0, 0, 1, 1], [], []>} : vector<2x32xf32>, vector<32x128xf32>, vector<2x128xf32> -> vector<2x128xf32>
    %cst_78 = arith.constant dense<0.000000e+00> : vector<2x128xf32>
    %532 = tpu.matmul %511, %1, %cst_78 {dimension_numbers = #tpu.dot_dimension_numbers<[1], [0], [0], [1], [0, 0, 1, 1], [], []>} : vector<2x32xf32>, vector<32x128xf32>, vector<2x128xf32> -> vector<2x128xf32>
    %533 = arith.addf %531, %532 : vector<2x128xf32>
    %534 = vector.broadcast %3 : vector<1x128xf32> to vector<2x128xf32>
    %535 = arith.addf %533, %534 : vector<2x128xf32>
    %536 = vector.extract_strided_slice %535 {offsets = [0, 0], sizes = [2, 96], strides = [1, 1]} : vector<2x128xf32> to vector<2x96xf32>
    %537 = arith.negf %536 : vector<2x96xf32>
    %538 = math.exp %537 : vector<2x96xf32>
    %cst_79 = arith.constant 1.000000e+00 : f32
    %539 = vector.broadcast %cst_79 : f32 to vector<2x96xf32>
    %540 = arith.addf %539, %538 : vector<2x96xf32>
    %541 = arith.divf %539, %540 : vector<2x96xf32>
    %542 = vector.extract_strided_slice %535 {offsets = [0, 96], sizes = [2, 32], strides = [1, 1]} : vector<2x128xf32> to vector<2x32xf32>
    %543 = math.tanh %542 : vector<2x32xf32>
    %544 = vector.extract_strided_slice %541 {offsets = [0, 0], sizes = [2, 32], strides = [1, 1]} : vector<2x96xf32> to vector<2x32xf32>
    %545 = vector.extract_strided_slice %541 {offsets = [0, 32], sizes = [2, 32], strides = [1, 1]} : vector<2x96xf32> to vector<2x32xf32>
    %546 = vector.extract_strided_slice %541 {offsets = [0, 64], sizes = [2, 32], strides = [1, 1]} : vector<2x96xf32> to vector<2x32xf32>
    %547 = arith.mulf %545, %509 : vector<2x32xf32>
    %548 = arith.mulf %544, %543 : vector<2x32xf32>
    %549 = arith.addf %547, %548 : vector<2x32xf32>
    %550 = math.tanh %549 : vector<2x32xf32>
    %551 = arith.mulf %546, %550 : vector<2x32xf32>
    %552 = vector.extract_strided_slice %11 {offsets = [28, 0], sizes = [2, 128], strides = [1, 1]} : vector<32x128xf32> to vector<2x128xf32>
    %cst_80 = arith.constant dense<0.000000e+00> : vector<2x128xf32>
    %553 = tpu.matmul %530, %0, %cst_80 {dimension_numbers = #tpu.dot_dimension_numbers<[1], [0], [0], [1], [0, 0, 1, 1], [], []>} : vector<2x32xf32>, vector<32x128xf32>, vector<2x128xf32> -> vector<2x128xf32>
    %554 = arith.addf %552, %553 : vector<2x128xf32>
    %555 = vector.extract_strided_slice %554 {offsets = [0, 0], sizes = [2, 96], strides = [1, 1]} : vector<2x128xf32> to vector<2x96xf32>
    %556 = arith.negf %555 : vector<2x96xf32>
    %557 = math.exp %556 : vector<2x96xf32>
    %cst_81 = arith.constant 1.000000e+00 : f32
    %558 = vector.broadcast %cst_81 : f32 to vector<2x96xf32>
    %559 = arith.addf %558, %557 : vector<2x96xf32>
    %560 = arith.divf %558, %559 : vector<2x96xf32>
    %561 = vector.extract_strided_slice %554 {offsets = [0, 96], sizes = [2, 32], strides = [1, 1]} : vector<2x128xf32> to vector<2x32xf32>
    %562 = math.tanh %561 : vector<2x32xf32>
    %563 = vector.extract_strided_slice %560 {offsets = [0, 0], sizes = [2, 32], strides = [1, 1]} : vector<2x96xf32> to vector<2x32xf32>
    %564 = vector.extract_strided_slice %560 {offsets = [0, 32], sizes = [2, 32], strides = [1, 1]} : vector<2x96xf32> to vector<2x32xf32>
    %565 = vector.extract_strided_slice %560 {offsets = [0, 64], sizes = [2, 32], strides = [1, 1]} : vector<2x96xf32> to vector<2x32xf32>
    %566 = arith.mulf %564, %528 : vector<2x32xf32>
    %567 = arith.mulf %563, %562 : vector<2x32xf32>
    %568 = arith.addf %566, %567 : vector<2x32xf32>
    %569 = math.tanh %568 : vector<2x32xf32>
    %570 = arith.mulf %565, %569 : vector<2x32xf32>
    %cst_82 = arith.constant dense<0.000000e+00> : vector<2x128xf32>
    %571 = tpu.matmul %530, %2, %cst_82 {dimension_numbers = #tpu.dot_dimension_numbers<[1], [0], [0], [1], [0, 0, 1, 1], [], []>} : vector<2x32xf32>, vector<32x128xf32>, vector<2x128xf32> -> vector<2x128xf32>
    %cst_83 = arith.constant dense<0.000000e+00> : vector<2x128xf32>
    %572 = tpu.matmul %551, %1, %cst_83 {dimension_numbers = #tpu.dot_dimension_numbers<[1], [0], [0], [1], [0, 0, 1, 1], [], []>} : vector<2x32xf32>, vector<32x128xf32>, vector<2x128xf32> -> vector<2x128xf32>
    %573 = arith.addf %571, %572 : vector<2x128xf32>
    %574 = vector.broadcast %3 : vector<1x128xf32> to vector<2x128xf32>
    %575 = arith.addf %573, %574 : vector<2x128xf32>
    %576 = vector.extract_strided_slice %575 {offsets = [0, 0], sizes = [2, 96], strides = [1, 1]} : vector<2x128xf32> to vector<2x96xf32>
    %577 = arith.negf %576 : vector<2x96xf32>
    %578 = math.exp %577 : vector<2x96xf32>
    %cst_84 = arith.constant 1.000000e+00 : f32
    %579 = vector.broadcast %cst_84 : f32 to vector<2x96xf32>
    %580 = arith.addf %579, %578 : vector<2x96xf32>
    %581 = arith.divf %579, %580 : vector<2x96xf32>
    %582 = vector.extract_strided_slice %575 {offsets = [0, 96], sizes = [2, 32], strides = [1, 1]} : vector<2x128xf32> to vector<2x32xf32>
    %583 = math.tanh %582 : vector<2x32xf32>
    %584 = vector.extract_strided_slice %581 {offsets = [0, 0], sizes = [2, 32], strides = [1, 1]} : vector<2x96xf32> to vector<2x32xf32>
    %585 = vector.extract_strided_slice %581 {offsets = [0, 32], sizes = [2, 32], strides = [1, 1]} : vector<2x96xf32> to vector<2x32xf32>
    %586 = vector.extract_strided_slice %581 {offsets = [0, 64], sizes = [2, 32], strides = [1, 1]} : vector<2x96xf32> to vector<2x32xf32>
    %587 = arith.mulf %585, %549 : vector<2x32xf32>
    %588 = arith.mulf %584, %583 : vector<2x32xf32>
    %589 = arith.addf %587, %588 : vector<2x32xf32>
    %590 = math.tanh %589 : vector<2x32xf32>
    %591 = arith.mulf %586, %590 : vector<2x32xf32>
    %592 = vector.extract_strided_slice %11 {offsets = [30, 0], sizes = [2, 128], strides = [1, 1]} : vector<32x128xf32> to vector<2x128xf32>
    %cst_85 = arith.constant dense<0.000000e+00> : vector<2x128xf32>
    %593 = tpu.matmul %570, %0, %cst_85 {dimension_numbers = #tpu.dot_dimension_numbers<[1], [0], [0], [1], [0, 0, 1, 1], [], []>} : vector<2x32xf32>, vector<32x128xf32>, vector<2x128xf32> -> vector<2x128xf32>
    %594 = arith.addf %592, %593 : vector<2x128xf32>
    %595 = vector.extract_strided_slice %594 {offsets = [0, 0], sizes = [2, 96], strides = [1, 1]} : vector<2x128xf32> to vector<2x96xf32>
    %596 = arith.negf %595 : vector<2x96xf32>
    %597 = math.exp %596 : vector<2x96xf32>
    %cst_86 = arith.constant 1.000000e+00 : f32
    %598 = vector.broadcast %cst_86 : f32 to vector<2x96xf32>
    %599 = arith.addf %598, %597 : vector<2x96xf32>
    %600 = arith.divf %598, %599 : vector<2x96xf32>
    %601 = vector.extract_strided_slice %594 {offsets = [0, 96], sizes = [2, 32], strides = [1, 1]} : vector<2x128xf32> to vector<2x32xf32>
    %602 = math.tanh %601 : vector<2x32xf32>
    %603 = vector.extract_strided_slice %600 {offsets = [0, 0], sizes = [2, 32], strides = [1, 1]} : vector<2x96xf32> to vector<2x32xf32>
    %604 = vector.extract_strided_slice %600 {offsets = [0, 32], sizes = [2, 32], strides = [1, 1]} : vector<2x96xf32> to vector<2x32xf32>
    %605 = vector.extract_strided_slice %600 {offsets = [0, 64], sizes = [2, 32], strides = [1, 1]} : vector<2x96xf32> to vector<2x32xf32>
    %606 = arith.mulf %604, %568 : vector<2x32xf32>
    %607 = arith.mulf %603, %602 : vector<2x32xf32>
    %608 = arith.addf %606, %607 : vector<2x32xf32>
    %609 = math.tanh %608 : vector<2x32xf32>
    %610 = arith.mulf %605, %609 : vector<2x32xf32>
    %cst_87 = arith.constant dense<0.000000e+00> : vector<2x128xf32>
    %611 = tpu.matmul %570, %2, %cst_87 {dimension_numbers = #tpu.dot_dimension_numbers<[1], [0], [0], [1], [0, 0, 1, 1], [], []>} : vector<2x32xf32>, vector<32x128xf32>, vector<2x128xf32> -> vector<2x128xf32>
    %cst_88 = arith.constant dense<0.000000e+00> : vector<2x128xf32>
    %612 = tpu.matmul %591, %1, %cst_88 {dimension_numbers = #tpu.dot_dimension_numbers<[1], [0], [0], [1], [0, 0, 1, 1], [], []>} : vector<2x32xf32>, vector<32x128xf32>, vector<2x128xf32> -> vector<2x128xf32>
    %613 = arith.addf %611, %612 : vector<2x128xf32>
    %614 = vector.broadcast %3 : vector<1x128xf32> to vector<2x128xf32>
    %615 = arith.addf %613, %614 : vector<2x128xf32>
    %616 = vector.extract_strided_slice %615 {offsets = [0, 0], sizes = [2, 96], strides = [1, 1]} : vector<2x128xf32> to vector<2x96xf32>
    %617 = arith.negf %616 : vector<2x96xf32>
    %618 = math.exp %617 : vector<2x96xf32>
    %cst_89 = arith.constant 1.000000e+00 : f32
    %619 = vector.broadcast %cst_89 : f32 to vector<2x96xf32>
    %620 = arith.addf %619, %618 : vector<2x96xf32>
    %621 = arith.divf %619, %620 : vector<2x96xf32>
    %622 = vector.extract_strided_slice %615 {offsets = [0, 96], sizes = [2, 32], strides = [1, 1]} : vector<2x128xf32> to vector<2x32xf32>
    %623 = math.tanh %622 : vector<2x32xf32>
    %624 = vector.extract_strided_slice %621 {offsets = [0, 0], sizes = [2, 32], strides = [1, 1]} : vector<2x96xf32> to vector<2x32xf32>
    %625 = vector.extract_strided_slice %621 {offsets = [0, 32], sizes = [2, 32], strides = [1, 1]} : vector<2x96xf32> to vector<2x32xf32>
    %626 = vector.extract_strided_slice %621 {offsets = [0, 64], sizes = [2, 32], strides = [1, 1]} : vector<2x96xf32> to vector<2x32xf32>
    %627 = arith.mulf %625, %589 : vector<2x32xf32>
    %628 = arith.mulf %624, %623 : vector<2x32xf32>
    %629 = arith.addf %627, %628 : vector<2x32xf32>
    %630 = math.tanh %629 : vector<2x32xf32>
    %631 = arith.mulf %626, %630 : vector<2x32xf32>
    %cst_90 = arith.constant dense<0.000000e+00> : vector<2x128xf32>
    %632 = tpu.matmul %610, %2, %cst_90 {dimension_numbers = #tpu.dot_dimension_numbers<[1], [0], [0], [1], [0, 0, 1, 1], [], []>} : vector<2x32xf32>, vector<32x128xf32>, vector<2x128xf32> -> vector<2x128xf32>
    %cst_91 = arith.constant dense<0.000000e+00> : vector<2x128xf32>
    %633 = tpu.matmul %631, %1, %cst_91 {dimension_numbers = #tpu.dot_dimension_numbers<[1], [0], [0], [1], [0, 0, 1, 1], [], []>} : vector<2x32xf32>, vector<32x128xf32>, vector<2x128xf32> -> vector<2x128xf32>
    %634 = arith.addf %632, %633 : vector<2x128xf32>
    %635 = vector.broadcast %3 : vector<1x128xf32> to vector<2x128xf32>
    %636 = arith.addf %634, %635 : vector<2x128xf32>
    %637 = vector.extract_strided_slice %636 {offsets = [0, 0], sizes = [2, 96], strides = [1, 1]} : vector<2x128xf32> to vector<2x96xf32>
    %638 = arith.negf %637 : vector<2x96xf32>
    %639 = math.exp %638 : vector<2x96xf32>
    %cst_92 = arith.constant 1.000000e+00 : f32
    %640 = vector.broadcast %cst_92 : f32 to vector<2x96xf32>
    %641 = arith.addf %640, %639 : vector<2x96xf32>
    %642 = arith.divf %640, %641 : vector<2x96xf32>
    %643 = vector.extract_strided_slice %636 {offsets = [0, 96], sizes = [2, 32], strides = [1, 1]} : vector<2x128xf32> to vector<2x32xf32>
    %644 = math.tanh %643 : vector<2x32xf32>
    %645 = vector.extract_strided_slice %642 {offsets = [0, 0], sizes = [2, 32], strides = [1, 1]} : vector<2x96xf32> to vector<2x32xf32>
    %646 = vector.extract_strided_slice %642 {offsets = [0, 32], sizes = [2, 32], strides = [1, 1]} : vector<2x96xf32> to vector<2x32xf32>
    %647 = vector.extract_strided_slice %642 {offsets = [0, 64], sizes = [2, 32], strides = [1, 1]} : vector<2x96xf32> to vector<2x32xf32>
    %648 = arith.mulf %646, %629 : vector<2x32xf32>
    %649 = arith.mulf %645, %644 : vector<2x32xf32>
    %650 = arith.addf %648, %649 : vector<2x32xf32>
    %651 = math.tanh %650 : vector<2x32xf32>
    %652 = arith.mulf %647, %651 : vector<2x32xf32>
    %c0_93 = arith.constant 0 : index
    %c0_94 = arith.constant 0 : index
    %653 = vector.load %arg7[%c0_93, %c0_94] : memref<1x32xf32, #tpu.memory_space<vmem>>, vector<1x32xf32>
    %654 = vector.broadcast %653 : vector<1x32xf32> to vector<2x32xf32>
    %655 = arith.mulf %652, %654 : vector<2x32xf32>
    %cst_95 = arith.constant dense<0.000000e+00> : vector<2xf32>
    %656 = vector.multi_reduction <add>, %655, %cst_95 [1] : vector<2x32xf32> to vector<2xf32>
    %657 = vector.shape_cast %656 : vector<2xf32> to vector<2x1xf32>
    %c0_96 = arith.constant 0 : index
    %c0_97 = arith.constant 0 : index
    %658 = vector.load %arg8[%c0_96, %c0_97] : memref<1x1xf32, #tpu.memory_space<vmem>>, vector<1x1xf32>
    %659 = vector.broadcast %658 : vector<1x1xf32> to vector<2x1xf32>
    %660 = arith.addf %657, %659 : vector<2x1xf32>
    %c0_98 = arith.constant 0 : index
    %c0_99 = arith.constant 0 : index
    %661 = vector.load %arg9[%c0_98, %c0_99] : memref<2x1xf32, #tpu.memory_space<vmem>>, vector<2x1xf32>
    tpu.vector_store %arg9[%c0_98, %c0_99], %660 {strides = array<i32>} : memref<2x1xf32, #tpu.memory_space<vmem>>, vector<2x1xf32>,
    return
  }
}

</mosaic_0001>

<bundles_post_ra>
// kernel: tpu_custom_call.1
= control target key start
LH: loop header
LB: loop body
LE: loop exit
PB: predicated region body
PF: predicated region fallthrough
CT: control target
= control target key end

     0   :  { %s3741_s0 = inlined_call_operand.vmem [shape: f32[32,1], index: 0, kind: input, shape index: {}]   ;;  %s3742_s1 = inlined_call_operand.vmem [shape: f32[1,128], index: 1, kind: input, shape index: {}]   ;;  %s3743_s2 = inlined_call_operand.vmem [shape: f32[1,128], index: 2, kind: input, shape index: {}]   ;;  %s3744_s3 = inlined_call_operand.vmem [shape: f32[32,128], index: 3, kind: input, shape index: {}]   ;;  %s3745_s4 = inlined_call_operand.hbm [shape: f32[32,128], index: 4, kind: input, shape index: {}]   ;;  %s3746_s5 = inlined_call_operand.hbm [shape: f32[32,128], index: 5, kind: input, shape index: {}]   ;;  %s3747_s6 = inlined_call_operand.vmem [shape: f32[1,128], index: 6, kind: input, shape index: {}]   ;;  %s3748_s7 = inlined_call_operand.vmem [shape: f32[1,32], index: 7, kind: input, shape index: {}]   ;;  %s3749_s8 = inlined_call_operand.<no memory space> [shape: f32[1,1], index: 8, kind: input, shape index: {}]   ;;  %s3750_s9 = inlined_call_operand.vmem [shape: f32[2,1], index: 9, kind: output, shape index: {}]  }
   0x1   :  { %v14_v0 = vstv %s3749_s8 }
   0x2   :  { %15 = vst [vmem:[#allocation2] sm:$0x1] %v14_v0 }
   0x3   :  { %16 = vsyncpa [#allocation4], 0  ;;  %s30_s13 = sshll.u32 %s3745_s4, 4  ;;  %s31_s13 = int_to_ptr.hbm [resolvable:$true] %s30_s13 }
   0x4   :  { %17 = vsyncpa [#allocation6], 0  ;;  %s3007_s14 = smov [#allocation3]   ;;  %s43_s18 = sshll.u32 %s3746_s5, 4  ;;  %s44_s18 = int_to_ptr.hbm [resolvable:$true] %s43_s18 }
   0x5   :  { %s32_s15 = sshll.u32 %s3007_s14, 4  ;;  %s3008_s19 = smov 128   ;;  %s33_s15 = int_to_ptr.vmem [resolvable:$true] %s32_s15 }
   0x6   :  { %s3009_s20 = smov 8   ;;  %s3010_s8 = smov [#allocation5]  }
   0x7   :  { %38 = dma.hbm_to_vmem [thread:$0]  %s31_s13, 512, %s33_s15, [#allocation4], %s3008_s19, %s3008_s19, %s3009_s20  }
   0x8   :  { %s45_s21 = sshll.u32 %s3010_s8, 4  ;;  %s46_s21 = int_to_ptr.vmem [resolvable:$true] %s45_s21 }
   0x9   :  { %51 = dma.hbm_to_vmem [thread:$0]  %s44_s18, 512, %s46_s21, [#allocation6], %s3008_s19, %s3008_s19, %s3009_s20  }
   0xa   :  { %3003 = dma.done.wait [#allocation4], 512  }
   0xb   :  { %3004 = vsyncadd [#allocation4], 4294966784 }
   0xc   :  { %3005 = dma.done.wait [#allocation6], 512  }
   0xd   :  { %3006 = vsyncadd [#allocation6], 4294966784  ;;  %v3011_v1 = vmov 0   ;;  %v3077_v2 = vld [vmem:[%s3744_s3 + $0x18] sm:$0xff]  ;;  %v3082_v3 = vld [vmem:[%s3744_s3 + $0x10] sm:$0xff]  ;;  %v3012_v7 = vmov 0.0  }
   0xe   :  { %2664 = vset.pattern.permute.xlu0 %v3011_v1  ;;  %2665 = vset.pattern.permute.xlu2 %v3011_v1  ;;  %v79_v4 = vld [vmem:[%s3741_s0] sm:$0xff]  ;;  %v3092_v5 = vld [vmem:[%s3744_s3 + $0x8] sm:$0xff]  ;;  %s3013_s13 = smov 32   ;;  %v3135_v37 = vld [vmem:[#allocation5 + $0x10] sm:$0xff]  ;;  %s3014_s14 = smov 64   ;;  %vm119_vm4 = vcmask 261120  }
   0xf   :  { %135 = vmatpush.msra.mxu0 %v3077_v2  ;;  %198 = vmatpush.msra.mxu1 %v3077_v2  ;;  %v3099_v6 = vld [vmem:[%s3744_s3] sm:$0xff]  ;;  %v3139_v38 = vld [vmem:[#allocation3 + $0x10] sm:$0xff]  ;;  %v3141_v39 = vld [vmem:[#allocation5 + $0x8] sm:$0xff] }
  0x10   :  { %86 = vperm.xlu0 %2664, %v79_v4   ;;  %v3113_v8 = vld [vmem:[%s3742_s1] ss:$0 sm:$0xff]  ;;  %v3143_v40 = vld [vmem:[#allocation3 + $0x8] sm:$0xff]  ;;  %v3149_v41 = vld [vmem:[#allocation5] sm:$0xff] }
  0x11   :  { %136 = vmatpush.msra.mxu0 %v3082_v3  ;;  %199 = vmatpush.msra.mxu1 %v3082_v3  ;;  %v3118_v10 = vld [vmem:[%s3743_s2] ss:$0 sm:$0xff]  ;;  %v3151_v42 = vld [vmem:[#allocation3] sm:$0xff] }
  0x12   :  { %v3131_v35 = vld [vmem:[#allocation5 + $0x18] sm:$0xff] }
  0x13   :  { %137 = vmatpush.msra.mxu0 %v3092_v5  ;;  %200 = vmatpush.msra.mxu1 %v3092_v5  ;;  %v3133_v36 = vld [vmem:[#allocation3 + $0x18] sm:$0xff] }
  0x14   :  { %262 = vmatpush.msra.mxu2 %v3131_v35  ;;  %282 = vmatpush.msra.mxu3 %v3133_v36  ;;  %v3191_v50 = vld [vmem:[%s3747_s6] ss:$0 sm:$0xff] }
  0x15   :  { %138 = vmatpush.msra.mxu0 %v3099_v6  ;;  %201 = vmatpush.msra.mxu1 %v3099_v6 }
  0x16   :  { %139 = vmatmul.f32.vlgmr.msra.gmra.mxu0 %v3012_v7  ;;  %263 = vmatpush.msra.mxu2 %v3135_v37 }
  0x17   :  { %349 = vmatpush.msrb.mxu0 %v3077_v2  ;;  %418 = vmatpush.msrb.mxu1 %v3131_v35 }
  0x18   :  { %283 = vmatpush.msra.mxu3 %v3139_v38  ;;  %264 = vmatpush.msra.mxu2 %v3141_v39 }
  0x19   :  { %350 = vmatpush.msrb.mxu0 %v3082_v3  ;;  %419 = vmatpush.msrb.mxu1 %v3135_v37 }
  0x1a   :  { %284 = vmatpush.msra.mxu3 %v3143_v40  ;;  %265 = vmatpush.msra.mxu2 %v3149_v41 }
  0x1b   :  { %351 = vmatpush.msrb.mxu0 %v3092_v5  ;;  %420 = vmatpush.msrb.mxu1 %v3141_v39 }
  0x1c   :  { %285 = vmatpush.msra.mxu3 %v3151_v42  ;;  %266 = vmatmul.f32.vlgmr.msra.gmra.mxu2 %v3012_v7 }
  0x1d   :  { %352 = vmatpush.msrb.mxu0 %v3099_v6  ;;  %421 = vmatpush.msrb.mxu1 %v3149_v41 }
  0x1e   :  { %438 = vmatpush.msrb.mxu2 %v3133_v36  ;;  %502 = vmatpush.msrb.mxu3 %v3077_v2 }
  0x1f   :  { %571 = vmatpush.msra.mxu0 %v3131_v35 }
  0x20   :  { %439 = vmatpush.msrb.mxu2 %v3139_v38  ;;  %503 = vmatpush.msrb.mxu3 %v3082_v3 }
  0x21   :  { %572 = vmatpush.msra.mxu0 %v3135_v37 }
  0x22   :  { %440 = vmatpush.msrb.mxu2 %v3143_v40  ;;  %504 = vmatpush.msrb.mxu3 %v3092_v5 }
  0x23   :  { %573 = vmatpush.msra.mxu0 %v3141_v39 }
  0x24   :  { %441 = vmatpush.msrb.mxu2 %v3151_v42  ;;  %505 = vmatpush.msrb.mxu3 %v3099_v6 }
  0x25   :  { %574 = vmatpush.msra.mxu0 %v3149_v41 }
  0x26   :  { %655 = vmatpush.msra.mxu2 %v3077_v2 }
  0x28   :  { %656 = vmatpush.msra.mxu2 %v3082_v3 }
  0x2a   :  { %657 = vmatpush.msra.mxu2 %v3092_v5 }
  0x2c   :  { %658 = vmatpush.msra.mxu2 %v3099_v6 }
  0x82   :  { %v87_v9 = vpop.permute.xlu0 %86 }
  0x83   :  { %v107_v11 = vmul.f32 %v3113_v8, %v87_v9 }
  0x85   :  { %v3122_v12 = vadd.f32 %v3118_v10, %v107_v11 }
  0x93   :  { %v140_v13 = vpop.f32.mrf.mxu0 }
  0x94   :  { %v143_v14 = vadd.f32 %v140_v13, %v3122_v12 }
  0x96   :  { %2671 = vtanh.f32 %v143_v14  ;;  %v2578_v16 = vmul.f32 -1.442695, %v143_v14 }
  0x98   :  { %2673 = vpow2.f32 %v2578_v16 }
  0x9c   :  { %v2672_v15 = vpop.eup %2671 }
  0x9d   :  { %166 = vrot.lane.b32.xlu0 %v2672_v15, %s3013_s13 }
  0x9e   :  { %v2674_v17 = vpop.eup %2673 }
  0x9f   :  { %v147_v18 = vadd.f32 1.0, %v2674_v17  ;;  %v267_v49 = vpop.f32.mrf.mxu2 }
  0xa1   :  { %2675 = vrcp.f32 %v147_v18  ;;  %v159_v24 = vand.u32 2147483648, %v147_v18  ;;  %vm153_vm1 = vweird.f32 %v147_v18  ;;  %v157_v25 = vand.u32 2147483647, %v147_v18 }
  0xa3   :  { %v160_v27 = vor.u32 1.1754944e-38, %v159_v24  ;;  %vm158_vm3 = vcmp.eq.f32.partialorder %v157_v25, 8.507059e+37 }
  0xa7   :  { %v2676_v19 = vpop.eup %2675 }
  0xa8   :  { %v149_v20 = vmul.f32 %v2676_v19, %v147_v18  ;;  %vm154_vm0 = vweird.f32 %v2676_v19 }
  0xa9   :  { %vm155_vm2 = vmor %vm153_vm1, %vm154_vm0 }
  0xaa   :  { %v150_v21 = vsub.f32 1.0, %v149_v20 }
  0xac   :  { %v151_v22 = vmul.f32 %v2676_v19, %v150_v21 }
  0xae   :  { %v152_v23 = vadd.f32 %v2676_v19, %v151_v22 }
  0xb0   :  { %v156_v26 = vsel %vm155_vm2, %v2676_v19, %v152_v23 }
  0xb1   :  { %v161_v29 = vsel %vm158_vm3, %v160_v27, %v156_v26 }
  0xb2   :  { %v164_v31 = vmul.f32 0.0, %v161_v29 }
 0x10f   :  { %v167_v28 = vpop.permute.xlu0 %166 }
 0x110   :  { %v169_v30 = vmul.f32 %v167_v28, %v161_v29 }
 0x112   :  { %171 = vrot.lane.b32.xlu1 %v169_v30, %s3013_s13 }
 0x184   :  { %v172_v32 = vpop.permute.xlu1 %171 }
 0x185   :  { %v3127_v33 = vadd.f32 %v172_v32, %v164_v31 }
 0x187   :  { %2677 = vtanh.f32 %v3127_v33 }
 0x18d   :  { %v2678_v34 = vpop.eup %2677 }
 0x18e   :  { %177 = vrot.lane.b32.xlu1 %v2678_v34, %s3013_s13 }
 0x200   :  { %v178_v43 = vpop.permute.xlu1 %177 }
 0x201   :  { %v180_v44 = vmul.f32 %v178_v43, %v161_v29  ;;  %v231_v29 = vrot.slane %v3127_v33, 6 }
 0x203   :  { %182 = vrot.lane.b32.xlu2 %v180_v44, %s3014_s14 }
 0x25d   :  { %v183_v45 = vpop.permute.xlu2 %182 }
 0x25e   :  { %2579 = vmatmul.msk.f32.vlgmr.msra.gmra.mxu1 %vm119_vm4, %v183_v45  ;;  %2581 = vmatmul.msk.f32.vlgmr.msra.gmra.mxu3 %vm119_vm4, %v183_v45 }
 0x25f   :  { %591 = vmatpush.msra.mxu1 %v3133_v36  ;;  %721 = vmatpush.msra.mxu3 %v3131_v35 }
 0x261   :  { %592 = vmatpush.msra.mxu1 %v3139_v38  ;;  %722 = vmatpush.msra.mxu3 %v3135_v37 }
 0x263   :  { %593 = vmatpush.msra.mxu1 %v3143_v40  ;;  %723 = vmatpush.msra.mxu3 %v3141_v39 }
 0x265   :  { %594 = vmatpush.msra.mxu1 %v3151_v42  ;;  %724 = vmatpush.msra.mxu3 %v3149_v41 }
 0x2db   :  { %v203_v46 = vpop.f32.mrf.mxu1 }
 0x2dc   :  { %v207_v47 = vrot.slane %v203_v46, 6 }
 0x2de   :  { %v209_v48 = vadd.f32 %v207_v47, %v3122_v12 }
 0x2e0   :  { %2679 = vtanh.f32 %v209_v48  ;;  %v2580_v56 = vmul.f32 -1.442695, %v209_v48 }
 0x2e1   :  { %v287_v51 = vpop.f32.mrf.mxu3 }
 0x2e2   :  { %v288_v52 = vadd.f32 %v287_v51, %v267_v49 }
 0x2e4   :  { %v293_v53 = vadd.f32 %v3191_v50, %v288_v52 }
 0x2e6   :  { %v2680_v54 = vpop.eup %2679  ;;  %2681 = vtanh.f32 %v293_v53  ;;  %v2582_v61 = vmul.f32 -1.442695, %v293_v53 }
 0x2e7   :  { %235 = vrot.lane.b32.xlu2 %v2680_v54, %s3013_s13  ;;  %2683 = vpow2.f32 %v2580_v56 }
 0x2ec   :  { %v2682_v55 = vpop.eup %2681 }
 0x2ed   :  { %316 = vrot.lane.b32.xlu0 %v2682_v55, %s3013_s13  ;;  %v2684_v57 = vpop.eup %2683 }
 0x2ee   :  { %v213_v58 = vadd.f32 1.0, %v2684_v57 }
 0x2f0   :  { %2685 = vrcp.f32 %v213_v58  ;;  %v225_v1 = vand.u32 2147483648, %v213_v58  ;;  %vm219_vm6 = vweird.f32 %v213_v58  ;;  %v223_v7 = vand.u32 2147483647, %v213_v58 }
 0x2f1   :  { %2687 = vpow2.f32 %v2582_v61 }
 0x2f2   :  { %v226_v13 = vor.u32 1.1754944e-38, %v225_v1  ;;  %vm224_vm8 = vcmp.eq.f32.partialorder %v223_v7, 8.507059e+37 }
 0x2f6   :  { %v2686_v59 = vpop.eup %2685 }
 0x2f7   :  { %v215_v60 = vmul.f32 %v2686_v59, %v213_v58  ;;  %vm220_vm5 = vweird.f32 %v2686_v59  ;;  %v2688_v4 = vpop.eup %2687 }
 0x2f8   :  { %vm221_vm7 = vmor %vm219_vm6, %vm220_vm5  ;;  %v297_v11 = vadd.f32 1.0, %v2688_v4 }
 0x2f9   :  { %v216_v62 = vsub.f32 1.0, %v215_v60 }
 0x2fa   :  { %2689 = vrcp.f32 %v297_v11  ;;  %v309_v22 = vand.u32 2147483648, %v297_v11  ;;  %vm303_vm10 = vweird.f32 %v297_v11  ;;  %v307_v23 = vand.u32 2147483647, %v297_v11 }
 0x2fb   :  { %v217_v63 = vmul.f32 %v2686_v59, %v216_v62 }
 0x2fc   :  { %v310_v25 = vor.u32 1.1754944e-38, %v309_v22  ;;  %vm308_vm12 = vcmp.eq.f32.partialorder %v307_v23, 8.507059e+37 }
 0x2fd   :  { %v218_v0 = vadd.f32 %v2686_v59, %v217_v63 }
 0x2ff   :  { %v222_v9 = vsel %vm221_vm7, %v2686_v59, %v218_v0 }
 0x300   :  { %v227_v15 = vsel %vm224_vm8, %v226_v13, %v222_v9  ;;  %v2690_v17 = vpop.eup %2689 }
 0x301   :  { %v299_v18 = vmul.f32 %v2690_v17, %v297_v11  ;;  %vm304_vm9 = vweird.f32 %v2690_v17  ;;  %v233_v30 = vmul.f32 %v231_v29, %v227_v15 }
 0x302   :  { %vm305_vm11 = vmor %vm303_vm10, %vm304_vm9 }
 0x303   :  { %v300_v19 = vsub.f32 1.0, %v299_v18 }
 0x305   :  { %v301_v20 = vmul.f32 %v2690_v17, %v300_v19 }
 0x307   :  { %v302_v21 = vadd.f32 %v2690_v17, %v301_v20 }
 0x309   :  { %v306_v24 = vsel %vm305_vm11, %v2690_v17, %v302_v21 }
 0x30a   :  { %v311_v27 = vsel %vm308_vm12, %v310_v25, %v306_v24 }
 0x30b   :  { %v314_v34 = vmul.f32 0.0, %v311_v27 }
 0x341   :  { %v236_v14 = vpop.permute.xlu2 %235 }
 0x342   :  { %v238_v16 = vmul.f32 %v236_v14, %v227_v15 }
 0x344   :  { %240 = vrot.lane.b32.xlu1 %v238_v16, %s3013_s13 }
 0x35f   :  { %v317_v26 = vpop.permute.xlu0 %316 }
 0x360   :  { %v319_v28 = vmul.f32 %v317_v26, %v311_v27 }
 0x362   :  { %321 = vrot.lane.b32.xlu2 %v319_v28, %s3013_s13 }
 0x3b6   :  { %v241_v31 = vpop.permute.xlu1 %240 }
 0x3b7   :  { %v3199_v32 = vadd.f32 %v241_v31, %v233_v30 }
 0x3b9   :  { %2691 = vtanh.f32 %v3199_v32 }
 0x3bc   :  { %v322_v43 = vpop.permute.xlu2 %321 }
 0x3bd   :  { %v3202_v44 = vadd.f32 %v322_v43, %v314_v34 }
 0x3bf   :  { %v2692_v45 = vpop.eup %2691  ;;  %2693 = vtanh.f32 %v3202_v44 }
 0x3c0   :  { %246 = vrot.lane.b32.xlu0 %v2692_v45, %s3013_s13 }
 0x3c5   :  { %v2694_v46 = vpop.eup %2693 }
 0x3c6   :  { %327 = vrot.lane.b32.xlu1 %v2694_v46, %s3013_s13 }
 0x432   :  { %v247_v47 = vpop.permute.xlu0 %246 }
 0x433   :  { %v249_v33 = vmul.f32 %v247_v47, %v227_v15  ;;  %v382_v47 = vrot.slane %v3199_v32, 6 }
 0x435   :  { %v332_v48 = vrot.slane %v249_v33, 2 }
 0x437   :  { %333 = vrot.lane.b32.xlu2 %v332_v48, %s3014_s14 }
 0x438   :  { %v328_v49 = vpop.permute.xlu1 %327 }
 0x439   :  { %v330_v51 = vmul.f32 %v328_v49, %v311_v27 }
 0x43b   :  { %402 = vrot.lane.b32.xlu0 %v330_v51, %s3014_s14 }
 0x491   :  { %v334_v52 = vpop.permute.xlu2 %333 }
 0x492   :  { %2583 = vmatmul.msk.f32.vlgmr.msrb.gmra.mxu0 %vm119_vm4, %v334_v52  ;;  %2586 = vmatmul.msk.f32.vlgmr.msrb.gmra.mxu2 %vm119_vm4, %v334_v52 }
 0x493   :  { %741 = vmatpush.msrb.mxu0 %v3133_v36  ;;  %873 = vmatpush.msrb.mxu2 %v3131_v35 }
 0x495   :  { %742 = vmatpush.msrb.mxu0 %v3139_v38  ;;  %874 = vmatpush.msrb.mxu2 %v3135_v37 }
 0x497   :  { %743 = vmatpush.msrb.mxu0 %v3143_v40  ;;  %875 = vmatpush.msrb.mxu2 %v3141_v39 }
 0x499   :  { %744 = vmatpush.msrb.mxu0 %v3151_v42  ;;  %876 = vmatpush.msrb.mxu2 %v3149_v41 }
 0x4ad   :  { %v403_v53 = vpop.permute.xlu0 %402 }
 0x4ae   :  { %2585 = vmatmul.msk.f32.vlgmr.msrb.gmra.mxu1 %vm119_vm4, %v403_v53 }
 0x4af   :  { %804 = vmatpush.msrb.mxu1 %v3077_v2 }
 0x4b1   :  { %805 = vmatpush.msrb.mxu1 %v3082_v3 }
 0x4b3   :  { %806 = vmatpush.msrb.mxu1 %v3092_v5 }
 0x4b5   :  { %807 = vmatpush.msrb.mxu1 %v3099_v6 }
 0x50f   :  { %v354_v54 = vpop.f32.mrf.mxu0 }
 0x510   :  { %v358_v55 = vrot.slane %v354_v54, 4 }
 0x512   :  { %v360_v56 = vadd.f32 %v358_v55, %v3122_v12 }
 0x514   :  { %2695 = vtanh.f32 %v360_v56  ;;  %v2584_v63 = vmul.f32 -1.442695, %v360_v56 }
 0x515   :  { %v443_v58 = vpop.f32.mrf.mxu2 }
 0x51a   :  { %v2696_v57 = vpop.eup %2695 }
 0x51b   :  { %386 = vrot.lane.b32.xlu1 %v2696_v57, %s3013_s13 }
 0x52b   :  { %v423_v59 = vpop.f32.mrf.mxu1 }
 0x52c   :  { %v444_v60 = vadd.f32 %v443_v58, %v423_v59 }
 0x52e   :  { %v446_v61 = vadd.f32 %v3191_v50, %v444_v60 }
 0x530   :  { %2697 = vtanh.f32 %v446_v61  ;;  %v2587_v0 = vmul.f32 -1.442695, %v446_v61 }
 0x531   :  { %2699 = vpow2.f32 %v2584_v63 }
 0x532   :  { %2701 = vpow2.f32 %v2587_v0 }
 0x536   :  { %v2698_v62 = vpop.eup %2697 }
 0x537   :  { %469 = vrot.lane.b32.xlu2 %v2698_v62, %s3013_s13  ;;  %v2700_v1 = vpop.eup %2699 }
 0x538   :  { %v364_v4 = vadd.f32 1.0, %v2700_v1  ;;  %v2702_v7 = vpop.eup %2701 }
 0x539   :  { %v450_v9 = vadd.f32 1.0, %v2702_v7 }
 0x53a   :  { %2703 = vrcp.f32 %v364_v4  ;;  %v376_v21 = vand.u32 2147483648, %v364_v4  ;;  %vm370_vm14 = vweird.f32 %v364_v4  ;;  %v374_v22 = vand.u32 2147483647, %v364_v4 }
 0x53b   :  { %2705 = vrcp.f32 %v450_v9  ;;  %v462_v26 = vand.u32 2147483648, %v450_v9  ;;  %vm456_vm2 = vweird.f32 %v450_v9  ;;  %v460_v27 = vand.u32 2147483647, %v450_v9 }
 0x53c   :  { %v377_v25 = vor.u32 1.1754944e-38, %v376_v21  ;;  %vm375_vm1 = vcmp.eq.f32.partialorder %v374_v22, 8.507059e+37 }
 0x53d   :  { %v463_v34 = vor.u32 1.1754944e-38, %v462_v26  ;;  %vm461_vm5 = vcmp.eq.f32.partialorder %v460_v27, 8.507059e+37 }
 0x540   :  { %v2704_v11 = vpop.eup %2703 }
 0x541   :  { %v366_v13 = vmul.f32 %v2704_v11, %v364_v4  ;;  %v2706_v14 = vpop.eup %2705  ;;  %vm371_vm13 = vweird.f32 %v2704_v11 }
 0x542   :  { %v452_v16 = vmul.f32 %v2706_v14, %v450_v9  ;;  %vm372_vm15 = vmor %vm370_vm14, %vm371_vm13  ;;  %vm457_vm0 = vweird.f32 %v2706_v14 }
 0x543   :  { %v367_v15 = vsub.f32 1.0, %v366_v13  ;;  %vm458_vm3 = vmor %vm456_vm2, %vm457_vm0 }
 0x544   :  { %v453_v18 = vsub.f32 1.0, %v452_v16 }
 0x545   :  { %v368_v17 = vmul.f32 %v2704_v11, %v367_v15 }
 0x546   :  { %v454_v20 = vmul.f32 %v2706_v14, %v453_v18 }
 0x547   :  { %v369_v19 = vadd.f32 %v2704_v11, %v368_v17 }
 0x548   :  { %v455_v24 = vadd.f32 %v2706_v14, %v454_v20 }
 0x549   :  { %v373_v23 = vsel %vm372_vm15, %v2704_v11, %v369_v19 }
 0x54a   :  { %v378_v29 = vsel %vm375_vm1, %v377_v25, %v373_v23  ;;  %v459_v31 = vsel %vm458_vm3, %v2706_v14, %v455_v24 }
 0x54b   :  { %v464_v45 = vsel %vm461_vm5, %v463_v34, %v459_v31  ;;  %v384_v33 = vmul.f32 %v382_v47, %v378_v29 }
 0x54c   :  { %v467_v51 = vmul.f32 %v464_v45, %v3202_v44 }
 0x58d   :  { %v387_v28 = vpop.permute.xlu1 %386 }
 0x58e   :  { %v389_v30 = vmul.f32 %v387_v28, %v378_v29 }
 0x590   :  { %391 = vrot.lane.b32.xlu0 %v389_v30, %s3013_s13 }
 0x591   :  { %v470_v43 = vpop.permute.xlu2 %469 }
 0x592   :  { %v472_v46 = vmul.f32 %v470_v43, %v464_v45 }
 0x594   :  { %474 = vrot.lane.b32.xlu1 %v472_v46, %s3013_s13 }
 0x602   :  { %v392_v48 = vpop.permute.xlu0 %391 }
 0x603   :  { %v3231_v49 = vadd.f32 %v392_v48, %v384_v33 }
 0x605   :  { %2707 = vtanh.f32 %v3231_v49 }
 0x606   :  { %v475_v52 = vpop.permute.xlu1 %474 }
 0x607   :  { %v3235_v53 = vadd.f32 %v475_v52, %v467_v51 }
 0x609   :  { %2709 = vtanh.f32 %v3235_v53 }
 0x60b   :  { %v2708_v54 = vpop.eup %2707 }
 0x60c   :  { %397 = vrot.lane.b32.xlu2 %v2708_v54, %s3013_s13 }
 0x60f   :  { %v2710_v55 = vpop.eup %2709 }
 0x610   :  { %480 = vrot.lane.b32.xlu0 %v2710_v55, %s3013_s13  ;;  %v535_v55 = vrot.slane %v3231_v49, 6 }
 0x666   :  { %v398_v32 = vpop.permute.xlu2 %397 }
 0x667   :  { %v400_v56 = vmul.f32 %v398_v32, %v378_v29 }
 0x669   :  { %v485_v57 = vrot.slane %v400_v56, 4 }
 0x66b   :  { %486 = vrot.lane.b32.xlu1 %v485_v57, %s3014_s14 }
 0x682   :  { %v481_v58 = vpop.permute.xlu0 %480 }
 0x683   :  { %v483_v59 = vmul.f32 %v481_v58, %v464_v45 }
 0x685   :  { %555 = vrot.lane.b32.xlu2 %v483_v59, %s3014_s14 }
 0x6dd   :  { %v487_v44 = vpop.permute.xlu1 %486 }
 0x6de   :  { %2588 = vmatmul.msk.f32.vlgmr.msrb.gmra.mxu3 %vm119_vm4, %v487_v44  ;;  %2591 = vmatmul.msk.f32.vlgmr.msra.gmra.mxu1 %vm119_vm4, %v487_v44 }
 0x6df   :  { %v556_v60 = vpop.permute.xlu2 %555  ;;  %893 = vmatpush.msrb.mxu3 %v3133_v36  ;;  %1026 = vmatpush.msra.mxu1 %v3131_v35 }
 0x6e0   :  { %2590 = vmatmul.msk.f32.vlgmr.msra.gmra.mxu0 %vm119_vm4, %v556_v60 }
 0x6e1   :  { %894 = vmatpush.msrb.mxu3 %v3139_v38  ;;  %957 = vmatpush.msra.mxu0 %v3077_v2 }
 0x6e2   :  { %1027 = vmatpush.msra.mxu1 %v3135_v37 }
 0x6e3   :  { %895 = vmatpush.msrb.mxu3 %v3143_v40  ;;  %958 = vmatpush.msra.mxu0 %v3082_v3 }
 0x6e4   :  { %1028 = vmatpush.msra.mxu1 %v3141_v39 }
 0x6e5   :  { %896 = vmatpush.msrb.mxu3 %v3151_v42  ;;  %959 = vmatpush.msra.mxu0 %v3092_v5 }
 0x6e6   :  { %1029 = vmatpush.msra.mxu1 %v3149_v41 }
 0x6e7   :  { %960 = vmatpush.msra.mxu0 %v3099_v6 }
 0x75b   :  { %v596_v61 = vpop.f32.mrf.mxu1 }
 0x75d   :  { %v576_v62 = vpop.f32.mrf.mxu0 }
 0x75e   :  { %v597_v63 = vadd.f32 %v596_v61, %v576_v62 }
 0x760   :  { %v599_v0 = vadd.f32 %v3191_v50, %v597_v63 }
 0x761   :  { %v507_v1 = vpop.f32.mrf.mxu3 }
 0x762   :  { %2711 = vtanh.f32 %v599_v0  ;;  %v511_v4 = vrot.slane %v507_v1, 2  ;;  %v2592_v13 = vmul.f32 -1.442695, %v599_v0 }
 0x764   :  { %v513_v7 = vadd.f32 %v511_v4, %v3122_v12 }
 0x766   :  { %2713 = vtanh.f32 %v513_v7  ;;  %v2589_v14 = vmul.f32 -1.442695, %v513_v7 }
 0x767   :  { %2715 = vpow2.f32 %v2592_v13 }
 0x768   :  { %v2712_v9 = vpop.eup %2711  ;;  %2717 = vpow2.f32 %v2589_v14 }
 0x769   :  { %622 = vrot.lane.b32.xlu1 %v2712_v9, %s3013_s13 }
 0x76c   :  { %v2714_v11 = vpop.eup %2713 }
 0x76d   :  { %539 = vrot.lane.b32.xlu0 %v2714_v11, %s3013_s13  ;;  %v2716_v15 = vpop.eup %2715 }
 0x76e   :  { %v603_v16 = vadd.f32 1.0, %v2716_v15  ;;  %v2718_v17 = vpop.eup %2717 }
 0x76f   :  { %v517_v18 = vadd.f32 1.0, %v2718_v17 }
 0x770   :  { %2719 = vrcp.f32 %v603_v16  ;;  %v615_v27 = vand.u32 2147483648, %v603_v16  ;;  %vm609_vm7 = vweird.f32 %v603_v16  ;;  %v613_v28 = vand.u32 2147483647, %v603_v16 }
 0x771   :  { %2721 = vrcp.f32 %v517_v18  ;;  %v529_v34 = vand.u32 2147483648, %v517_v18  ;;  %vm523_vm11 = vweird.f32 %v517_v18  ;;  %v527_v43 = vand.u32 2147483647, %v517_v18 }
 0x772   :  { %v616_v31 = vor.u32 1.1754944e-38, %v615_v27  ;;  %vm614_vm10 = vcmp.eq.f32.partialorder %v613_v28, 8.507059e+37 }
 0x773   :  { %v530_v48 = vor.u32 1.1754944e-38, %v529_v34  ;;  %vm528_vm13 = vcmp.eq.f32.partialorder %v527_v43, 8.507059e+37 }
 0x776   :  { %v2720_v19 = vpop.eup %2719 }
 0x777   :  { %v605_v20 = vmul.f32 %v2720_v19, %v603_v16  ;;  %v2722_v12 = vpop.eup %2721  ;;  %vm610_vm6 = vweird.f32 %v2720_v19 }
 0x778   :  { %v519_v22 = vmul.f32 %v2722_v12, %v517_v18  ;;  %vm611_vm8 = vmor %vm609_vm7, %vm610_vm6  ;;  %vm524_vm9 = vweird.f32 %v2722_v12 }
 0x779   :  { %v606_v21 = vsub.f32 1.0, %v605_v20  ;;  %vm525_vm12 = vmor %vm523_vm11, %vm524_vm9 }
 0x77a   :  { %v520_v24 = vsub.f32 1.0, %v519_v22 }
 0x77b   :  { %v607_v23 = vmul.f32 %v2720_v19, %v606_v21 }
 0x77c   :  { %v521_v26 = vmul.f32 %v2722_v12, %v520_v24 }
 0x77d   :  { %v608_v25 = vadd.f32 %v2720_v19, %v607_v23 }
 0x77e   :  { %v522_v30 = vadd.f32 %v2722_v12, %v521_v26 }
 0x77f   :  { %v612_v29 = vsel %vm611_vm8, %v2720_v19, %v608_v25 }
 0x780   :  { %v617_v46 = vsel %vm614_vm10, %v616_v31, %v612_v29  ;;  %v526_v33 = vsel %vm525_vm12, %v2722_v12, %v522_v30 }
 0x781   :  { %v531_v51 = vsel %vm528_vm13, %v530_v48, %v526_v33  ;;  %v620_v59 = vmul.f32 %v617_v46, %v3235_v53  ;;  %v80_v53 = vld [vmem:[%s3741_s0 + $0x8] sm:$0xff] }
 0x782   :  { %v537_v32 = vmul.f32 %v535_v55, %v531_v51 }
 0x7db   :  { %v623_v45 = vpop.permute.xlu1 %622 }
 0x7dc   :  { %v625_v47 = vmul.f32 %v623_v45, %v617_v46 }
 0x7de   :  { %627 = vrot.lane.b32.xlu0 %v625_v47, %s3013_s13 }
 0x7df   :  { %v540_v52 = vpop.permute.xlu0 %539 }
 0x7e0   :  { %v542_v54 = vmul.f32 %v540_v52, %v531_v51 }
 0x7e2   :  { %544 = vrot.lane.b32.xlu2 %v542_v54, %s3013_s13 }
 0x83c   :  { %v545_v56 = vpop.permute.xlu2 %544 }
 0x83d   :  { %v3264_v57 = vadd.f32 %v545_v56, %v537_v32 }
 0x83f   :  { %2723 = vtanh.f32 %v3264_v57 }
 0x845   :  { %v2724_v58 = vpop.eup %2723 }
 0x846   :  { %550 = vrot.lane.b32.xlu1 %v2724_v58, %s3013_s13 }
 0x850   :  { %v628_v44 = vpop.permute.xlu0 %627 }
 0x851   :  { %v3269_v60 = vadd.f32 %v628_v44, %v620_v59 }
 0x853   :  { %2725 = vtanh.f32 %v3269_v60 }
 0x859   :  { %v2726_v61 = vpop.eup %2725 }
 0x85a   :  { %633 = vrot.lane.b32.xlu2 %v2726_v61, %s3013_s13 }
 0x862   :  { %91 = vperm.xlu2 %2665, %v80_v53  }
 0x8b4   :  { %v634_v49 = vpop.permute.xlu2 %633 }
 0x8b5   :  { %v636_v62 = vmul.f32 %v634_v49, %v617_v46  ;;  %v685_v49 = vrot.slane %v3264_v57, 6 }
 0x8b7   :  { %705 = vrot.lane.b32.xlu1 %v636_v62, %s3014_s14 }
 0x8b8   :  { %v551_v63 = vpop.permute.xlu1 %550 }
 0x8b9   :  { %v553_v0 = vmul.f32 %v551_v63, %v531_v51 }
 0x8bb   :  { %v638_v1 = vrot.slane %v553_v0, 6 }
 0x8bc   :  { %v92_v9 = vpop.permute.xlu2 %91 }
 0x8bd   :  { %639 = vrot.lane.b32.xlu0 %v638_v1, %s3014_s14  ;;  %v108_v11 = vmul.f32 %v3113_v8, %v92_v9 }
 0x8bf   :  { %v3296_v17 = vadd.f32 %v3118_v10, %v108_v11 }
 0x929   :  { %v706_v4 = vpop.permute.xlu1 %705 }
 0x92a   :  { %2595 = vmatmul.msk.f32.vlgmr.msra.gmra.mxu3 %vm119_vm4, %v706_v4 }
 0x92b   :  { %1110 = vmatpush.msra.mxu3 %v3077_v2 }
 0x92d   :  { %1111 = vmatpush.msra.mxu3 %v3082_v3 }
 0x92f   :  { %v640_v7 = vpop.permute.xlu0 %639  ;;  %1112 = vmatpush.msra.mxu3 %v3092_v5 }
 0x930   :  { %2593 = vmatmul.msk.f32.vlgmr.msra.gmra.mxu2 %vm119_vm4, %v640_v7  ;;  %2596 = vmatmul.msk.f32.vlgmr.msrb.gmra.mxu0 %vm119_vm4, %v640_v7 }
 0x931   :  { %1046 = vmatpush.msra.mxu2 %v3133_v36  ;;  %1179 = vmatpush.msrb.mxu0 %v3131_v35 }
 0x932   :  { %1113 = vmatpush.msra.mxu3 %v3099_v6 }
 0x933   :  { %1047 = vmatpush.msra.mxu2 %v3139_v38  ;;  %1180 = vmatpush.msrb.mxu0 %v3135_v37 }
 0x935   :  { %1048 = vmatpush.msra.mxu2 %v3143_v40  ;;  %1181 = vmatpush.msrb.mxu0 %v3141_v39 }
 0x937   :  { %1049 = vmatpush.msra.mxu2 %v3151_v42  ;;  %1182 = vmatpush.msrb.mxu0 %v3149_v41 }
 0x9ad   :  { %v726_v13 = vpop.f32.mrf.mxu3  ;;  %v746_v14 = vpop.f32.mrf.mxu0 }
 0x9ae   :  { %v747_v15 = vadd.f32 %v746_v14, %v726_v13 }
 0x9b0   :  { %v749_v16 = vadd.f32 %v3191_v50, %v747_v15 }
 0x9b2   :  { %2727 = vtanh.f32 %v749_v16  ;;  %v2597_v8 = vmul.f32 -1.442695, %v749_v16 }
 0x9b3   :  { %v660_v18 = vpop.f32.mrf.mxu2 }
 0x9b4   :  { %v663_v19 = vadd.f32 %v660_v18, %v3296_v17 }
 0x9b6   :  { %2729 = vtanh.f32 %v663_v19  ;;  %v2594_v21 = vmul.f32 -1.442695, %v663_v19 }
 0x9b7   :  { %2731 = vpow2.f32 %v2597_v8 }
 0x9b8   :  { %v2728_v20 = vpop.eup %2727  ;;  %2733 = vpow2.f32 %v2594_v21 }
 0x9b9   :  { %772 = vrot.lane.b32.xlu1 %v2728_v20, %s3013_s13 }
 0x9bc   :  { %v2730_v12 = vpop.eup %2729 }
 0x9bd   :  { %689 = vrot.lane.b32.xlu0 %v2730_v12, %s3013_s13  ;;  %v2732_v22 = vpop.eup %2731 }
 0x9be   :  { %v753_v23 = vadd.f32 1.0, %v2732_v22  ;;  %v2734_v24 = vpop.eup %2733 }
 0x9bf   :  { %v667_v10 = vadd.f32 1.0, %v2734_v24 }
 0x9c0   :  { %2735 = vrcp.f32 %v753_v23  ;;  %v765_v45 = vand.u32 2147483648, %v753_v23  ;;  %vm759_vm15 = vweird.f32 %v753_v23  ;;  %v763_v46 = vand.u32 2147483647, %v753_v23 }
 0x9c1   :  { %2737 = vrcp.f32 %v667_v10  ;;  %v679_v51 = vand.u32 2147483648, %v667_v10  ;;  %vm673_vm3 = vweird.f32 %v667_v10  ;;  %v677_v52 = vand.u32 2147483647, %v667_v10 }
 0x9c2   :  { %v766_v48 = vor.u32 1.1754944e-38, %v765_v45  ;;  %vm764_vm2 = vcmp.eq.f32.partialorder %v763_v46, 8.507059e+37 }
 0x9c3   :  { %v680_v58 = vor.u32 1.1754944e-38, %v679_v51  ;;  %vm678_vm6 = vcmp.eq.f32.partialorder %v677_v52, 8.507059e+37 }
 0x9c6   :  { %v2736_v25 = vpop.eup %2735 }
 0x9c7   :  { %v755_v26 = vmul.f32 %v2736_v25, %v753_v23  ;;  %v2738_v27 = vpop.eup %2737  ;;  %vm760_vm14 = vweird.f32 %v2736_v25 }
 0x9c8   :  { %v669_v29 = vmul.f32 %v2738_v27, %v667_v10  ;;  %vm761_vm0 = vmor %vm759_vm15, %vm760_vm14  ;;  %vm674_vm1 = vweird.f32 %v2738_v27 }
 0x9c9   :  { %v756_v28 = vsub.f32 1.0, %v755_v26  ;;  %vm675_vm5 = vmor %vm673_vm3, %vm674_vm1 }
 0x9ca   :  { %v670_v31 = vsub.f32 1.0, %v669_v29 }
 0x9cb   :  { %v757_v30 = vmul.f32 %v2736_v25, %v756_v28 }
 0x9cc   :  { %v671_v43 = vmul.f32 %v2738_v27, %v670_v31 }
 0x9cd   :  { %v758_v34 = vadd.f32 %v2736_v25, %v757_v30 }
 0x9ce   :  { %v672_v33 = vadd.f32 %v2738_v27, %v671_v43 }
 0x9cf   :  { %v762_v47 = vsel %vm761_vm0, %v2736_v25, %v758_v34 }
 0x9d0   :  { %v767_v55 = vsel %vm764_vm2, %v766_v48, %v762_v47  ;;  %v676_v56 = vsel %vm675_vm5, %v2738_v27, %v672_v33 }
 0x9d1   :  { %v681_v44 = vsel %vm678_vm6, %v680_v58, %v676_v56  ;;  %v770_v53 = vmul.f32 %v767_v55, %v3269_v60 }
 0x9d2   :  { %v687_v62 = vmul.f32 %v685_v49, %v681_v44 }
 0xa2b   :  { %v773_v54 = vpop.permute.xlu1 %772 }
 0xa2c   :  { %v775_v32 = vmul.f32 %v773_v54, %v767_v55 }
 0xa2e   :  { %777 = vrot.lane.b32.xlu0 %v775_v32, %s3013_s13 }
 0xa2f   :  { %v690_v59 = vpop.permute.xlu0 %689 }
 0xa30   :  { %v692_v61 = vmul.f32 %v690_v59, %v681_v44 }
 0xa32   :  { %694 = vrot.lane.b32.xlu2 %v692_v61, %s3013_s13 }
 0xa8c   :  { %v695_v63 = vpop.permute.xlu2 %694 }
 0xa8d   :  { %v3304_v0 = vadd.f32 %v695_v63, %v687_v62 }
 0xa8f   :  { %2739 = vtanh.f32 %v3304_v0  ;;  %v837_v58 = vrot.slane %v3304_v0, 6 }
 0xa95   :  { %v2740_v1 = vpop.eup %2739 }
 0xa96   :  { %700 = vrot.lane.b32.xlu1 %v2740_v1, %s3013_s13 }
 0xaa0   :  { %v778_v4 = vpop.permute.xlu0 %777 }
 0xaa1   :  { %v3309_v7 = vadd.f32 %v778_v4, %v770_v53 }
 0xaa3   :  { %2741 = vtanh.f32 %v3309_v7 }
 0xaa9   :  { %v2742_v9 = vpop.eup %2741 }
 0xaaa   :  { %783 = vrot.lane.b32.xlu2 %v2742_v9, %s3013_s13 }
 0xb04   :  { %v784_v57 = vpop.permute.xlu2 %783 }
 0xb05   :  { %v786_v11 = vmul.f32 %v784_v57, %v767_v55 }
 0xb07   :  { %857 = vrot.lane.b32.xlu1 %v786_v11, %s3014_s14 }
 0xb08   :  { %v701_v13 = vpop.permute.xlu1 %700 }
 0xb09   :  { %v703_v14 = vmul.f32 %v701_v13, %v681_v44  ;;  %v3350_v13 = vld [vmem:[#allocation3 + $0x18] sm:$0xff] }
 0xb0b   :  { %788 = vrot.lane.b32.xlu0 %v703_v14, %s3014_s14  ;;  %v3353_v14 = vld [vmem:[#allocation5 + $0x18] sm:$0xff] }
 0xb79   :  { %v858_v15 = vpop.permute.xlu1 %857 }
 0xb7a   :  { %2600 = vmatmul.msk.f32.vlgmr.msrb.gmra.mxu2 %vm119_vm4, %v858_v15  ;;  %v3357_v15 = vld [vmem:[#allocation5 + $0x10] sm:$0xff] }
 0xb7b   :  { %1263 = vmatpush.msrb.mxu2 %v3077_v2 }
 0xb7d   :  { %v789_v60 = vpop.permute.xlu0 %788  ;;  %1264 = vmatpush.msrb.mxu2 %v3082_v3 }
 0xb7e   :  { %2598 = vmatmul.msk.f32.vlgmr.msrb.gmra.mxu1 %vm119_vm4, %v789_v60  ;;  %2601 = vmatmul.msk.f32.vlgmr.msrb.gmra.mxu3 %vm119_vm4, %v789_v60  ;;  %v3361_v60 = vld [vmem:[#allocation5 + $0x8] sm:$0xff] }
 0xb7f   :  { %1199 = vmatpush.msrb.mxu1 %v3133_v36  ;;  %1329 = vmatpush.msrb.mxu3 %v3131_v35 }
 0xb80   :  { %1265 = vmatpush.msrb.mxu2 %v3092_v5 }
 0xb81   :  { %1200 = vmatpush.msrb.mxu1 %v3139_v38  ;;  %1330 = vmatpush.msrb.mxu3 %v3135_v37 }
 0xb82   :  { %1266 = vmatpush.msrb.mxu2 %v3099_v6 }
 0xb83   :  { %1201 = vmatpush.msrb.mxu1 %v3143_v40  ;;  %1331 = vmatpush.msrb.mxu3 %v3141_v39 }
 0xb85   :  { %1202 = vmatpush.msrb.mxu1 %v3151_v42  ;;  %1332 = vmatpush.msrb.mxu3 %v3149_v41 }
 0xbfb   :  { %v809_v2 = vpop.f32.mrf.mxu1 }
 0xbfc   :  { %v813_v3 = vrot.slane %v809_v2, 6 }
 0xbfd   :  { %v878_v5 = vpop.f32.mrf.mxu2 }
 0xbfe   :  { %v815_v35 = vadd.f32 %v813_v3, %v3296_v17 }
 0xc00   :  { %2743 = vtanh.f32 %v815_v35  ;;  %v2599_v39 = vmul.f32 -1.442695, %v815_v35 }
 0xc01   :  { %v898_v36 = vpop.f32.mrf.mxu3 }
 0xc02   :  { %v899_v16 = vadd.f32 %v898_v36, %v878_v5 }
 0xc04   :  { %v901_v37 = vadd.f32 %v3191_v50, %v899_v16 }
 0xc06   :  { %v2744_v18 = vpop.eup %2743  ;;  %2745 = vtanh.f32 %v901_v37  ;;  %v2602_v21 = vmul.f32 -1.442695, %v901_v37 }
 0xc07   :  { %841 = vrot.lane.b32.xlu2 %v2744_v18, %s3013_s13  ;;  %2747 = vpow2.f32 %v2599_v39 }
 0xc0c   :  { %v2746_v6 = vpop.eup %2745 }
 0xc0d   :  { %924 = vrot.lane.b32.xlu0 %v2746_v6, %s3013_s13  ;;  %v2748_v19 = vpop.eup %2747 }
 0xc0e   :  { %v819_v20 = vadd.f32 1.0, %v2748_v19 }
 0xc10   :  { %2749 = vrcp.f32 %v819_v20  ;;  %v831_v10 = vand.u32 2147483648, %v819_v20  ;;  %vm825_vm8 = vweird.f32 %v819_v20  ;;  %v829_v26 = vand.u32 2147483647, %v819_v20 }
 0xc11   :  { %2751 = vpow2.f32 %v2602_v21 }
 0xc12   :  { %v832_v29 = vor.u32 1.1754944e-38, %v831_v10  ;;  %vm830_vm10 = vcmp.eq.f32.partialorder %v829_v26, 8.507059e+37 }
 0xc16   :  { %v2750_v12 = vpop.eup %2749 }
 0xc17   :  { %v821_v8 = vmul.f32 %v2750_v12, %v819_v20  ;;  %vm826_vm7 = vweird.f32 %v2750_v12  ;;  %v2752_v25 = vpop.eup %2751 }
 0xc18   :  { %vm827_vm9 = vmor %vm825_vm8, %vm826_vm7  ;;  %v905_v28 = vadd.f32 1.0, %v2752_v25 }
 0xc19   :  { %v822_v22 = vsub.f32 1.0, %v821_v8 }
 0xc1a   :  { %2753 = vrcp.f32 %v905_v28  ;;  %v917_v48 = vand.u32 2147483648, %v905_v28  ;;  %vm911_vm12 = vweird.f32 %v905_v28  ;;  %v915_v51 = vand.u32 2147483647, %v905_v28 }
 0xc1b   :  { %v823_v23 = vmul.f32 %v2750_v12, %v822_v22 }
 0xc1c   :  { %v918_v54 = vor.u32 1.1754944e-38, %v917_v48  ;;  %vm916_vm14 = vcmp.eq.f32.partialorder %v915_v51, 8.507059e+37 }
 0xc1d   :  { %v824_v24 = vadd.f32 %v2750_v12, %v823_v23 }
 0xc1f   :  { %v828_v27 = vsel %vm827_vm9, %v2750_v12, %v824_v24 }
 0xc20   :  { %v833_v31 = vsel %vm830_vm10, %v832_v29, %v828_v27  ;;  %v2754_v43 = vpop.eup %2753 }
 0xc21   :  { %v907_v45 = vmul.f32 %v2754_v43, %v905_v28  ;;  %vm912_vm11 = vweird.f32 %v2754_v43  ;;  %v839_v59 = vmul.f32 %v837_v58, %v833_v31 }
 0xc22   :  { %vm913_vm13 = vmor %vm911_vm12, %vm912_vm11 }
 0xc23   :  { %v908_v46 = vsub.f32 1.0, %v907_v45 }
 0xc25   :  { %v909_v47 = vmul.f32 %v2754_v43, %v908_v46 }
 0xc27   :  { %v910_v33 = vadd.f32 %v2754_v43, %v909_v47 }
 0xc29   :  { %v914_v52 = vsel %vm913_vm13, %v2754_v43, %v910_v33 }
 0xc2a   :  { %v919_v32 = vsel %vm916_vm14, %v918_v54, %v914_v52 }
 0xc2b   :  { %v922_v49 = vmul.f32 %v919_v32, %v3309_v7 }
 0xc61   :  { %v842_v30 = vpop.permute.xlu2 %841 }
 0xc62   :  { %v844_v34 = vmul.f32 %v842_v30, %v833_v31 }
 0xc64   :  { %846 = vrot.lane.b32.xlu1 %v844_v34, %s3013_s13 }
 0xc7f   :  { %v925_v55 = vpop.permute.xlu0 %924 }
 0xc80   :  { %v927_v56 = vmul.f32 %v925_v55, %v919_v32 }
 0xc82   :  { %929 = vrot.lane.b32.xlu2 %v927_v56, %s3013_s13 }
 0xcd6   :  { %v847_v44 = vpop.permute.xlu1 %846 }
 0xcd7   :  { %v3337_v61 = vadd.f32 %v847_v44, %v839_v59 }
 0xcd9   :  { %2755 = vtanh.f32 %v3337_v61  ;;  %v990_v58 = vrot.slane %v3337_v61, 6 }
 0xcdc   :  { %v930_v62 = vpop.permute.xlu2 %929 }
 0xcdd   :  { %v3341_v63 = vadd.f32 %v930_v62, %v922_v49 }
 0xcdf   :  { %v2756_v1 = vpop.eup %2755  ;;  %2757 = vtanh.f32 %v3341_v63 }
 0xce0   :  { %852 = vrot.lane.b32.xlu0 %v2756_v1, %s3013_s13 }
 0xce5   :  { %v2758_v53 = vpop.eup %2757 }
 0xce6   :  { %935 = vrot.lane.b32.xlu1 %v2758_v53, %s3013_s13 }
 0xd52   :  { %v853_v0 = vpop.permute.xlu0 %852 }
 0xd53   :  { %v855_v4 = vmul.f32 %v853_v0, %v833_v31 }
 0xd55   :  { %v940_v9 = vrot.slane %v855_v4, 2 }
 0xd57   :  { %941 = vrot.lane.b32.xlu2 %v940_v9, %s3014_s14 }
 0xd58   :  { %v936_v57 = vpop.permute.xlu1 %935 }
 0xd59   :  { %v938_v11 = vmul.f32 %v936_v57, %v919_v32 }
 0xd5b   :  { %1010 = vrot.lane.b32.xlu0 %v938_v11, %s3014_s14 }
 0xdb1   :  { %v942_v7 = vpop.permute.xlu2 %941 }
 0xdb2   :  { %2603 = vmatmul.msk.f32.vlgmr.msra.gmra.mxu0 %vm119_vm4, %v942_v7  ;;  %2606 = vmatmul.msk.f32.vlgmr.msra.gmra.mxu2 %vm119_vm4, %v942_v7 }
 0xdb3   :  { %1349 = vmatpush.msra.mxu0 %v3350_v13  ;;  %1481 = vmatpush.msra.mxu2 %v3353_v14 }
 0xdb5   :  { %1350 = vmatpush.msra.mxu0 %v3139_v38  ;;  %1482 = vmatpush.msra.mxu2 %v3357_v15  ;;  %v3370_v38 = vld [vmem:[%s3744_s3 + $0x18] sm:$0xff] }
 0xdb7   :  { %1351 = vmatpush.msra.mxu0 %v3143_v40  ;;  %1483 = vmatpush.msra.mxu2 %v3361_v60  ;;  %v3376_v40 = vld [vmem:[%s3744_s3 + $0x10] sm:$0xff] }
 0xdb9   :  { %1352 = vmatpush.msra.mxu0 %v3151_v42  ;;  %1484 = vmatpush.msra.mxu2 %v3149_v41  ;;  %v3382_v41 = vld [vmem:[%s3744_s3 + $0x8] sm:$0xff]  ;;  %v3388_v42 = vld [vmem:[%s3744_s3] sm:$0xff] }
 0xdcd   :  { %v1011_v2 = vpop.permute.xlu0 %1010 }
 0xdce   :  { %2605 = vmatmul.msk.f32.vlgmr.msra.gmra.mxu1 %vm119_vm4, %v1011_v2 }
 0xdcf   :  { %1412 = vmatpush.msra.mxu1 %v3370_v38 }
 0xdd1   :  { %1413 = vmatpush.msra.mxu1 %v3376_v40 }
 0xdd3   :  { %1414 = vmatpush.msra.mxu1 %v3382_v41 }
 0xdd5   :  { %1415 = vmatpush.msra.mxu1 %v3388_v42 }
 0xe2f   :  { %v962_v3 = vpop.f32.mrf.mxu0 }
 0xe30   :  { %v966_v35 = vrot.slane %v962_v3, 4  ;;  %v3414_v3 = vld [vmem:[#allocation3 + $0x10] sm:$0xff] }
 0xe32   :  { %v968_v5 = vadd.f32 %v966_v35, %v3296_v17  ;;  %v3419_v35 = vld [vmem:[#allocation3 + $0x8] sm:$0xff] }
 0xe34   :  { %2759 = vtanh.f32 %v968_v5  ;;  %v2604_v19 = vmul.f32 -1.442695, %v968_v5  ;;  %v3424_v5 = vld [vmem:[#allocation3] sm:$0xff] }
 0xe35   :  { %v1051_v16 = vpop.f32.mrf.mxu2 }
 0xe3a   :  { %v2760_v36 = vpop.eup %2759 }
 0xe3b   :  { %994 = vrot.lane.b32.xlu1 %v2760_v36, %s3013_s13  ;;  %v3428_v36 = vld [vmem:[#allocation5] sm:$0xff] }
 0xe4b   :  { %v1031_v37 = vpop.f32.mrf.mxu1 }
 0xe4c   :  { %v1052_v18 = vadd.f32 %v1051_v16, %v1031_v37 }
 0xe4e   :  { %v1054_v6 = vadd.f32 %v3191_v50, %v1052_v18 }
 0xe50   :  { %2761 = vtanh.f32 %v1054_v6  ;;  %v2607_v20 = vmul.f32 -1.442695, %v1054_v6  ;;  %v3435_v6 = vld [vmem:[%s3747_s6] ss:$0 sm:$0xff] }
 0xe51   :  { %2763 = vpow2.f32 %v2604_v19 }
 0xe52   :  { %2765 = vpow2.f32 %v2607_v20 }
 0xe56   :  { %v2762_v39 = vpop.eup %2761 }
 0xe57   :  { %1077 = vrot.lane.b32.xlu2 %v2762_v39, %s3013_s13  ;;  %v2764_v12 = vpop.eup %2763 }
 0xe58   :  { %v972_v8 = vadd.f32 1.0, %v2764_v12  ;;  %v2766_v21 = vpop.eup %2765 }
 0xe59   :  { %v1058_v22 = vadd.f32 1.0, %v2766_v21 }
 0xe5a   :  { %2767 = vrcp.f32 %v972_v8  ;;  %v984_v30 = vand.u32 2147483648, %v972_v8  ;;  %vm978_vm0 = vweird.f32 %v972_v8  ;;  %v982_v31 = vand.u32 2147483647, %v972_v8 }
 0xe5b   :  { %2769 = vrcp.f32 %v1058_v22  ;;  %v1070_v46 = vand.u32 2147483648, %v1058_v22  ;;  %vm1064_vm5 = vweird.f32 %v1058_v22  ;;  %v1068_v47 = vand.u32 2147483647, %v1058_v22 }
 0xe5c   :  { %v985_v45 = vor.u32 1.1754944e-38, %v984_v30  ;;  %vm983_vm3 = vcmp.eq.f32.partialorder %v982_v31, 8.507059e+37 }
 0xe5d   :  { %v1071_v54 = vor.u32 1.1754944e-38, %v1070_v46  ;;  %vm1069_vm7 = vcmp.eq.f32.partialorder %v1068_v47, 8.507059e+37 }
 0xe60   :  { %v2768_v23 = vpop.eup %2767 }
 0xe61   :  { %v974_v24 = vmul.f32 %v2768_v23, %v972_v8  ;;  %v2770_v10 = vpop.eup %2769  ;;  %vm979_vm15 = vweird.f32 %v2768_v23 }
 0xe62   :  { %v1060_v26 = vmul.f32 %v2770_v10, %v1058_v22  ;;  %vm980_vm1 = vmor %vm978_vm0, %vm979_vm15  ;;  %vm1065_vm2 = vweird.f32 %v2770_v10 }
 0xe63   :  { %v975_v25 = vsub.f32 1.0, %v974_v24  ;;  %vm1066_vm6 = vmor %vm1064_vm5, %vm1065_vm2 }
 0xe64   :  { %v1061_v27 = vsub.f32 1.0, %v1060_v26 }
 0xe65   :  { %v976_v50 = vmul.f32 %v2768_v23, %v975_v25 }
 0xe66   :  { %v1062_v29 = vmul.f32 %v2770_v10, %v1061_v27 }
 0xe67   :  { %v977_v28 = vadd.f32 %v2768_v23, %v976_v50 }
 0xe68   :  { %v1063_v43 = vadd.f32 %v2770_v10, %v1062_v29 }
 0xe69   :  { %v981_v34 = vsel %vm980_vm1, %v2768_v23, %v977_v28 }
 0xe6a   :  { %v986_v33 = vsel %vm983_vm3, %v985_v45, %v981_v34  ;;  %v1067_v52 = vsel %vm1066_vm6, %v2770_v10, %v1063_v43 }
 0xe6b   :  { %v1072_v32 = vsel %vm1069_vm7, %v1071_v54, %v1067_v52  ;;  %v992_v59 = vmul.f32 %v990_v58, %v986_v33 }
 0xe6c   :  { %v1075_v62 = vmul.f32 %v1072_v32, %v3341_v63 }
 0xead   :  { %v995_v48 = vpop.permute.xlu1 %994 }
 0xeae   :  { %v997_v51 = vmul.f32 %v995_v48, %v986_v33 }
 0xeb0   :  { %999 = vrot.lane.b32.xlu0 %v997_v51, %s3013_s13 }
 0xeb1   :  { %v1078_v55 = vpop.permute.xlu2 %1077 }
 0xeb2   :  { %v1080_v56 = vmul.f32 %v1078_v55, %v1072_v32 }
 0xeb4   :  { %1082 = vrot.lane.b32.xlu1 %v1080_v56, %s3013_s13 }
 0xf22   :  { %v1000_v44 = vpop.permute.xlu0 %999 }
 0xf23   :  { %v3398_v49 = vadd.f32 %v1000_v44, %v992_v59 }
 0xf25   :  { %2771 = vtanh.f32 %v3398_v49 }
 0xf26   :  { %v1083_v1 = vpop.permute.xlu1 %1082 }
 0xf27   :  { %v3402_v53 = vadd.f32 %v1083_v1, %v1075_v62  ;;  %v1143_v1 = vrot.slane %v3398_v49, 6  ;;  %v81_v49 = vld [vmem:[%s3741_s0 + $0x10] sm:$0xff] }
 0xf29   :  { %2773 = vtanh.f32 %v3402_v53 }
 0xf2b   :  { %v2772_v0 = vpop.eup %2771 }
 0xf2c   :  { %1005 = vrot.lane.b32.xlu2 %v2772_v0, %s3013_s13 }
 0xf2f   :  { %v2774_v4 = vpop.eup %2773 }
 0xf30   :  { %1088 = vrot.lane.b32.xlu0 %v2774_v4, %s3013_s13 }
 0xf86   :  { %v1006_v61 = vpop.permute.xlu2 %1005 }
 0xf87   :  { %v1008_v9 = vmul.f32 %v1006_v61, %v986_v33 }
 0xf89   :  { %v1093_v57 = vrot.slane %v1008_v9, 4 }
 0xf8b   :  { %1094 = vrot.lane.b32.xlu1 %v1093_v57, %s3014_s14 }
 0xfa2   :  { %v1089_v11 = vpop.permute.xlu0 %1088 }
 0xfa3   :  { %v1091_v7 = vmul.f32 %v1089_v11, %v1072_v32 }
 0xfa5   :  { %1163 = vrot.lane.b32.xlu2 %v1091_v7, %s3014_s14 }
 0xffd   :  { %v1095_v63 = vpop.permute.xlu1 %1094 }
 0xffe   :  { %2608 = vmatmul.msk.f32.vlgmr.msra.gmra.mxu3 %vm119_vm4, %v1095_v63  ;;  %2611 = vmatmul.msk.f32.vlgmr.msrb.gmra.mxu1 %vm119_vm4, %v1095_v63 }
 0xfff   :  { %v1164_v2 = vpop.permute.xlu2 %1163  ;;  %1501 = vmatpush.msra.mxu3 %v3350_v13  ;;  %1634 = vmatpush.msrb.mxu1 %v3353_v14 }
0x1000   :  { %2610 = vmatmul.msk.f32.vlgmr.msrb.gmra.mxu0 %vm119_vm4, %v1164_v2 }
0x1001   :  { %1502 = vmatpush.msra.mxu3 %v3414_v3  ;;  %1565 = vmatpush.msrb.mxu0 %v3370_v38 }
0x1002   :  { %1635 = vmatpush.msrb.mxu1 %v3357_v15 }
0x1003   :  { %1503 = vmatpush.msra.mxu3 %v3419_v35  ;;  %1566 = vmatpush.msrb.mxu0 %v3376_v40 }
0x1004   :  { %1636 = vmatpush.msrb.mxu1 %v3361_v60 }
0x1005   :  { %1504 = vmatpush.msra.mxu3 %v3424_v5  ;;  %1567 = vmatpush.msrb.mxu0 %v3382_v41 }
0x1006   :  { %1637 = vmatpush.msrb.mxu1 %v3428_v36 }
0x1007   :  { %1568 = vmatpush.msrb.mxu0 %v3388_v42 }
0x107b   :  { %v1204_v16 = vpop.f32.mrf.mxu1 }
0x107d   :  { %v1184_v37 = vpop.f32.mrf.mxu0 }
0x107e   :  { %v1205_v18 = vadd.f32 %v1204_v16, %v1184_v37 }
0x1080   :  { %v1207_v39 = vadd.f32 %v3435_v6, %v1205_v18 }
0x1081   :  { %v1115_v19 = vpop.f32.mrf.mxu3 }
0x1082   :  { %2775 = vtanh.f32 %v1207_v39  ;;  %v1119_v20 = vrot.slane %v1115_v19, 2  ;;  %v2612_v22 = vmul.f32 -1.442695, %v1207_v39 }
0x1084   :  { %v1121_v12 = vadd.f32 %v1119_v20, %v3296_v17 }
0x1086   :  { %2777 = vtanh.f32 %v1121_v12  ;;  %v2609_v23 = vmul.f32 -1.442695, %v1121_v12 }
0x1087   :  { %2779 = vpow2.f32 %v2612_v22 }
0x1088   :  { %v2776_v8 = vpop.eup %2775  ;;  %2781 = vpow2.f32 %v2609_v23 }
0x1089   :  { %1230 = vrot.lane.b32.xlu1 %v2776_v8, %s3013_s13 }
0x108c   :  { %v2778_v21 = vpop.eup %2777 }
0x108d   :  { %1147 = vrot.lane.b32.xlu0 %v2778_v21, %s3013_s13  ;;  %v2780_v24 = vpop.eup %2779  ;;  %v3476_v21 = vld [vmem:[%s3742_s1] ss:$0 sm:$0xff] }
0x108e   :  { %v1211_v10 = vadd.f32 1.0, %v2780_v24  ;;  %v2782_v25 = vpop.eup %2781 }
0x108f   :  { %v1125_v26 = vadd.f32 1.0, %v2782_v25 }
0x1090   :  { %2783 = vrcp.f32 %v1211_v10  ;;  %v1223_v45 = vand.u32 2147483648, %v1211_v10  ;;  %vm1217_vm9 = vweird.f32 %v1211_v10  ;;  %v1221_v46 = vand.u32 2147483647, %v1211_v10 }
0x1091   :  { %2785 = vrcp.f32 %v1125_v26  ;;  %v1137_v51 = vand.u32 2147483648, %v1125_v26  ;;  %vm1131_vm13 = vweird.f32 %v1125_v26  ;;  %v1135_v52 = vand.u32 2147483647, %v1125_v26 }
0x1092   :  { %v1224_v48 = vor.u32 1.1754944e-38, %v1223_v45  ;;  %vm1222_vm12 = vcmp.eq.f32.partialorder %v1221_v46, 8.507059e+37 }
0x1093   :  { %v1138_v58 = vor.u32 1.1754944e-38, %v1137_v51  ;;  %vm1136_vm15 = vcmp.eq.f32.partialorder %v1135_v52, 8.507059e+37 }
0x1096   :  { %v2784_v50 = vpop.eup %2783 }
0x1097   :  { %v1213_v27 = vmul.f32 %v2784_v50, %v1211_v10  ;;  %v2786_v17 = vpop.eup %2785  ;;  %vm1218_vm8 = vweird.f32 %v2784_v50  ;;  %v3483_v10 = vld [vmem:[%s3743_s2] ss:$0 sm:$0xff] }
0x1098   :  { %v1127_v29 = vmul.f32 %v2786_v17, %v1125_v26  ;;  %vm1219_vm10 = vmor %vm1217_vm9, %vm1218_vm8  ;;  %vm1132_vm11 = vweird.f32 %v2786_v17 }
0x1099   :  { %v1214_v28 = vsub.f32 1.0, %v1213_v27  ;;  %vm1133_vm14 = vmor %vm1131_vm13, %vm1132_vm11 }
0x109a   :  { %v1128_v31 = vsub.f32 1.0, %v1127_v29 }
0x109b   :  { %v1215_v30 = vmul.f32 %v2784_v50, %v1214_v28 }
0x109c   :  { %v1129_v43 = vmul.f32 %v2786_v17, %v1128_v31 }
0x109d   :  { %v1216_v34 = vadd.f32 %v2784_v50, %v1215_v30 }
0x109e   :  { %v1130_v33 = vadd.f32 %v2786_v17, %v1129_v43 }
0x109f   :  { %v1220_v47 = vsel %vm1219_vm10, %v2784_v50, %v1216_v34 }
0x10a0   :  { %v1225_v55 = vsel %vm1222_vm12, %v1224_v48, %v1220_v47  ;;  %v1134_v56 = vsel %vm1133_vm14, %v2786_v17, %v1130_v33 }
0x10a1   :  { %v1139_v44 = vsel %vm1136_vm15, %v1138_v58, %v1134_v56  ;;  %v1228_v57 = vmul.f32 %v1225_v55, %v3402_v53 }
0x10a2   :  { %v1145_v0 = vmul.f32 %v1143_v1, %v1139_v44 }
0x10fb   :  { %v1231_v54 = vpop.permute.xlu1 %1230 }
0x10fc   :  { %v1233_v32 = vmul.f32 %v1231_v54, %v1225_v55 }
0x10fe   :  { %1235 = vrot.lane.b32.xlu0 %v1233_v32, %s3013_s13 }
0x10ff   :  { %v1148_v59 = vpop.permute.xlu0 %1147 }
0x1100   :  { %v1150_v62 = vmul.f32 %v1148_v59, %v1139_v44 }
0x1102   :  { %1152 = vrot.lane.b32.xlu2 %v1150_v62, %s3013_s13 }
0x115c   :  { %v1153_v4 = vpop.permute.xlu2 %1152 }
0x115d   :  { %v3444_v61 = vadd.f32 %v1153_v4, %v1145_v0 }
0x115f   :  { %2787 = vtanh.f32 %v3444_v61 }
0x1165   :  { %v2788_v9 = vpop.eup %2787 }
0x1166   :  { %1158 = vrot.lane.b32.xlu1 %v2788_v9, %s3013_s13 }
0x1170   :  { %v1236_v11 = vpop.permute.xlu0 %1235 }
0x1171   :  { %v3449_v7 = vadd.f32 %v1236_v11, %v1228_v57 }
0x1173   :  { %2789 = vtanh.f32 %v3449_v7 }
0x1179   :  { %v2790_v63 = vpop.eup %2789 }
0x117a   :  { %1241 = vrot.lane.b32.xlu2 %v2790_v63, %s3013_s13 }
0x1182   :  { %96 = vperm.xlu2 %2665, %v81_v49  }
0x11d4   :  { %v1242_v2 = vpop.permute.xlu2 %1241 }
0x11d5   :  { %v1244_v16 = vmul.f32 %v1242_v2, %v1225_v55 }
0x11d7   :  { %1313 = vrot.lane.b32.xlu1 %v1244_v16, %s3014_s14  ;;  %v1293_v16 = vrot.slane %v3444_v61, 6 }
0x11d8   :  { %v1159_v37 = vpop.permute.xlu1 %1158 }
0x11d9   :  { %v1161_v18 = vmul.f32 %v1159_v37, %v1139_v44 }
0x11db   :  { %v1246_v53 = vrot.slane %v1161_v18, 6 }
0x11dc   :  { %v97_v20 = vpop.permute.xlu2 %96 }
0x11dd   :  { %1247 = vrot.lane.b32.xlu0 %v1246_v53, %s3014_s14  ;;  %v109_v22 = vmul.f32 %v3476_v21, %v97_v20 }
0x11df   :  { %v3486_v25 = vadd.f32 %v3483_v10, %v109_v22 }
0x1249   :  { %v1314_v39 = vpop.permute.xlu1 %1313 }
0x124a   :  { %2615 = vmatmul.msk.f32.vlgmr.msrb.gmra.mxu3 %vm119_vm4, %v1314_v39 }
0x124b   :  { %1718 = vmatpush.msrb.mxu3 %v3370_v38 }
0x124d   :  { %1719 = vmatpush.msrb.mxu3 %v3376_v40 }
0x124f   :  { %v1248_v19 = vpop.permute.xlu0 %1247  ;;  %1720 = vmatpush.msrb.mxu3 %v3382_v41 }
0x1250   :  { %2613 = vmatmul.msk.f32.vlgmr.msrb.gmra.mxu2 %vm119_vm4, %v1248_v19  ;;  %2616 = vmatmul.msk.f32.vlgmr.msra.gmra.mxu0 %vm119_vm4, %v1248_v19 }
0x1251   :  { %1654 = vmatpush.msrb.mxu2 %v3350_v13  ;;  %1787 = vmatpush.msra.mxu0 %v3353_v14 }
0x1252   :  { %1721 = vmatpush.msrb.mxu3 %v3388_v42 }
0x1253   :  { %1655 = vmatpush.msrb.mxu2 %v3414_v3  ;;  %1788 = vmatpush.msra.mxu0 %v3357_v15 }
0x1255   :  { %1656 = vmatpush.msrb.mxu2 %v3419_v35  ;;  %1789 = vmatpush.msra.mxu0 %v3361_v60 }
0x1257   :  { %1657 = vmatpush.msrb.mxu2 %v3424_v5  ;;  %1790 = vmatpush.msra.mxu0 %v3428_v36 }
0x12cd   :  { %v1334_v12 = vpop.f32.mrf.mxu3  ;;  %v1354_v8 = vpop.f32.mrf.mxu0 }
0x12ce   :  { %v1355_v23 = vadd.f32 %v1354_v8, %v1334_v12 }
0x12d0   :  { %v1357_v24 = vadd.f32 %v3435_v6, %v1355_v23 }
0x12d2   :  { %2791 = vtanh.f32 %v1357_v24  ;;  %v2617_v28 = vmul.f32 -1.442695, %v1357_v24 }
0x12d3   :  { %v1268_v26 = vpop.f32.mrf.mxu2 }
0x12d4   :  { %v1271_v50 = vadd.f32 %v1268_v26, %v3486_v25 }
0x12d6   :  { %2793 = vtanh.f32 %v1271_v50  ;;  %v2614_v29 = vmul.f32 -1.442695, %v1271_v50 }
0x12d7   :  { %2795 = vpow2.f32 %v2617_v28 }
0x12d8   :  { %v2792_v27 = vpop.eup %2791  ;;  %2797 = vpow2.f32 %v2614_v29 }
0x12d9   :  { %1380 = vrot.lane.b32.xlu1 %v2792_v27, %s3013_s13 }
0x12dc   :  { %v2794_v17 = vpop.eup %2793 }
0x12dd   :  { %1297 = vrot.lane.b32.xlu0 %v2794_v17, %s3013_s13  ;;  %v2796_v30 = vpop.eup %2795 }
0x12de   :  { %v1361_v31 = vadd.f32 1.0, %v2796_v30  ;;  %v2798_v34 = vpop.eup %2797 }
0x12df   :  { %v1275_v43 = vadd.f32 1.0, %v2798_v34 }
0x12e0   :  { %2799 = vrcp.f32 %v1361_v31  ;;  %v1373_v32 = vand.u32 2147483648, %v1361_v31  ;;  %vm1367_vm1 = vweird.f32 %v1361_v31  ;;  %v1371_v56 = vand.u32 2147483647, %v1361_v31 }
0x12e1   :  { %2801 = vrcp.f32 %v1275_v43  ;;  %v1287_v62 = vand.u32 2147483648, %v1275_v43  ;;  %vm1281_vm6 = vweird.f32 %v1275_v43  ;;  %v1285_v1 = vand.u32 2147483647, %v1275_v43 }
0x12e2   :  { %v1374_v44 = vor.u32 1.1754944e-38, %v1373_v32  ;;  %vm1372_vm5 = vcmp.eq.f32.partialorder %v1371_v56, 8.507059e+37 }
0x12e3   :  { %v1288_v11 = vor.u32 1.1754944e-38, %v1287_v62  ;;  %vm1286_vm8 = vcmp.eq.f32.partialorder %v1285_v1, 8.507059e+37 }
0x12e6   :  { %v2800_v45 = vpop.eup %2799 }
0x12e7   :  { %v1363_v46 = vmul.f32 %v2800_v45, %v1361_v31  ;;  %v2802_v47 = vpop.eup %2801  ;;  %vm1368_vm0 = vweird.f32 %v2800_v45 }
0x12e8   :  { %v1277_v48 = vmul.f32 %v2802_v47, %v1275_v43  ;;  %vm1369_vm2 = vmor %vm1367_vm1, %vm1368_vm0  ;;  %vm1282_vm3 = vweird.f32 %v2802_v47 }
0x12e9   :  { %v1364_v33 = vsub.f32 1.0, %v1363_v46  ;;  %vm1283_vm7 = vmor %vm1281_vm6, %vm1282_vm3 }
0x12ea   :  { %v1278_v52 = vsub.f32 1.0, %v1277_v48 }
0x12eb   :  { %v1365_v51 = vmul.f32 %v2800_v45, %v1364_v33 }
0x12ec   :  { %v1279_v55 = vmul.f32 %v2802_v47, %v1278_v52 }
0x12ed   :  { %v1366_v54 = vadd.f32 %v2800_v45, %v1365_v51 }
0x12ee   :  { %v1280_v59 = vadd.f32 %v2802_v47, %v1279_v55 }
0x12ef   :  { %v1370_v58 = vsel %vm1369_vm2, %v2800_v45, %v1366_v54 }
0x12f0   :  { %v1375_v4 = vsel %vm1372_vm5, %v1374_v44, %v1370_v58  ;;  %v1284_v57 = vsel %vm1283_vm7, %v2802_v47, %v1280_v59 }
0x12f1   :  { %v1289_v49 = vsel %vm1286_vm8, %v1288_v11, %v1284_v57  ;;  %v1378_v19 = vmul.f32 %v1375_v4, %v3449_v7 }
0x12f2   :  { %v1295_v37 = vmul.f32 %v1293_v16, %v1289_v49 }
0x134b   :  { %v1381_v0 = vpop.permute.xlu1 %1380 }
0x134c   :  { %v1383_v9 = vmul.f32 %v1381_v0, %v1375_v4 }
0x134e   :  { %1385 = vrot.lane.b32.xlu0 %v1383_v9, %s3013_s13 }
0x134f   :  { %v1298_v63 = vpop.permute.xlu0 %1297 }
0x1350   :  { %v1300_v2 = vmul.f32 %v1298_v63, %v1289_v49 }
0x1352   :  { %1302 = vrot.lane.b32.xlu2 %v1300_v2, %s3013_s13 }
0x13ac   :  { %v1303_v18 = vpop.permute.xlu2 %1302 }
0x13ad   :  { %v3494_v53 = vadd.f32 %v1303_v18, %v1295_v37 }
0x13af   :  { %2803 = vtanh.f32 %v3494_v53 }
0x13b5   :  { %v2804_v39 = vpop.eup %2803 }
0x13b6   :  { %1308 = vrot.lane.b32.xlu1 %v2804_v39, %s3013_s13 }
0x13c0   :  { %v1386_v20 = vpop.permute.xlu0 %1385 }
0x13c1   :  { %v3499_v12 = vadd.f32 %v1386_v20, %v1378_v19 }
0x13c3   :  { %2805 = vtanh.f32 %v3499_v12 }
0x13c9   :  { %v2806_v8 = vpop.eup %2805 }
0x13ca   :  { %1391 = vrot.lane.b32.xlu2 %v2806_v8, %s3013_s13  ;;  %v1445_v8 = vrot.slane %v3494_v53, 6 }
0x1424   :  { %v1392_v61 = vpop.permute.xlu2 %1391 }
0x1425   :  { %v1394_v22 = vmul.f32 %v1392_v61, %v1375_v4 }
0x1427   :  { %1465 = vrot.lane.b32.xlu1 %v1394_v22, %s3014_s14 }
0x1428   :  { %v1309_v23 = vpop.permute.xlu1 %1308 }
0x1429   :  { %v1311_v24 = vmul.f32 %v1309_v23, %v1289_v49 }
0x142b   :  { %1396 = vrot.lane.b32.xlu0 %v1311_v24, %s3014_s14 }
0x1499   :  { %v1466_v26 = vpop.permute.xlu1 %1465 }
0x149a   :  { %2620 = vmatmul.msk.f32.vlgmr.msra.gmra.mxu2 %vm119_vm4, %v1466_v26 }
0x149b   :  { %1871 = vmatpush.msra.mxu2 %v3370_v38 }
0x149d   :  { %v1397_v7 = vpop.permute.xlu0 %1396  ;;  %1872 = vmatpush.msra.mxu2 %v3376_v40 }
0x149e   :  { %2618 = vmatmul.msk.f32.vlgmr.msra.gmra.mxu1 %vm119_vm4, %v1397_v7  ;;  %2621 = vmatmul.msk.f32.vlgmr.msra.gmra.mxu3 %vm119_vm4, %v1397_v7 }
0x149f   :  { %1807 = vmatpush.msra.mxu1 %v3350_v13  ;;  %1937 = vmatpush.msra.mxu3 %v3353_v14 }
0x14a0   :  { %1873 = vmatpush.msra.mxu2 %v3382_v41 }
0x14a1   :  { %1808 = vmatpush.msra.mxu1 %v3414_v3  ;;  %1938 = vmatpush.msra.mxu3 %v3357_v15 }
0x14a2   :  { %1874 = vmatpush.msra.mxu2 %v3388_v42 }
0x14a3   :  { %1809 = vmatpush.msra.mxu1 %v3419_v35  ;;  %1939 = vmatpush.msra.mxu3 %v3361_v60 }
0x14a5   :  { %1810 = vmatpush.msra.mxu1 %v3424_v5  ;;  %1940 = vmatpush.msra.mxu3 %v3428_v36 }
0x151b   :  { %v1417_v50 = vpop.f32.mrf.mxu1 }
0x151c   :  { %v1421_v27 = vrot.slane %v1417_v50, 6 }
0x151d   :  { %v1486_v28 = vpop.f32.mrf.mxu2 }
0x151e   :  { %v1423_v17 = vadd.f32 %v1421_v27, %v3486_v25 }
0x1520   :  { %2807 = vtanh.f32 %v1423_v17  ;;  %v2619_v45 = vmul.f32 -1.442695, %v1423_v17 }
0x1521   :  { %v1506_v29 = vpop.f32.mrf.mxu3 }
0x1522   :  { %v1507_v30 = vadd.f32 %v1506_v29, %v1486_v28 }
0x1524   :  { %v1509_v31 = vadd.f32 %v3435_v6, %v1507_v30 }
0x1526   :  { %v2808_v34 = vpop.eup %2807  ;;  %2809 = vtanh.f32 %v1509_v31  ;;  %v2622_v51 = vmul.f32 -1.442695, %v1509_v31 }
0x1527   :  { %1449 = vrot.lane.b32.xlu2 %v2808_v34, %s3013_s13  ;;  %2811 = vpow2.f32 %v2619_v45 }
0x152c   :  { %v2810_v43 = vpop.eup %2809 }
0x152d   :  { %1532 = vrot.lane.b32.xlu0 %v2810_v43, %s3013_s13  ;;  %v2812_v46 = vpop.eup %2811 }
0x152e   :  { %v1427_v47 = vadd.f32 1.0, %v2812_v46 }
0x1530   :  { %2813 = vrcp.f32 %v1427_v47  ;;  %v1439_v32 = vand.u32 2147483648, %v1427_v47  ;;  %vm1433_vm10 = vweird.f32 %v1427_v47  ;;  %v1437_v58 = vand.u32 2147483647, %v1427_v47 }
0x1531   :  { %2815 = vpow2.f32 %v2622_v51 }
0x1532   :  { %v1440_v62 = vor.u32 1.1754944e-38, %v1439_v32  ;;  %vm1438_vm12 = vcmp.eq.f32.partialorder %v1437_v58, 8.507059e+37 }
0x1536   :  { %v2814_v33 = vpop.eup %2813 }
0x1537   :  { %v1429_v48 = vmul.f32 %v2814_v33, %v1427_v47  ;;  %vm1434_vm9 = vweird.f32 %v2814_v33  ;;  %v2816_v56 = vpop.eup %2815 }
0x1538   :  { %vm1435_vm11 = vmor %vm1433_vm10, %vm1434_vm9  ;;  %v1513_v44 = vadd.f32 1.0, %v2816_v56 }
0x1539   :  { %v1430_v52 = vsub.f32 1.0, %v1429_v48 }
0x153a   :  { %2817 = vrcp.f32 %v1513_v44  ;;  %v1525_v2 = vand.u32 2147483648, %v1513_v44  ;;  %vm1519_vm14 = vweird.f32 %v1513_v44  ;;  %v1523_v16 = vand.u32 2147483647, %v1513_v44 }
0x153b   :  { %v1431_v54 = vmul.f32 %v2814_v33, %v1430_v52 }
0x153c   :  { %v1526_v18 = vor.u32 1.1754944e-38, %v1525_v2  ;;  %vm1524_vm0 = vcmp.eq.f32.partialorder %v1523_v16, 8.507059e+37 }
0x153d   :  { %v1432_v55 = vadd.f32 %v2814_v33, %v1431_v54 }
0x153f   :  { %v1436_v59 = vsel %vm1435_vm11, %v2814_v33, %v1432_v55 }
0x1540   :  { %v1441_v1 = vsel %vm1438_vm12, %v1440_v62, %v1436_v59  ;;  %v2818_v9 = vpop.eup %2817 }
0x1541   :  { %v1515_v57 = vmul.f32 %v2818_v9, %v1513_v44  ;;  %vm1520_vm13 = vweird.f32 %v2818_v9  ;;  %v1447_v61 = vmul.f32 %v1445_v8, %v1441_v1 }
0x1542   :  { %vm1521_vm15 = vmor %vm1519_vm14, %vm1520_vm13 }
0x1543   :  { %v1516_v11 = vsub.f32 1.0, %v1515_v57 }
0x1545   :  { %v1517_v63 = vmul.f32 %v2818_v9, %v1516_v11 }
0x1547   :  { %v1518_v49 = vadd.f32 %v2818_v9, %v1517_v63 }
0x1549   :  { %v1522_v37 = vsel %vm1521_vm15, %v2818_v9, %v1518_v49 }
0x154a   :  { %v1527_v19 = vsel %vm1524_vm0, %v1526_v18, %v1522_v37 }
0x154b   :  { %v1530_v24 = vmul.f32 %v1527_v19, %v3499_v12 }
0x1581   :  { %v1450_v0 = vpop.permute.xlu2 %1449 }
0x1582   :  { %v1452_v4 = vmul.f32 %v1450_v0, %v1441_v1 }
0x1584   :  { %1454 = vrot.lane.b32.xlu1 %v1452_v4, %s3013_s13 }
0x159f   :  { %v1533_v39 = vpop.permute.xlu0 %1532 }
0x15a0   :  { %v1535_v20 = vmul.f32 %v1533_v39, %v1527_v19 }
0x15a2   :  { %1537 = vrot.lane.b32.xlu2 %v1535_v20, %s3013_s13 }
0x15f6   :  { %v1455_v22 = vpop.permute.xlu1 %1454 }
0x15f7   :  { %v3527_v23 = vadd.f32 %v1455_v22, %v1447_v61 }
0x15f9   :  { %2819 = vtanh.f32 %v3527_v23 }
0x15fc   :  { %v1538_v26 = vpop.permute.xlu2 %1537 }
0x15fd   :  { %v3531_v7 = vadd.f32 %v1538_v26, %v1530_v24 }
0x15ff   :  { %v2820_v50 = vpop.eup %2819  ;;  %2821 = vtanh.f32 %v3531_v7 }
0x1600   :  { %1460 = vrot.lane.b32.xlu0 %v2820_v50, %s3013_s13 }
0x1605   :  { %v2822_v27 = vpop.eup %2821 }
0x1606   :  { %1543 = vrot.lane.b32.xlu1 %v2822_v27, %s3013_s13 }
0x1672   :  { %v1461_v53 = vpop.permute.xlu0 %1460 }
0x1673   :  { %v1463_v17 = vmul.f32 %v1461_v53, %v1441_v1  ;;  %v1598_v53 = vrot.slane %v3527_v23, 6 }
0x1675   :  { %v1548_v28 = vrot.slane %v1463_v17, 2 }
0x1677   :  { %1549 = vrot.lane.b32.xlu2 %v1548_v28, %s3014_s14 }
0x1678   :  { %v1544_v29 = vpop.permute.xlu1 %1543 }
0x1679   :  { %v1546_v30 = vmul.f32 %v1544_v29, %v1527_v19 }
0x167b   :  { %1618 = vrot.lane.b32.xlu0 %v1546_v30, %s3014_s14 }
0x16d1   :  { %v1550_v12 = vpop.permute.xlu2 %1549 }
0x16d2   :  { %2623 = vmatmul.msk.f32.vlgmr.msrb.gmra.mxu0 %vm119_vm4, %v1550_v12  ;;  %2626 = vmatmul.msk.f32.vlgmr.msrb.gmra.mxu2 %vm119_vm4, %v1550_v12 }
0x16d3   :  { %1957 = vmatpush.msrb.mxu0 %v3350_v13  ;;  %2089 = vmatpush.msrb.mxu2 %v3353_v14 }
0x16d5   :  { %1958 = vmatpush.msrb.mxu0 %v3414_v3  ;;  %2090 = vmatpush.msrb.mxu2 %v3357_v15 }
0x16d7   :  { %1959 = vmatpush.msrb.mxu0 %v3419_v35  ;;  %2091 = vmatpush.msrb.mxu2 %v3361_v60 }
0x16d9   :  { %1960 = vmatpush.msrb.mxu0 %v3424_v5  ;;  %2092 = vmatpush.msrb.mxu2 %v3428_v36 }
0x16ed   :  { %v1619_v31 = vpop.permute.xlu0 %1618 }
0x16ee   :  { %2625 = vmatmul.msk.f32.vlgmr.msrb.gmra.mxu1 %vm119_vm4, %v1619_v31 }
0x16ef   :  { %2020 = vmatpush.msrb.mxu1 %v3370_v38 }
0x16f1   :  { %2021 = vmatpush.msrb.mxu1 %v3376_v40 }
0x16f3   :  { %2022 = vmatpush.msrb.mxu1 %v3382_v41 }
0x16f5   :  { %2023 = vmatpush.msrb.mxu1 %v3388_v42 }
0x174f   :  { %v1570_v34 = vpop.f32.mrf.mxu0 }
0x1750   :  { %v1574_v43 = vrot.slane %v1570_v34, 4 }
0x1752   :  { %v1576_v45 = vadd.f32 %v1574_v43, %v3486_v25 }
0x1754   :  { %2823 = vtanh.f32 %v1576_v45  ;;  %v2624_v54 = vmul.f32 -1.442695, %v1576_v45 }
0x1755   :  { %v1659_v47 = vpop.f32.mrf.mxu2 }
0x175a   :  { %v2824_v46 = vpop.eup %2823 }
0x175b   :  { %1602 = vrot.lane.b32.xlu1 %v2824_v46, %s3013_s13 }
0x176b   :  { %v1639_v33 = vpop.f32.mrf.mxu1 }
0x176c   :  { %v1660_v48 = vadd.f32 %v1659_v47, %v1639_v33 }
0x176e   :  { %v1662_v51 = vadd.f32 %v3435_v6, %v1660_v48 }
0x1770   :  { %2825 = vtanh.f32 %v1662_v51  ;;  %v2627_v55 = vmul.f32 -1.442695, %v1662_v51 }
0x1771   :  { %2827 = vpow2.f32 %v2624_v54 }
0x1772   :  { %2829 = vpow2.f32 %v2627_v55 }
0x1776   :  { %v2826_v52 = vpop.eup %2825 }
0x1777   :  { %1685 = vrot.lane.b32.xlu2 %v2826_v52, %s3013_s13  ;;  %v2828_v32 = vpop.eup %2827 }
0x1778   :  { %v1580_v56 = vadd.f32 1.0, %v2828_v32  ;;  %v2830_v58 = vpop.eup %2829 }
0x1779   :  { %v1666_v59 = vadd.f32 1.0, %v2830_v58 }
0x177a   :  { %2831 = vrcp.f32 %v1580_v56  ;;  %v1592_v49 = vand.u32 2147483648, %v1580_v56  ;;  %vm1586_vm2 = vweird.f32 %v1580_v56  ;;  %v1590_v2 = vand.u32 2147483647, %v1580_v56 }
0x177b   :  { %2833 = vrcp.f32 %v1666_v59  ;;  %v1678_v39 = vand.u32 2147483648, %v1666_v59  ;;  %vm1672_vm7 = vweird.f32 %v1666_v59  ;;  %v1676_v19 = vand.u32 2147483647, %v1666_v59 }
0x177c   :  { %v1593_v18 = vor.u32 1.1754944e-38, %v1592_v49  ;;  %vm1591_vm6 = vcmp.eq.f32.partialorder %v1590_v2, 8.507059e+37 }
0x177d   :  { %v1679_v24 = vor.u32 1.1754944e-38, %v1678_v39  ;;  %vm1677_vm9 = vcmp.eq.f32.partialorder %v1676_v19, 8.507059e+37 }
0x1780   :  { %v2832_v44 = vpop.eup %2831 }
0x1781   :  { %v1582_v62 = vmul.f32 %v2832_v44, %v1580_v56  ;;  %v2834_v1 = vpop.eup %2833  ;;  %vm1587_vm1 = vweird.f32 %v2832_v44 }
0x1782   :  { %v1668_v4 = vmul.f32 %v2834_v1, %v1666_v59  ;;  %vm1588_vm3 = vmor %vm1586_vm2, %vm1587_vm1  ;;  %vm1673_vm5 = vweird.f32 %v2834_v1 }
0x1783   :  { %v1583_v0 = vsub.f32 1.0, %v1582_v62  ;;  %vm1674_vm8 = vmor %vm1672_vm7, %vm1673_vm5 }
0x1784   :  { %v1669_v57 = vsub.f32 1.0, %v1668_v4 }
0x1785   :  { %v1584_v9 = vmul.f32 %v2832_v44, %v1583_v0 }
0x1786   :  { %v1670_v63 = vmul.f32 %v2834_v1, %v1669_v57 }
0x1787   :  { %v1585_v11 = vadd.f32 %v2832_v44, %v1584_v9 }
0x1788   :  { %v1671_v37 = vadd.f32 %v2834_v1, %v1670_v63 }
0x1789   :  { %v1589_v16 = vsel %vm1588_vm3, %v2832_v44, %v1585_v11 }
0x178a   :  { %v1594_v8 = vsel %vm1591_vm6, %v1593_v18, %v1589_v16  ;;  %v1675_v22 = vsel %vm1674_vm8, %v2834_v1, %v1671_v37 }
0x178b   :  { %v1680_v50 = vsel %vm1677_vm9, %v1679_v24, %v1675_v22  ;;  %v1600_v17 = vmul.f32 %v1598_v53, %v1594_v8 }
0x178c   :  { %v1683_v30 = vmul.f32 %v1680_v50, %v3531_v7 }
0x17cd   :  { %v1603_v20 = vpop.permute.xlu1 %1602 }
0x17ce   :  { %v1605_v61 = vmul.f32 %v1603_v20, %v1594_v8 }
0x17d0   :  { %1607 = vrot.lane.b32.xlu0 %v1605_v61, %s3013_s13 }
0x17d1   :  { %v1686_v26 = vpop.permute.xlu2 %1685 }
0x17d2   :  { %v1688_v27 = vmul.f32 %v1686_v26, %v1680_v50 }
0x17d4   :  { %1690 = vrot.lane.b32.xlu1 %v1688_v27, %s3013_s13 }
0x1842   :  { %v1608_v28 = vpop.permute.xlu0 %1607 }
0x1843   :  { %v3560_v29 = vadd.f32 %v1608_v28, %v1600_v17 }
0x1845   :  { %2835 = vtanh.f32 %v3560_v29 }
0x1846   :  { %v1691_v12 = vpop.permute.xlu1 %1690 }
0x1847   :  { %v3564_v31 = vadd.f32 %v1691_v12, %v1683_v30 }
0x1849   :  { %2837 = vtanh.f32 %v3564_v31 }
0x184b   :  { %v2836_v34 = vpop.eup %2835 }
0x184c   :  { %1613 = vrot.lane.b32.xlu2 %v2836_v34, %s3013_s13 }
0x184f   :  { %v2838_v43 = vpop.eup %2837 }
0x1850   :  { %1696 = vrot.lane.b32.xlu0 %v2838_v43, %s3013_s13 }
0x18a6   :  { %v1614_v23 = vpop.permute.xlu2 %1613 }
0x18a7   :  { %v1616_v45 = vmul.f32 %v1614_v23, %v1594_v8 }
0x18a9   :  { %v1701_v46 = vrot.slane %v1616_v45, 4 }
0x18ab   :  { %1702 = vrot.lane.b32.xlu1 %v1701_v46, %s3014_s14 }
0x18c2   :  { %v1697_v47 = vpop.permute.xlu0 %1696 }
0x18c3   :  { %v1699_v33 = vmul.f32 %v1697_v47, %v1680_v50  ;;  %v1751_v50 = vrot.slane %v3560_v29, 6  ;;  %v82_v29 = vld [vmem:[%s3741_s0 + $0x18] sm:$0xff] }
0x18c5   :  { %1771 = vrot.lane.b32.xlu2 %v1699_v33, %s3014_s14 }
0x191d   :  { %v1703_v7 = vpop.permute.xlu1 %1702 }
0x191e   :  { %2628 = vmatmul.msk.f32.vlgmr.msrb.gmra.mxu3 %vm119_vm4, %v1703_v7  ;;  %2631 = vmatmul.msk.f32.vlgmr.msra.gmra.mxu1 %vm119_vm4, %v1703_v7  ;;  %v2942_v7 = vld [vmem:[%s3744_s3 + $0x18] sm:$0xff] }
0x191f   :  { %v1772_v48 = vpop.permute.xlu2 %1771  ;;  %2109 = vmatpush.msrb.mxu3 %v3350_v13  ;;  %2242 = vmatpush.msra.mxu1 %v3353_v14 }
0x1920   :  { %2630 = vmatmul.msk.f32.vlgmr.msra.gmra.mxu0 %vm119_vm4, %v1772_v48  ;;  %v2943_v48 = vld [vmem:[%s3744_s3 + $0x10] sm:$0xff] }
0x1921   :  { %2110 = vmatpush.msrb.mxu3 %v3414_v3  ;;  %2173 = vmatpush.msra.mxu0 %v3370_v38 }
0x1922   :  { %2243 = vmatpush.msra.mxu1 %v3357_v15 }
0x1923   :  { %2111 = vmatpush.msrb.mxu3 %v3419_v35  ;;  %2174 = vmatpush.msra.mxu0 %v3376_v40 }
0x1924   :  { %2244 = vmatpush.msra.mxu1 %v3361_v60 }
0x1925   :  { %2112 = vmatpush.msrb.mxu3 %v3424_v5  ;;  %2175 = vmatpush.msra.mxu0 %v3382_v41 }
0x1926   :  { %2245 = vmatpush.msra.mxu1 %v3428_v36 }
0x1927   :  { %2176 = vmatpush.msra.mxu0 %v3388_v42 }
0x199b   :  { %v1812_v13 = vpop.f32.mrf.mxu1 }
0x199d   :  { %v1792_v14 = vpop.f32.mrf.mxu0 }
0x199e   :  { %v1813_v51 = vadd.f32 %v1812_v13, %v1792_v14  ;;  %v2944_v14 = vld [vmem:[%s3744_s3 + $0x8] sm:$0xff] }
0x19a0   :  { %v1815_v38 = vadd.f32 %v3435_v6, %v1813_v51  ;;  %v3619_v51 = vld [vmem:[#allocation3 + $0x18] sm:$0xff] }
0x19a1   :  { %v1723_v15 = vpop.f32.mrf.mxu3 }
0x19a2   :  { %2839 = vtanh.f32 %v1815_v38  ;;  %v1727_v52 = vrot.slane %v1723_v15, 2  ;;  %v2632_v41 = vmul.f32 -1.442695, %v1815_v38  ;;  %v3622_v38 = vld [vmem:[#allocation5 + $0x18] sm:$0xff] }
0x19a3   :  { %v2947_v15 = vld [vmem:[%s3744_s3] sm:$0xff] }
0x19a4   :  { %v1729_v40 = vadd.f32 %v1727_v52, %v3486_v25  ;;  %v3629_v52 = vld [vmem:[#allocation5 + $0x10] sm:$0xff] }
0x19a6   :  { %2841 = vtanh.f32 %v1729_v40  ;;  %v2629_v42 = vmul.f32 -1.442695, %v1729_v40  ;;  %v3633_v40 = vld [vmem:[#allocation5 + $0x8] sm:$0xff] }
0x19a7   :  { %2843 = vpow2.f32 %v2632_v41 }
0x19a8   :  { %v2840_v60 = vpop.eup %2839  ;;  %2845 = vpow2.f32 %v2629_v42 }
0x19a9   :  { %1838 = vrot.lane.b32.xlu1 %v2840_v60, %s3013_s13 }
0x19ac   :  { %v2842_v54 = vpop.eup %2841 }
0x19ad   :  { %1755 = vrot.lane.b32.xlu0 %v2842_v54, %s3013_s13  ;;  %v2844_v55 = vpop.eup %2843 }
0x19ae   :  { %v1819_v32 = vadd.f32 1.0, %v2844_v55  ;;  %v2846_v56 = vpop.eup %2845 }
0x19af   :  { %v1733_v58 = vadd.f32 1.0, %v2846_v56 }
0x19b0   :  { %2847 = vrcp.f32 %v1819_v32  ;;  %v1831_v11 = vand.u32 2147483648, %v1819_v32  ;;  %vm1825_vm11 = vweird.f32 %v1819_v32  ;;  %v1829_v63 = vand.u32 2147483647, %v1819_v32 }
0x19b1   :  { %2849 = vrcp.f32 %v1733_v58  ;;  %v1745_v37 = vand.u32 2147483648, %v1733_v58  ;;  %vm1739_vm15 = vweird.f32 %v1733_v58  ;;  %v1743_v18 = vand.u32 2147483647, %v1733_v58 }
0x19b2   :  { %v1832_v16 = vor.u32 1.1754944e-38, %v1831_v11  ;;  %vm1830_vm14 = vcmp.eq.f32.partialorder %v1829_v63, 8.507059e+37 }
0x19b3   :  { %v1746_v61 = vor.u32 1.1754944e-38, %v1745_v37  ;;  %vm1744_vm1 = vcmp.eq.f32.partialorder %v1743_v18, 8.507059e+37 }
0x19b6   :  { %v2848_v59 = vpop.eup %2847 }
0x19b7   :  { %v1821_v44 = vmul.f32 %v2848_v59, %v1819_v32  ;;  %v2850_v25 = vpop.eup %2849  ;;  %vm1826_vm10 = vweird.f32 %v2848_v59 }
0x19b8   :  { %v1735_v1 = vmul.f32 %v2850_v25, %v1733_v58  ;;  %vm1827_vm12 = vmor %vm1825_vm11, %vm1826_vm10  ;;  %vm1740_vm13 = vweird.f32 %v2850_v25 }
0x19b9   :  { %v1822_v62 = vsub.f32 1.0, %v1821_v44  ;;  %vm1741_vm0 = vmor %vm1739_vm15, %vm1740_vm13 }
0x19ba   :  { %v1736_v4 = vsub.f32 1.0, %v1735_v1 }
0x19bb   :  { %v1823_v0 = vmul.f32 %v2848_v59, %v1822_v62 }
0x19bc   :  { %v1737_v57 = vmul.f32 %v2850_v25, %v1736_v4 }
0x19bd   :  { %v1824_v9 = vadd.f32 %v2848_v59, %v1823_v0 }
0x19be   :  { %v1738_v2 = vadd.f32 %v2850_v25, %v1737_v57 }
0x19bf   :  { %v1828_v49 = vsel %vm1827_vm12, %v2848_v59, %v1824_v9 }
0x19c0   :  { %v1833_v19 = vsel %vm1830_vm14, %v1832_v16, %v1828_v49  ;;  %v1742_v8 = vsel %vm1741_vm0, %v2850_v25, %v1738_v2 }
0x19c1   :  { %v1747_v24 = vsel %vm1744_vm1, %v1746_v61, %v1742_v8  ;;  %v1836_v30 = vmul.f32 %v1833_v19, %v3564_v31 }
0x19c2   :  { %v1753_v27 = vmul.f32 %v1751_v50, %v1747_v24 }
0x1a1b   :  { %v1839_v39 = vpop.permute.xlu1 %1838 }
0x1a1c   :  { %v1841_v20 = vmul.f32 %v1839_v39, %v1833_v19 }
0x1a1e   :  { %1843 = vrot.lane.b32.xlu0 %v1841_v20, %s3013_s13 }
0x1a1f   :  { %v1756_v22 = vpop.permute.xlu0 %1755 }
0x1a20   :  { %v1758_v26 = vmul.f32 %v1756_v22, %v1747_v24 }
0x1a22   :  { %1760 = vrot.lane.b32.xlu2 %v1758_v26, %s3013_s13 }
0x1a7c   :  { %v1761_v53 = vpop.permute.xlu2 %1760 }
0x1a7d   :  { %v3593_v17 = vadd.f32 %v1761_v53, %v1753_v27 }
0x1a7f   :  { %2851 = vtanh.f32 %v3593_v17  ;;  %v1901_v53 = vrot.slane %v3593_v17, 6 }
0x1a85   :  { %v2852_v28 = vpop.eup %2851 }
0x1a86   :  { %1766 = vrot.lane.b32.xlu1 %v2852_v28, %s3013_s13 }
0x1a90   :  { %v1844_v12 = vpop.permute.xlu0 %1843 }
0x1a91   :  { %v3598_v34 = vadd.f32 %v1844_v12, %v1836_v30 }
0x1a93   :  { %2853 = vtanh.f32 %v3598_v34 }
0x1a99   :  { %v2854_v43 = vpop.eup %2853 }
0x1a9a   :  { %1849 = vrot.lane.b32.xlu2 %v2854_v43, %s3013_s13 }
0x1aa2   :  { %101 = vperm.xlu2 %2665, %v82_v29  }
0x1af4   :  { %v1850_v23 = vpop.permute.xlu2 %1849 }
0x1af5   :  { %v1852_v45 = vmul.f32 %v1850_v23, %v1833_v19 }
0x1af7   :  { %1921 = vrot.lane.b32.xlu1 %v1852_v45, %s3014_s14 }
0x1af8   :  { %v1767_v46 = vpop.permute.xlu1 %1766 }
0x1af9   :  { %v1769_v47 = vmul.f32 %v1767_v46, %v1747_v24 }
0x1afb   :  { %v1854_v31 = vrot.slane %v1769_v47, 6 }
0x1afc   :  { %v102_v60 = vpop.permute.xlu2 %101 }
0x1afd   :  { %1855 = vrot.lane.b32.xlu0 %v1854_v31, %s3014_s14  ;;  %v110_v42 = vmul.f32 %v3476_v21, %v102_v60 }
0x1aff   :  { %v3641_v32 = vadd.f32 %v3483_v10, %v110_v42 }
0x1b69   :  { %v1922_v33 = vpop.permute.xlu1 %1921 }
0x1b6a   :  { %2635 = vmatmul.msk.f32.vlgmr.msra.gmra.mxu3 %vm119_vm4, %v1922_v33 }
0x1b6b   :  { %2326 = vmatpush.msra.mxu3 %v2942_v7 }
0x1b6d   :  { %2327 = vmatpush.msra.mxu3 %v2943_v48  ;;  %v2950_v48 = vld [vmem:[#allocation3 + $0x10] sm:$0xff] }
0x1b6f   :  { %v1856_v13 = vpop.permute.xlu0 %1855  ;;  %2328 = vmatpush.msra.mxu3 %v2944_v14  ;;  %v2952_v14 = vld [vmem:[#allocation3 + $0x8] sm:$0xff] }
0x1b70   :  { %2633 = vmatmul.msk.f32.vlgmr.msra.gmra.mxu2 %vm119_vm4, %v1856_v13  ;;  %2636 = vmatmul.msk.f32.vlgmr.msrb.gmra.mxu0 %vm119_vm4, %v1856_v13  ;;  %v2951_v13 = vld [vmem:[#allocation5] sm:$0xff] }
0x1b71   :  { %2262 = vmatpush.msra.mxu2 %v3619_v51  ;;  %2395 = vmatpush.msrb.mxu0 %v3622_v38 }
0x1b72   :  { %2329 = vmatpush.msra.mxu3 %v2947_v15 }
0x1b73   :  { %2263 = vmatpush.msra.mxu2 %v3414_v3  ;;  %2396 = vmatpush.msrb.mxu0 %v3629_v52 }
0x1b75   :  { %2264 = vmatpush.msra.mxu2 %v3419_v35  ;;  %2397 = vmatpush.msrb.mxu0 %v3633_v40 }
0x1b77   :  { %2265 = vmatpush.msra.mxu2 %v3424_v5  ;;  %2398 = vmatpush.msrb.mxu0 %v3428_v36 }
0x1bed   :  { %v1942_v54 = vpop.f32.mrf.mxu3  ;;  %v1962_v41 = vpop.f32.mrf.mxu0 }
0x1bee   :  { %v1963_v3 = vadd.f32 %v1962_v41, %v1942_v54 }
0x1bf0   :  { %v1965_v55 = vadd.f32 %v3435_v6, %v1963_v3 }
0x1bf2   :  { %2855 = vtanh.f32 %v1965_v55  ;;  %v2637_v36 = vmul.f32 -1.442695, %v1965_v55 }
0x1bf3   :  { %v1876_v35 = vpop.f32.mrf.mxu2 }
0x1bf4   :  { %v1879_v56 = vadd.f32 %v1876_v35, %v3641_v32 }
0x1bf6   :  { %2857 = vtanh.f32 %v1879_v56  ;;  %v2634_v21 = vmul.f32 -1.442695, %v1879_v56 }
0x1bf7   :  { %2859 = vpow2.f32 %v2637_v36 }
0x1bf8   :  { %v2856_v58 = vpop.eup %2855  ;;  %2861 = vpow2.f32 %v2634_v21 }
0x1bf9   :  { %1988 = vrot.lane.b32.xlu1 %v2856_v58, %s3013_s13 }
0x1bfc   :  { %v2858_v5 = vpop.eup %2857 }
0x1bfd   :  { %1905 = vrot.lane.b32.xlu0 %v2858_v5, %s3013_s13  ;;  %v2860_v59 = vpop.eup %2859 }
0x1bfe   :  { %v1969_v6 = vadd.f32 1.0, %v2860_v59  ;;  %v2862_v44 = vpop.eup %2861 }
0x1bff   :  { %v1883_v10 = vadd.f32 1.0, %v2862_v44 }
0x1c00   :  { %2863 = vrcp.f32 %v1969_v6  ;;  %v1981_v49 = vand.u32 2147483648, %v1969_v6  ;;  %vm1975_vm3 = vweird.f32 %v1969_v6  ;;  %v1979_v2 = vand.u32 2147483647, %v1969_v6 }
0x1c01   :  { %2865 = vrcp.f32 %v1883_v10  ;;  %v1895_v39 = vand.u32 2147483648, %v1883_v10  ;;  %vm1889_vm8 = vweird.f32 %v1883_v10  ;;  %v1893_v19 = vand.u32 2147483647, %v1883_v10 }
0x1c02   :  { %v1982_v18 = vor.u32 1.1754944e-38, %v1981_v49  ;;  %vm1980_vm7 = vcmp.eq.f32.partialorder %v1979_v2, 8.507059e+37 }
0x1c03   :  { %v1896_v24 = vor.u32 1.1754944e-38, %v1895_v39  ;;  %vm1894_vm10 = vcmp.eq.f32.partialorder %v1893_v19, 8.507059e+37 }
0x1c06   :  { %v2864_v25 = vpop.eup %2863 }
0x1c07   :  { %v1971_v62 = vmul.f32 %v2864_v25, %v1969_v6  ;;  %v2866_v1 = vpop.eup %2865  ;;  %vm1976_vm2 = vweird.f32 %v2864_v25 }
0x1c08   :  { %v1885_v4 = vmul.f32 %v2866_v1, %v1883_v10  ;;  %vm1977_vm5 = vmor %vm1975_vm3, %vm1976_vm2  ;;  %vm1890_vm6 = vweird.f32 %v2866_v1 }
0x1c09   :  { %v1972_v0 = vsub.f32 1.0, %v1971_v62  ;;  %vm1891_vm9 = vmor %vm1889_vm8, %vm1890_vm6 }
0x1c0a   :  { %v1886_v57 = vsub.f32 1.0, %v1885_v4 }
0x1c0b   :  { %v1973_v9 = vmul.f32 %v2864_v25, %v1972_v0 }
0x1c0c   :  { %v1887_v63 = vmul.f32 %v2866_v1, %v1886_v57 }
0x1c0d   :  { %v1974_v11 = vadd.f32 %v2864_v25, %v1973_v9 }
0x1c0e   :  { %v1888_v37 = vadd.f32 %v2866_v1, %v1887_v63 }
0x1c0f   :  { %v1978_v16 = vsel %vm1977_vm5, %v2864_v25, %v1974_v11 }
0x1c10   :  { %v1983_v8 = vsel %vm1980_vm7, %v1982_v18, %v1978_v16  ;;  %v1892_v22 = vsel %vm1891_vm9, %v2866_v1, %v1888_v37 }
0x1c11   :  { %v1897_v50 = vsel %vm1894_vm10, %v1896_v24, %v1892_v22  ;;  %v1986_v29 = vmul.f32 %v1983_v8, %v3598_v34 }
0x1c12   :  { %v1903_v28 = vmul.f32 %v1901_v53, %v1897_v50 }
0x1c6b   :  { %v1989_v20 = vpop.permute.xlu1 %1988 }
0x1c6c   :  { %v1991_v61 = vmul.f32 %v1989_v20, %v1983_v8 }
0x1c6e   :  { %1993 = vrot.lane.b32.xlu0 %v1991_v61, %s3013_s13 }
0x1c6f   :  { %v1906_v26 = vpop.permute.xlu0 %1905 }
0x1c70   :  { %v1908_v27 = vmul.f32 %v1906_v26, %v1897_v50 }
0x1c72   :  { %1910 = vrot.lane.b32.xlu2 %v1908_v27, %s3013_s13 }
0x1ccc   :  { %v1911_v30 = vpop.permute.xlu2 %1910 }
0x1ccd   :  { %v3649_v12 = vadd.f32 %v1911_v30, %v1903_v28 }
0x1ccf   :  { %2867 = vtanh.f32 %v3649_v12  ;;  %v2053_v24 = vrot.slane %v3649_v12, 6 }
0x1cd5   :  { %v2868_v43 = vpop.eup %2867 }
0x1cd6   :  { %1916 = vrot.lane.b32.xlu1 %v2868_v43, %s3013_s13 }
0x1ce0   :  { %v1994_v23 = vpop.permute.xlu0 %1993 }
0x1ce1   :  { %v3654_v45 = vadd.f32 %v1994_v23, %v1986_v29 }
0x1ce3   :  { %2869 = vtanh.f32 %v3654_v45 }
0x1ce9   :  { %v2870_v46 = vpop.eup %2869 }
0x1cea   :  { %1999 = vrot.lane.b32.xlu2 %v2870_v46, %s3013_s13 }
0x1d44   :  { %v2000_v17 = vpop.permute.xlu2 %1999 }
0x1d45   :  { %v2002_v47 = vmul.f32 %v2000_v17, %v1983_v8 }
0x1d47   :  { %2073 = vrot.lane.b32.xlu1 %v2002_v47, %s3014_s14 }
0x1d48   :  { %v1917_v31 = vpop.permute.xlu1 %1916 }
0x1d49   :  { %v1919_v33 = vmul.f32 %v1917_v31, %v1897_v50 }
0x1d4b   :  { %2004 = vrot.lane.b32.xlu0 %v1919_v33, %s3014_s14 }
0x1db9   :  { %v2074_v7 = vpop.permute.xlu1 %2073 }
0x1dba   :  { %2640 = vmatmul.msk.f32.vlgmr.msrb.gmra.mxu2 %vm119_vm4, %v2074_v7 }
0x1dbb   :  { %2478 = vmatpush.msrb.mxu2 %v3622_v38  ;;  %v2953_v38 = vld [vmem:[#allocation3] sm:$0xff] }
0x1dbd   :  { %v2005_v34 = vpop.permute.xlu0 %2004  ;;  %2479 = vmatpush.msrb.mxu2 %v3629_v52 }
0x1dbe   :  { %2638 = vmatmul.msk.f32.vlgmr.msrb.gmra.mxu1 %vm119_vm4, %v2005_v34  ;;  %2641 = vmatmul.msk.f32.vlgmr.msrb.gmra.mxu3 %vm119_vm4, %v2005_v34 }
0x1dbf   :  { %2415 = vmatpush.msrb.mxu1 %v3619_v51  ;;  %2480 = vmatpush.msrb.mxu2 %v3633_v40 }
0x1dc0   :  { %2504 = vmatpush.msrb.mxu3 %v3619_v51  ;;  %v3672_v51 = vld [vmem:[%s3747_s6] ss:$0 sm:$0xff] }
0x1dc1   :  { %2416 = vmatpush.msrb.mxu1 %v2950_v48  ;;  %2481 = vmatpush.msrb.mxu2 %v2951_v13 }
0x1dc2   :  { %2505 = vmatpush.msrb.mxu3 %v2950_v48 }
0x1dc3   :  { %2417 = vmatpush.msrb.mxu1 %v2952_v14 }
0x1dc4   :  { %2506 = vmatpush.msrb.mxu3 %v2952_v14 }
0x1dc5   :  { %2418 = vmatpush.msrb.mxu1 %v2953_v38 }
0x1dc6   :  { %2507 = vmatpush.msrb.mxu3 %v2953_v38 }
0x1e3b   :  { %v2025_v15 = vpop.f32.mrf.mxu1 }
0x1e3c   :  { %v2029_v52 = vrot.slane %v2025_v15, 6 }
0x1e3d   :  { %v2094_v54 = vpop.f32.mrf.mxu2 }
0x1e3e   :  { %v2031_v60 = vadd.f32 %v2029_v52, %v3641_v32 }
0x1e40   :  { %2871 = vtanh.f32 %v2031_v60  ;;  %v2639_v35 = vmul.f32 -1.442695, %v2031_v60 }
0x1e41   :  { %v2114_v40 = vpop.f32.mrf.mxu3 }
0x1e42   :  { %v2115_v41 = vadd.f32 %v2114_v40, %v2094_v54 }
0x1e44   :  { %v2117_v42 = vadd.f32 %v3672_v51, %v2115_v41 }
0x1e46   :  { %v2872_v3 = vpop.eup %2871  ;;  %2873 = vtanh.f32 %v2117_v42  ;;  %v2642_v21 = vmul.f32 -1.442695, %v2117_v42 }
0x1e47   :  { %2057 = vrot.lane.b32.xlu2 %v2872_v3, %s3013_s13  ;;  %2875 = vpow2.f32 %v2639_v35 }
0x1e4c   :  { %v2874_v55 = vpop.eup %2873 }
0x1e4d   :  { %2140 = vrot.lane.b32.xlu0 %v2874_v55, %s3013_s13  ;;  %v2876_v56 = vpop.eup %2875 }
0x1e4e   :  { %v2035_v58 = vadd.f32 1.0, %v2876_v56 }
0x1e50   :  { %2877 = vrcp.f32 %v2035_v58  ;;  %v2047_v10 = vand.u32 2147483648, %v2035_v58  ;;  %vm2041_vm12 = vweird.f32 %v2035_v58  ;;  %v2045_v62 = vand.u32 2147483647, %v2035_v58 }
0x1e51   :  { %2879 = vpow2.f32 %v2642_v21 }
0x1e52   :  { %v2048_v4 = vor.u32 1.1754944e-38, %v2047_v10  ;;  %vm2046_vm14 = vcmp.eq.f32.partialorder %v2045_v62, 8.507059e+37 }
0x1e56   :  { %v2878_v5 = vpop.eup %2877 }
0x1e57   :  { %v2037_v36 = vmul.f32 %v2878_v5, %v2035_v58  ;;  %vm2042_vm11 = vweird.f32 %v2878_v5  ;;  %v2880_v25 = vpop.eup %2879 }
0x1e58   :  { %vm2043_vm13 = vmor %vm2041_vm12, %vm2042_vm11  ;;  %v2121_v0 = vadd.f32 1.0, %v2880_v25 }
0x1e59   :  { %v2038_v59 = vsub.f32 1.0, %v2037_v36 }
0x1e5a   :  { %2881 = vrcp.f32 %v2121_v0  ;;  %v2133_v18 = vand.u32 2147483648, %v2121_v0  ;;  %vm2127_vm0 = vweird.f32 %v2121_v0  ;;  %v2131_v39 = vand.u32 2147483647, %v2121_v0 }
0x1e5b   :  { %v2039_v6 = vmul.f32 %v2878_v5, %v2038_v59 }
0x1e5c   :  { %v2134_v20 = vor.u32 1.1754944e-38, %v2133_v18  ;;  %vm2132_vm2 = vcmp.eq.f32.partialorder %v2131_v39, 8.507059e+37 }
0x1e5d   :  { %v2040_v44 = vadd.f32 %v2878_v5, %v2039_v6 }
0x1e5f   :  { %v2044_v1 = vsel %vm2043_vm13, %v2878_v5, %v2040_v44 }
0x1e60   :  { %v2049_v57 = vsel %vm2046_vm14, %v2048_v4, %v2044_v1  ;;  %v2882_v63 = vpop.eup %2881 }
0x1e61   :  { %v2123_v49 = vmul.f32 %v2882_v63, %v2121_v0  ;;  %vm2128_vm15 = vweird.f32 %v2882_v63  ;;  %v2055_v26 = vmul.f32 %v2053_v24, %v2049_v57 }
0x1e62   :  { %vm2129_vm1 = vmor %vm2127_vm0, %vm2128_vm15 }
0x1e63   :  { %v2124_v2 = vsub.f32 1.0, %v2123_v49 }
0x1e65   :  { %v2125_v16 = vmul.f32 %v2882_v63, %v2124_v2 }
0x1e67   :  { %v2126_v37 = vadd.f32 %v2882_v63, %v2125_v16 }
0x1e69   :  { %v2130_v19 = vsel %vm2129_vm1, %v2882_v63, %v2126_v37 }
0x1e6a   :  { %v2135_v61 = vsel %vm2132_vm2, %v2134_v20, %v2130_v19 }
0x1e6b   :  { %v2138_v53 = vmul.f32 %v2135_v61, %v3654_v45 }
0x1ea1   :  { %v2058_v9 = vpop.permute.xlu2 %2057 }
0x1ea2   :  { %v2060_v11 = vmul.f32 %v2058_v9, %v2049_v57 }
0x1ea4   :  { %2062 = vrot.lane.b32.xlu1 %v2060_v11, %s3013_s13 }
0x1ebf   :  { %v2141_v8 = vpop.permute.xlu0 %2140 }
0x1ec0   :  { %v2143_v22 = vmul.f32 %v2141_v8, %v2135_v61 }
0x1ec2   :  { %2145 = vrot.lane.b32.xlu2 %v2143_v22, %s3013_s13 }
0x1f16   :  { %v2063_v50 = vpop.permute.xlu1 %2062 }
0x1f17   :  { %v3680_v27 = vadd.f32 %v2063_v50, %v2055_v26 }
0x1f19   :  { %2883 = vtanh.f32 %v3680_v27  ;;  %v2206_v18 = vrot.slane %v3680_v27, 6 }
0x1f1c   :  { %v2146_v28 = vpop.permute.xlu2 %2145 }
0x1f1d   :  { %v3684_v30 = vadd.f32 %v2146_v28, %v2138_v53 }
0x1f1f   :  { %v2884_v43 = vpop.eup %2883  ;;  %2885 = vtanh.f32 %v3684_v30 }
0x1f20   :  { %2068 = vrot.lane.b32.xlu0 %v2884_v43, %s3013_s13 }
0x1f25   :  { %v2886_v29 = vpop.eup %2885 }
0x1f26   :  { %2151 = vrot.lane.b32.xlu1 %v2886_v29, %s3013_s13 }
0x1f92   :  { %v2069_v12 = vpop.permute.xlu0 %2068 }
0x1f93   :  { %v2071_v23 = vmul.f32 %v2069_v12, %v2049_v57 }
0x1f95   :  { %v2156_v46 = vrot.slane %v2071_v23, 2 }
0x1f97   :  { %2157 = vrot.lane.b32.xlu2 %v2156_v46, %s3014_s14 }
0x1f98   :  { %v2152_v17 = vpop.permute.xlu1 %2151 }
0x1f99   :  { %v2154_v47 = vmul.f32 %v2152_v17, %v2135_v61 }
0x1f9b   :  { %2226 = vrot.lane.b32.xlu0 %v2154_v47, %s3014_s14 }
0x1ff1   :  { %v2158_v45 = vpop.permute.xlu2 %2157 }
0x1ff2   :  { %2643 = vmatmul.msk.f32.vlgmr.msra.gmra.mxu0 %vm119_vm4, %v2158_v45  ;;  %2646 = vmatmul.msk.f32.vlgmr.msra.gmra.mxu2 %vm119_vm4, %v2158_v45 }
0x200d   :  { %v2227_v31 = vpop.permute.xlu0 %2226 }
0x200e   :  { %2645 = vmatmul.msk.f32.vlgmr.msra.gmra.mxu1 %vm119_vm4, %v2227_v31 }
0x206f   :  { %v2178_v33 = vpop.f32.mrf.mxu0 }
0x2070   :  { %v2182_v7 = vrot.slane %v2178_v33, 4 }
0x2072   :  { %v2184_v34 = vadd.f32 %v2182_v7, %v3641_v32 }
0x2074   :  { %2887 = vtanh.f32 %v2184_v34  ;;  %v2644_v60 = vmul.f32 -1.442695, %v2184_v34 }
0x2075   :  { %v2267_v13 = vpop.f32.mrf.mxu2 }
0x207a   :  { %v2888_v48 = vpop.eup %2887 }
0x207b   :  { %2210 = vrot.lane.b32.xlu1 %v2888_v48, %s3013_s13 }
0x208b   :  { %v2247_v14 = vpop.f32.mrf.mxu1 }
0x208c   :  { %v2268_v38 = vadd.f32 %v2267_v13, %v2247_v14 }
0x208e   :  { %v2270_v15 = vadd.f32 %v3672_v51, %v2268_v38 }
0x2090   :  { %2889 = vtanh.f32 %v2270_v15  ;;  %v2647_v54 = vmul.f32 -1.442695, %v2270_v15 }
0x2091   :  { %2891 = vpow2.f32 %v2644_v60 }
0x2092   :  { %2893 = vpow2.f32 %v2647_v54 }
0x2096   :  { %v2890_v52 = vpop.eup %2889 }
0x2097   :  { %2293 = vrot.lane.b32.xlu2 %v2890_v52, %s3013_s13  ;;  %v2892_v40 = vpop.eup %2891 }
0x2098   :  { %v2188_v41 = vadd.f32 1.0, %v2892_v40  ;;  %v2894_v42 = vpop.eup %2893 }
0x2099   :  { %v2274_v3 = vadd.f32 1.0, %v2894_v42 }
0x209a   :  { %2895 = vrcp.f32 %v2188_v41  ;;  %v2200_v44 = vand.u32 2147483648, %v2188_v41  ;;  %vm2194_vm5 = vweird.f32 %v2188_v41  ;;  %v2198_v10 = vand.u32 2147483647, %v2188_v41 }
0x209b   :  { %2897 = vrcp.f32 %v2274_v3  ;;  %v2286_v0 = vand.u32 2147483648, %v2274_v3  ;;  %vm2280_vm9 = vweird.f32 %v2274_v3  ;;  %v2284_v4 = vand.u32 2147483647, %v2274_v3 }
0x209c   :  { %v2201_v1 = vor.u32 1.1754944e-38, %v2200_v44  ;;  %vm2199_vm8 = vcmp.eq.f32.partialorder %v2198_v10, 8.507059e+37 }
0x209d   :  { %v2287_v49 = vor.u32 1.1754944e-38, %v2286_v0  ;;  %vm2285_vm11 = vcmp.eq.f32.partialorder %v2284_v4, 8.507059e+37 }
0x20a0   :  { %v2896_v55 = vpop.eup %2895 }
0x20a1   :  { %v2190_v35 = vmul.f32 %v2896_v55, %v2188_v41  ;;  %v2898_v56 = vpop.eup %2897  ;;  %vm2195_vm3 = vweird.f32 %v2896_v55 }
0x20a2   :  { %v2276_v5 = vmul.f32 %v2898_v56, %v2274_v3  ;;  %vm2196_vm6 = vmor %vm2194_vm5, %vm2195_vm3  ;;  %vm2281_vm7 = vweird.f32 %v2898_v56 }
0x20a3   :  { %v2191_v58 = vsub.f32 1.0, %v2190_v35  ;;  %vm2282_vm10 = vmor %vm2280_vm9, %vm2281_vm7  ;;  %vm2570_vm9 = vcmask 1024  }
0x20a4   :  { %v2277_v21 = vsub.f32 1.0, %v2276_v5 }
0x20a5   :  { %v2192_v36 = vmul.f32 %v2896_v55, %v2191_v58 }
0x20a6   :  { %v2278_v6 = vmul.f32 %v2898_v56, %v2277_v21 }
0x20a7   :  { %v2193_v59 = vadd.f32 %v2896_v55, %v2192_v36 }
0x20a8   :  { %v2279_v62 = vadd.f32 %v2898_v56, %v2278_v6 }
0x20a9   :  { %v2197_v25 = vsel %vm2196_vm6, %v2896_v55, %v2193_v59 }
0x20aa   :  { %v2202_v9 = vsel %vm2199_vm8, %v2201_v1, %v2197_v25  ;;  %v2283_v63 = vsel %vm2282_vm10, %v2898_v56, %v2279_v62  ;;  %vm2561_vm8 = vcmask 254976  }
0x20ab   :  { %v2288_v16 = vsel %vm2285_vm11, %v2287_v49, %v2283_v63  ;;  %v2208_v39 = vmul.f32 %v2206_v18, %v2202_v9 }
0x20ac   :  { %v2291_v8 = vmul.f32 %v2288_v16, %v3684_v30 }
0x20ed   :  { %v2211_v57 = vpop.permute.xlu1 %2210 }
0x20ee   :  { %v2213_v11 = vmul.f32 %v2211_v57, %v2202_v9 }
0x20f0   :  { %2215 = vrot.lane.b32.xlu0 %v2213_v11, %s3013_s13 }
0x20f1   :  { %v2294_v2 = vpop.permute.xlu2 %2293 }
0x20f2   :  { %v2296_v37 = vmul.f32 %v2294_v2, %v2288_v16 }
0x20f4   :  { %2298 = vrot.lane.b32.xlu1 %v2296_v37, %s3013_s13 }
0x2162   :  { %v2216_v19 = vpop.permute.xlu0 %2215 }
0x2163   :  { %v3701_v20 = vadd.f32 %v2216_v19, %v2208_v39 }
0x2165   :  { %2899 = vtanh.f32 %v3701_v20 }
0x2166   :  { %v2299_v61 = vpop.permute.xlu1 %2298 }
0x2167   :  { %v3705_v22 = vadd.f32 %v2299_v61, %v2291_v8 }
0x2169   :  { %2901 = vtanh.f32 %v3705_v22 }
0x216b   :  { %v2900_v24 = vpop.eup %2899 }
0x216c   :  { %2221 = vrot.lane.b32.xlu2 %v2900_v24, %s3013_s13 }
0x216f   :  { %v2902_v26 = vpop.eup %2901 }
0x2170   :  { %2304 = vrot.lane.b32.xlu0 %v2902_v26, %s3013_s13 }
0x21c6   :  { %v2222_v50 = vpop.permute.xlu2 %2221 }
0x21c7   :  { %v2224_v27 = vmul.f32 %v2222_v50, %v2202_v9  ;;  %v2359_v9 = vrot.slane %v3701_v20, 6 }
0x21c9   :  { %v2309_v53 = vrot.slane %v2224_v27, 4 }
0x21cb   :  { %2310 = vrot.lane.b32.xlu1 %v2309_v53, %s3014_s14 }
0x21e2   :  { %v2305_v28 = vpop.permute.xlu0 %2304 }
0x21e3   :  { %v2307_v43 = vmul.f32 %v2305_v28, %v2288_v16 }
0x21e5   :  { %2379 = vrot.lane.b32.xlu2 %v2307_v43, %s3014_s14 }
0x223d   :  { %v2311_v30 = vpop.permute.xlu1 %2310 }
0x223e   :  { %2648 = vmatmul.msk.f32.vlgmr.msra.gmra.mxu3 %vm119_vm4, %v2311_v30  ;;  %2651 = vmatmul.msk.f32.vlgmr.msrb.gmra.mxu1 %vm119_vm4, %v2311_v30 }
0x223f   :  { %v2380_v29 = vpop.permute.xlu2 %2379 }
0x2240   :  { %2650 = vmatmul.msk.f32.vlgmr.msrb.gmra.mxu0 %vm119_vm4, %v2380_v29 }
0x22bb   :  { %v2420_v12 = vpop.f32.mrf.mxu1 }
0x22bd   :  { %v2400_v23 = vpop.f32.mrf.mxu0 }
0x22be   :  { %v2421_v46 = vadd.f32 %v2420_v12, %v2400_v23 }
0x22c0   :  { %v2423_v17 = vadd.f32 %v3672_v51, %v2421_v46 }
0x22c1   :  { %v2331_v47 = vpop.f32.mrf.mxu3 }
0x22c2   :  { %2903 = vtanh.f32 %v2423_v17  ;;  %v2335_v45 = vrot.slane %v2331_v47, 2  ;;  %v2652_v34 = vmul.f32 -1.442695, %v2423_v17 }
0x22c4   :  { %v2337_v31 = vadd.f32 %v2335_v45, %v3641_v32 }
0x22c6   :  { %2905 = vtanh.f32 %v2337_v31  ;;  %v2649_v48 = vmul.f32 -1.442695, %v2337_v31 }
0x22c7   :  { %2907 = vpow2.f32 %v2652_v34 }
0x22c8   :  { %v2904_v33 = vpop.eup %2903  ;;  %2909 = vpow2.f32 %v2649_v48 }
0x22c9   :  { %2446 = vrot.lane.b32.xlu1 %v2904_v33, %s3013_s13 }
0x22cc   :  { %v2906_v7 = vpop.eup %2905 }
0x22cd   :  { %2363 = vrot.lane.b32.xlu0 %v2906_v7, %s3013_s13  ;;  %v2908_v13 = vpop.eup %2907 }
0x22ce   :  { %v2427_v14 = vadd.f32 1.0, %v2908_v13  ;;  %v2910_v38 = vpop.eup %2909  ;;  %v2669_v13 = vld [vmem:[%s3748_s7] ss:$0 sm:$0xff] }
0x22cf   :  { %v2341_v15 = vadd.f32 1.0, %v2910_v38 }
0x22d0   :  { %2911 = vrcp.f32 %v2427_v14  ;;  %v2439_v35 = vand.u32 2147483648, %v2427_v14  ;;  %vm2433_vm13 = vweird.f32 %v2427_v14  ;;  %v2437_v56 = vand.u32 2147483647, %v2427_v14 }
0x22d1   :  { %2913 = vrcp.f32 %v2341_v15  ;;  %v2353_v21 = vand.u32 2147483648, %v2341_v15  ;;  %vm2347_vm1 = vweird.f32 %v2341_v15  ;;  %v2351_v59 = vand.u32 2147483647, %v2341_v15 }
0x22d2   :  { %v2440_v36 = vor.u32 1.1754944e-38, %v2439_v35  ;;  %vm2438_vm0 = vcmp.eq.f32.partialorder %v2437_v56, 8.507059e+37 }
0x22d3   :  { %v2354_v62 = vor.u32 1.1754944e-38, %v2353_v21  ;;  %vm2352_vm3 = vcmp.eq.f32.partialorder %v2351_v59, 8.507059e+37 }
0x22d6   :  { %v2912_v52 = vpop.eup %2911 }
0x22d7   :  { %v2429_v60 = vmul.f32 %v2912_v52, %v2427_v14  ;;  %v2914_v32 = vpop.eup %2913  ;;  %vm2434_vm12 = vweird.f32 %v2912_v52 }
0x22d8   :  { %v2343_v40 = vmul.f32 %v2914_v32, %v2341_v15  ;;  %vm2435_vm14 = vmor %vm2433_vm13, %vm2434_vm12  ;;  %vm2348_vm15 = vweird.f32 %v2914_v32 }
0x22d9   :  { %v2430_v54 = vsub.f32 1.0, %v2429_v60  ;;  %vm2349_vm2 = vmor %vm2347_vm1, %vm2348_vm15 }
0x22da   :  { %v2344_v42 = vsub.f32 1.0, %v2343_v40 }
0x22db   :  { %v2431_v41 = vmul.f32 %v2912_v52, %v2430_v54 }
0x22dc   :  { %v2345_v55 = vmul.f32 %v2914_v32, %v2344_v42 }
0x22dd   :  { %v2432_v3 = vadd.f32 %v2912_v52, %v2431_v41 }
0x22de   :  { %v2346_v5 = vadd.f32 %v2914_v32, %v2345_v55 }
0x22df   :  { %v2436_v58 = vsel %vm2435_vm14, %v2912_v52, %v2432_v3  ;;  %v2670_v3 = vld [vmem:[#allocation2] ss:$0 sm:$0xff] }
0x22e0   :  { %v2441_v44 = vsel %vm2438_vm0, %v2440_v36, %v2436_v58  ;;  %v2350_v25 = vsel %vm2349_vm2, %v2914_v32, %v2346_v5 }
0x22e1   :  { %v2355_v0 = vsel %vm2352_vm3, %v2354_v62, %v2350_v25  ;;  %v2444_v2 = vmul.f32 %v2441_v44, %v3705_v22 }
0x22e2   :  { %v2361_v57 = vmul.f32 %v2359_v9, %v2355_v0 }
0x233b   :  { %v2447_v6 = vpop.permute.xlu1 %2446 }
0x233c   :  { %v2449_v10 = vmul.f32 %v2447_v6, %v2441_v44 }
0x233e   :  { %2451 = vrot.lane.b32.xlu0 %v2449_v10, %s3013_s13 }
0x233f   :  { %v2364_v1 = vpop.permute.xlu0 %2363 }
0x2340   :  { %v2366_v4 = vmul.f32 %v2364_v1, %v2355_v0 }
0x2342   :  { %2368 = vrot.lane.b32.xlu2 %v2366_v4, %s3013_s13 }
0x239c   :  { %v2369_v11 = vpop.permute.xlu2 %2368 }
0x239d   :  { %v2371_v63 = vadd.f32 %v2369_v11, %v2361_v57 }
0x239f   :  { %2915 = vtanh.f32 %v2371_v63 }
0x23a5   :  { %v2916_v49 = vpop.eup %2915 }
0x23a6   :  { %2374 = vrot.lane.b32.xlu1 %v2916_v49, %s3013_s13 }
0x23b0   :  { %v2452_v16 = vpop.permute.xlu0 %2451 }
0x23b1   :  { %v2454_v37 = vadd.f32 %v2452_v16, %v2444_v2 }
0x23b3   :  { %2917 = vtanh.f32 %v2454_v37 }
0x23b9   :  { %v2918_v18 = vpop.eup %2917 }
0x23ba   :  { %2457 = vrot.lane.b32.xlu2 %v2918_v18, %s3013_s13 }
0x2414   :  { %v2458_v39 = vpop.permute.xlu2 %2457 }
0x2415   :  { %v2460_v19 = vmul.f32 %v2458_v39, %v2441_v44 }
0x2417   :  { %2462 = vrot.lane.b32.xlu0 %v2460_v19, %s3014_s14 }
0x2418   :  { %v2375_v20 = vpop.permute.xlu1 %2374 }
0x2419   :  { %v2377_v8 = vmul.f32 %v2375_v20, %v2355_v0 }
0x241b   :  { %v2487_v61 = vrot.slane %v2377_v8, 6 }
0x241d   :  { %2488 = vrot.lane.b32.xlu1 %v2487_v61, %s3014_s14 }
0x2489   :  { %v2463_v24 = vpop.permute.xlu0 %2462 }
0x248a   :  { %2653 = vmatmul.msk.f32.vlgmr.msrb.gmra.mxu2 %vm119_vm4, %v2463_v24 }
0x248f   :  { %v2489_v26 = vpop.permute.xlu1 %2488 }
0x2490   :  { %2654 = vmatmul.msk.f32.vlgmr.msrb.gmra.mxu3 %vm119_vm4, %v2489_v26 }
0x250d   :  { %v2483_v22 = vpop.f32.mrf.mxu2 }
0x2513   :  { %v2509_v50 = vpop.f32.mrf.mxu3 }
0x2514   :  { %v2510_v27 = vadd.f32 %v2509_v50, %v2483_v22 }
0x2516   :  { %v2512_v53 = vadd.f32 %v3672_v51, %v2510_v27 }
0x2518   :  { %2919 = vtanh.f32 %v2512_v53  ;;  %v2655_v43 = vmul.f32 -1.442695, %v2512_v53 }
0x251a   :  { %2921 = vpow2.f32 %v2655_v43 }
0x251e   :  { %v2920_v28 = vpop.eup %2919 }
0x251f   :  { %2535 = vrot.lane.b32.xlu2 %v2920_v28, %s3013_s13 }
0x2520   :  { %v2922_v30 = vpop.eup %2921 }
0x2521   :  { %v2516_v29 = vadd.f32 1.0, %v2922_v30 }
0x2523   :  { %2923 = vrcp.f32 %v2516_v29  ;;  %v2528_v45 = vand.u32 2147483648, %v2516_v29  ;;  %vm2522_vm5 = vweird.f32 %v2516_v29  ;;  %v2526_v31 = vand.u32 2147483647, %v2516_v29 }
0x2525   :  { %v2529_v33 = vor.u32 1.1754944e-38, %v2528_v45  ;;  %vm2527_vm7 = vcmp.eq.f32.partialorder %v2526_v31, 8.507059e+37 }
0x2527   :  { %2553 = vrot.lane.b32.xlu2 %v2669_v13, %s3014_s14 }
0x2529   :  { %v2924_v12 = vpop.eup %2923 }
0x252a   :  { %v2518_v23 = vmul.f32 %v2924_v12, %v2516_v29  ;;  %vm2523_vm4 = vweird.f32 %v2924_v12 }
0x252b   :  { %vm2524_vm6 = vmor %vm2522_vm5, %vm2523_vm4 }
0x252c   :  { %v2519_v46 = vsub.f32 1.0, %v2518_v23 }
0x252e   :  { %v2520_v17 = vmul.f32 %v2924_v12, %v2519_v46 }
0x2530   :  { %v2521_v47 = vadd.f32 %v2924_v12, %v2520_v17 }
0x2532   :  { %v2525_v51 = vsel %vm2524_vm6, %v2924_v12, %v2521_v47 }
0x2533   :  { %v2530_v34 = vsel %vm2527_vm7, %v2529_v33, %v2525_v51 }
0x2534   :  { %v2533_v14 = vmul.f32 %v2530_v34, %v2454_v37 }
0x2579   :  { %v2536_v7 = vpop.permute.xlu2 %2535 }
0x257a   :  { %v2538_v48 = vmul.f32 %v2536_v7, %v2530_v34 }
0x257c   :  { %2540 = vrot.lane.b32.xlu0 %v2538_v48, %s3013_s13 }
0x2581   :  { %v2554_v32 = vpop.permute.xlu2 %2553 }
0x25ee   :  { %v2541_v38 = vpop.permute.xlu0 %2540 }
0x25ef   :  { %v2543_v15 = vadd.f32 %v2541_v38, %v2533_v14 }
0x25f1   :  { %2925 = vtanh.f32 %v2543_v15 }
0x25f7   :  { %v2926_v52 = vpop.eup %2925 }
0x25f8   :  { %2546 = vrot.lane.b32.xlu1 %v2926_v52, %s3013_s13 }
0x266a   :  { %v2547_v60 = vpop.permute.xlu1 %2546 }
0x266b   :  { %v2549_v54 = vmul.f32 %v2547_v60, %v2530_v34 }
0x266d   :  { %v2556_v40 = vmul.f32 %v2554_v32, %v2549_v54 }
0x266f   :  { %2558 = vrot.lane.b32.xlu0 %v2556_v40, %s3014_s14 }
0x26e1   :  { %v2559_v41 = vpop.permute.xlu0 %2558 }
0x26e2   :  { %v2562_v42 = vsel %vm2561_vm8, %v2559_v41, 0.0 }
0x26e3   :  { %2563 = vadd.xlane.f32.xlu1 %v2562_v42 }
0x2756   :  { %v2564_v55 = vpop.xlane.xlu1 %2563 }
0x2757   :  { %v2569_v35 = vadd.f32 %v2670_v3, %v2564_v55 }
0x2759   :  { %2571 = vst.msk [vmem:[%s3750_s9] sm:$0x3] %vm2570_vm9, %v2569_v35 }
0x275a   :  { %2576 = vsyncpa [#allocation4], 1 }
0x275b   :  { %2577 = vsyncpa [#allocation6], 1 }

</bundles_post_ra>
